<compile_context>
chip_gen: v5e
topology: v5e:2x2
jax: 0.10.0
libtpu: 0.0.40
codegen_flags: <defaults>
</compile_context>

<pallas_src>
import functools

import numpy as np
import jax
import jax.numpy as jnp
from jax.experimental import pallas as pl
from jax.experimental.pallas import tpu as pltpu


# ------------------------------ Pallas kernel -------------------------------

def _basic_unit_kernel(x_ref, w1_ref, w2_ref, o_ref, *scratch,
                       H, W, k, cin, cmid, cout):
    """Fused Conv(kxk, pad p) -> ReLU -> Conv(kxk, pad p) for one image.

    x_ref:  (1, cin,  H*W)        flat NCHW input block (lane-dense)
    w1_ref: (k*k, cmid, cin)      conv1 weight, one (cmid, cin) matrix per tap
    w2_ref: (k*k, cout, cmid)     conv2 weight
    o_ref:  (1, cout, H*W)        flat NCHW output block (lane-dense)
    scratch (only when p > 0):
      xp_ref: (cin,  Np)  flat zero-padded input, row stride Wp = W + 2p
      mp_ref: (cmid, Np)  flat zero-padded ReLU(conv1) intermediate
    where Np = (H + 2p + 1) * Wp  (one extra zero row absorbs the tap-slice
    overrun on the last junk columns).

    Flat-shift convolution: with row stride Wp, the output at flat index
    n = h*Wp + w (w < W real, w >= W junk) for tap (dy, dx) reads the padded
    buffer at n + dy*Wp + dx, i.e. each tap is ONE contiguous slice -> one
    (C_out, C_in) @ (C_in, H*Wp) MXU dot, no relayout.
    """
    p = k // 2
    Wp = W + 2 * p
    HWp = H * Wp

    # ---------------- k == 1 fast path: no padding, no scratch ----------------
    if p == 0:
        xv = x_ref[0]                                        # (cin, H*W)
        acc1 = jnp.zeros((cmid, HWp), jnp.float32)
        for t in range(k * k):
            acc1 = acc1 + jnp.dot(w1_ref[t], xv,
                                  preferred_element_type=jnp.float32)
        mid = jnp.maximum(acc1, 0.0)
        acc2 = jnp.zeros((cout, HWp), jnp.float32)
        for t in range(k * k):
            acc2 = acc2 + jnp.dot(w2_ref[t], mid,
                                  preferred_element_type=jnp.float32)
        o_ref[0] = acc2.astype(o_ref.dtype)
        return

    xp_ref, mp_ref = scratch
    Np = xp_ref.shape[1]
    base = p * Wp + p                       # flat offset of interior (p, p)

    # ---- stage the unpadded input into a zero-padded flat staging buffer ----
    # xp is only cin channels (~3 vregs of stores here); zeroing it whole is
    # cheaper than zeroing its many small row gaps.  The big cmid-channel
    # buffer below only gets perimeter strips zeroed.
    xp_ref[...] = jnp.zeros_like(xp_ref)
    xv = x_ref[0]                                            # (cin, H*W)
    for h in range(H):
        d = (p + h) * Wp + p
        xp_ref[:, d:d + W] = xv[:, h * W:(h + 1) * W]

    # ---- conv1: k*k contiguous-slice (cmid, cin) @ (cin, H*Wp) MXU dots ----
    acc1 = jnp.zeros((cmid, HWp), jnp.float32)
    for dy in range(k):
        for dx in range(k):
            s = dy * Wp + dx
            acc1 = acc1 + jnp.dot(w1_ref[dy * k + dx], xp_ref[:, s:s + HWp],
                                  preferred_element_type=jnp.float32)
    mid = jnp.maximum(acc1, 0.0)                             # ReLU, f32

    # ---- intermediate stays on-chip; its zero halo implements conv2's pad ----
    # Zero only the perimeter strips (the interior is fully overwritten) ...
    mp_ref[:, 0:base] = jnp.zeros((cmid, base), jnp.float32)
    mp_ref[:, base + HWp:Np] = jnp.zeros((cmid, Np - base - HWp), jnp.float32)
    mp_ref[:, base:base + HWp] = mid
    # ... and the 2p junk columns of each interior row, which alias the
    # right/left halo of adjacent rows in the flat layout.
    for h in range(H):
        s = base + h * Wp + W
        mp_ref[:, s:s + 2 * p] = jnp.zeros((cmid, 2 * p), jnp.float32)

    # ---- conv2: k*k contiguous-slice (cout, cmid) @ (cmid, H*Wp) MXU dots ----
    acc2 = jnp.zeros((cout, HWp), jnp.float32)
    for dy in range(k):
        for dx in range(k):
            s = dy * Wp + dx
            acc2 = acc2 + jnp.dot(w2_ref[dy * k + dx], mp_ref[:, s:s + HWp],
                                  preferred_element_type=jnp.float32)

    # ---- drop the junk columns and store the lane-dense flat output ----
    outv = acc2.astype(o_ref.dtype)                          # (cout, H*Wp)
    for h in range(H):
        o_ref[0, :, h * W:(h + 1) * W] = outv[:, h * Wp:h * Wp + W]


# -------------------------------- wrapper ------------------------------------

def basic_unit_nchw(x, w1, w2, k):
    """BasicUnit forward on NCHW input; weights in PyTorch (Cout, Cin, k, k)."""
    B, cin, H, W = x.shape
    cmid = w1.shape[0]
    cout = w2.shape[0]
    assert k % 2 == 1, "padding=k//2 is 'same'-sized only for odd k"
    assert w1.shape == (cmid, cin, k, k), w1.shape
    assert w2.shape == (cout, cmid, k, k), w2.shape
    p = k // 2
    Wp = W + 2 * p
    Hp = H + 2 * p
    Np = (Hp + 1) * Wp          # +1 zero row absorbs the tap-slice overrun
    HW = H * W

    # Free metadata reshapes only (contiguous NCHW) -- no transposes, no pad.
    x_flat = x.reshape(B, cin, HW)

    # (Cout, Cin, k, k) -> per-tap matrices (k*k, Cout, Cin); tap = dy*k + dx.
    w1m = jnp.transpose(w1, (2, 3, 0, 1)).reshape(k * k, cmid, cin)
    w2m = jnp.transpose(w2, (2, 3, 0, 1)).reshape(k * k, cout, cmid)

    kernel = functools.partial(_basic_unit_kernel, H=H, W=W, k=k,
                               cin=cin, cmid=cmid, cout=cout)

    scratch = []
    if p > 0:
        scratch = [pltpu.VMEM((cin, Np), x.dtype),        # padded input stage
                   pltpu.VMEM((cmid, Np), jnp.float32)]   # padded ReLU(conv1)

    flops = 2 * B * k * k * HW * (cin * cmid + cmid * cout)
    bytes_accessed = int((x.size + w1.size + w2.size) * x.dtype.itemsize
                         + B * cout * HW * x.dtype.itemsize)

    out_flat = pl.pallas_call(
        kernel,
        out_shape=jax.ShapeDtypeStruct((B, cout, HW), x.dtype),
        grid=(B,),
        in_specs=[
            pl.BlockSpec((1, cin, HW), lambda b: (b, 0, 0)),
            pl.BlockSpec((k * k, cmid, cin), lambda b: (0, 0, 0)),   # resident
            pl.BlockSpec((k * k, cout, cmid), lambda b: (0, 0, 0)),  # resident
        ],
        out_specs=pl.BlockSpec((1, cout, HW), lambda b: (b, 0, 0)),
        scratch_shapes=scratch,
        compiler_params=pltpu.CompilerParams(
            dimension_semantics=("parallel",),
            vmem_limit_bytes=32 * 1024 * 1024),
        cost_estimate=pl.CostEstimate(flops=flops, transcendentals=0,
                                      bytes_accessed=bytes_accessed),
    )(x_flat, w1m, w2m)

    return out_flat.reshape(B, cout, H, W)


# ----------------------------- pure-JAX reference ---------------------------

def _conv_ref(x, w, p):
    return jax.lax.conv_general_dilated(
        x, w, window_strides=(1, 1), padding=[(p, p), (p, p)],
        dimension_numbers=("NCHW", "OIHW", "NCHW"),
        precision=jax.lax.Precision.HIGHEST)


def _basic_unit_ref(x, w1, w2, k):
    p = k // 2
    return _conv_ref(jnp.maximum(_conv_ref(x, w1, p), 0.0), w2, p)


# ----------------------------------- main ------------------------------------

if __name__ == "__main__":
    B, Cin, H, W = 2, 4, 16, 16
    Cmid, Cout, K = 32, 4, 3

    key = jax.random.PRNGKey(0)
    kx, k1, k2 = jax.random.split(key, 3)
    x = jax.random.normal(kx, (B, Cin, H, W), jnp.float32)

    # PyTorch default Conv2d init bound: 1/sqrt(fan_in)
    b1 = 1.0 / np.sqrt(Cin * K * K)
    b2 = 1.0 / np.sqrt(Cmid * K * K)
    w1 = jax.random.uniform(k1, (Cmid, Cin, K, K), jnp.float32, -b1, b1)
    w2 = jax.random.uniform(k2, (Cout, Cmid, K, K), jnp.float32, -b2, b2)

    fwd = jax.jit(functools.partial(basic_unit_nchw, k=K))
    out = fwd(x, w1, w2)
    jax.block_until_ready(out)
    assert out.shape == (B, Cout, H, W), out.shape
    assert out.dtype == jnp.float32

    ref = _basic_unit_ref(x, w1, w2, K)
    np.testing.assert_allclose(np.asarray(out), np.asarray(ref),
                               rtol=5e-3, atol=5e-3)

    # Also exercise the kernel_size=1 path (p = 0: no scratch, no halo).
    K1 = 1
    c1 = 1.0 / np.sqrt(Cin * K1 * K1)
    c2 = 1.0 / np.sqrt(Cmid * K1 * K1)
    w1s = jax.random.uniform(k1, (Cmid, Cin, K1, K1), jnp.float32, -c1, c1)
    w2s = jax.random.uniform(k2, (Cout, Cmid, K1, K1), jnp.float32, -c2, c2)
    out1 = jax.jit(functools.partial(basic_unit_nchw, k=K1))(x, w1s, w2s)
    jax.block_until_ready(out1)
    ref1 = _basic_unit_ref(x, w1s, w2s, K1)
    np.testing.assert_allclose(np.asarray(out1), np.asarray(ref1),
                               rtol=5e-3, atol=5e-3)

    print("KERNEL_OK")
</pallas_src>

<mosaic_0001>
module attributes {stable_mosaic.version = 11 : i64} {
  func.func @_basic_unit_kernel(%arg0: i32, %arg1: memref<1x4x256xf32, #tpu.memory_space<vmem>>, %arg2: memref<9x32x4xf32, #tpu.memory_space<vmem>>, %arg3: memref<9x4x32xf32, #tpu.memory_space<vmem>>, %arg4: memref<1x4x256xf32, #tpu.memory_space<vmem>>, %arg5: memref<4x342xf32, #tpu.memory_space<vmem>>, %arg6: memref<32x342xf32, #tpu.memory_space<vmem>>) attributes {dimension_semantics = [#tpu.dimension_semantics<parallel>], iteration_bounds = array<i64: 2>, scalar_prefetch = 0 : i64, scratch_operands = 2 : i64, tpu.core_type = #tpu.core_type<tc>, window_params = [{transform_indices = @transform_0, window_bounds = array<i64: 1, 4, 256>}, {pipeline_mode = #tpu.pipeline_mode<synchronous>, transform_indices = @transform_1, window_bounds = array<i64: 9, 32, 4>}, {pipeline_mode = #tpu.pipeline_mode<synchronous>, transform_indices = @transform_2, window_bounds = array<i64: 9, 4, 32>}, {transform_indices = @transform_3, window_bounds = array<i64: 1, 4, 256>}]} {
    %cst = arith.constant 0.000000e+00 : f32
    %0 = vector.broadcast %cst : f32 to vector<4x342xf32>
    %c0 = arith.constant 0 : index
    %c0_0 = arith.constant 0 : index
    %1 = vector.load %arg5[%c0, %c0_0] : memref<4x342xf32, #tpu.memory_space<vmem>>, vector<4x342xf32>
    tpu.vector_store %arg5[%c0, %c0_0], %0 {strides = array<i32>} : memref<4x342xf32, #tpu.memory_space<vmem>>, vector<4x342xf32>,
    %c0_1 = arith.constant 0 : index
    %c0_2 = arith.constant 0 : index
    %c0_3 = arith.constant 0 : index
    %2 = vector.load %arg1[%c0_1, %c0_2, %c0_3] : memref<1x4x256xf32, #tpu.memory_space<vmem>>, vector<1x4x256xf32>
    %3 = vector.shape_cast %2 : vector<1x4x256xf32> to vector<4x256xf32>
    %4 = vector.extract_strided_slice %3 {offsets = [0, 0], sizes = [4, 16], strides = [1, 1]} : vector<4x256xf32> to vector<4x16xf32>
    %c0_4 = arith.constant 0 : index
    %c19 = arith.constant 19 : index
    %5 = vector.load %arg5[%c0_4, %c19] : memref<4x342xf32, #tpu.memory_space<vmem>>, vector<4x16xf32>
    tpu.vector_store %arg5[%c0_4, %c19], %4 {strides = array<i32>} : memref<4x342xf32, #tpu.memory_space<vmem>>, vector<4x16xf32>,
    %6 = vector.extract_strided_slice %3 {offsets = [0, 16], sizes = [4, 16], strides = [1, 1]} : vector<4x256xf32> to vector<4x16xf32>
    %c0_5 = arith.constant 0 : index
    %c37 = arith.constant 37 : index
    %7 = vector.load %arg5[%c0_5, %c37] : memref<4x342xf32, #tpu.memory_space<vmem>>, vector<4x16xf32>
    tpu.vector_store %arg5[%c0_5, %c37], %6 {strides = array<i32>} : memref<4x342xf32, #tpu.memory_space<vmem>>, vector<4x16xf32>,
    %8 = vector.extract_strided_slice %3 {offsets = [0, 32], sizes = [4, 16], strides = [1, 1]} : vector<4x256xf32> to vector<4x16xf32>
    %c0_6 = arith.constant 0 : index
    %c55 = arith.constant 55 : index
    %9 = vector.load %arg5[%c0_6, %c55] : memref<4x342xf32, #tpu.memory_space<vmem>>, vector<4x16xf32>
    tpu.vector_store %arg5[%c0_6, %c55], %8 {strides = array<i32>} : memref<4x342xf32, #tpu.memory_space<vmem>>, vector<4x16xf32>,
    %10 = vector.extract_strided_slice %3 {offsets = [0, 48], sizes = [4, 16], strides = [1, 1]} : vector<4x256xf32> to vector<4x16xf32>
    %c0_7 = arith.constant 0 : index
    %c73 = arith.constant 73 : index
    %11 = vector.load %arg5[%c0_7, %c73] : memref<4x342xf32, #tpu.memory_space<vmem>>, vector<4x16xf32>
    tpu.vector_store %arg5[%c0_7, %c73], %10 {strides = array<i32>} : memref<4x342xf32, #tpu.memory_space<vmem>>, vector<4x16xf32>,
    %12 = vector.extract_strided_slice %3 {offsets = [0, 64], sizes = [4, 16], strides = [1, 1]} : vector<4x256xf32> to vector<4x16xf32>
    %c0_8 = arith.constant 0 : index
    %c91 = arith.constant 91 : index
    %13 = vector.load %arg5[%c0_8, %c91] : memref<4x342xf32, #tpu.memory_space<vmem>>, vector<4x16xf32>
    tpu.vector_store %arg5[%c0_8, %c91], %12 {strides = array<i32>} : memref<4x342xf32, #tpu.memory_space<vmem>>, vector<4x16xf32>,
    %14 = vector.extract_strided_slice %3 {offsets = [0, 80], sizes = [4, 16], strides = [1, 1]} : vector<4x256xf32> to vector<4x16xf32>
    %c0_9 = arith.constant 0 : index
    %c109 = arith.constant 109 : index
    %15 = vector.load %arg5[%c0_9, %c109] : memref<4x342xf32, #tpu.memory_space<vmem>>, vector<4x16xf32>
    tpu.vector_store %arg5[%c0_9, %c109], %14 {strides = array<i32>} : memref<4x342xf32, #tpu.memory_space<vmem>>, vector<4x16xf32>,
    %16 = vector.extract_strided_slice %3 {offsets = [0, 96], sizes = [4, 16], strides = [1, 1]} : vector<4x256xf32> to vector<4x16xf32>
    %c0_10 = arith.constant 0 : index
    %c127 = arith.constant 127 : index
    %17 = vector.load %arg5[%c0_10, %c127] : memref<4x342xf32, #tpu.memory_space<vmem>>, vector<4x16xf32>
    tpu.vector_store %arg5[%c0_10, %c127], %16 {strides = array<i32>} : memref<4x342xf32, #tpu.memory_space<vmem>>, vector<4x16xf32>,
    %18 = vector.extract_strided_slice %3 {offsets = [0, 112], sizes = [4, 16], strides = [1, 1]} : vector<4x256xf32> to vector<4x16xf32>
    %c0_11 = arith.constant 0 : index
    %c145 = arith.constant 145 : index
    %19 = vector.load %arg5[%c0_11, %c145] : memref<4x342xf32, #tpu.memory_space<vmem>>, vector<4x16xf32>
    tpu.vector_store %arg5[%c0_11, %c145], %18 {strides = array<i32>} : memref<4x342xf32, #tpu.memory_space<vmem>>, vector<4x16xf32>,
    %20 = vector.extract_strided_slice %3 {offsets = [0, 128], sizes = [4, 16], strides = [1, 1]} : vector<4x256xf32> to vector<4x16xf32>
    %c0_12 = arith.constant 0 : index
    %c163 = arith.constant 163 : index
    %21 = vector.load %arg5[%c0_12, %c163] : memref<4x342xf32, #tpu.memory_space<vmem>>, vector<4x16xf32>
    tpu.vector_store %arg5[%c0_12, %c163], %20 {strides = array<i32>} : memref<4x342xf32, #tpu.memory_space<vmem>>, vector<4x16xf32>,
    %22 = vector.extract_strided_slice %3 {offsets = [0, 144], sizes = [4, 16], strides = [1, 1]} : vector<4x256xf32> to vector<4x16xf32>
    %c0_13 = arith.constant 0 : index
    %c181 = arith.constant 181 : index
    %23 = vector.load %arg5[%c0_13, %c181] : memref<4x342xf32, #tpu.memory_space<vmem>>, vector<4x16xf32>
    tpu.vector_store %arg5[%c0_13, %c181], %22 {strides = array<i32>} : memref<4x342xf32, #tpu.memory_space<vmem>>, vector<4x16xf32>,
    %24 = vector.extract_strided_slice %3 {offsets = [0, 160], sizes = [4, 16], strides = [1, 1]} : vector<4x256xf32> to vector<4x16xf32>
    %c0_14 = arith.constant 0 : index
    %c199 = arith.constant 199 : index
    %25 = vector.load %arg5[%c0_14, %c199] : memref<4x342xf32, #tpu.memory_space<vmem>>, vector<4x16xf32>
    tpu.vector_store %arg5[%c0_14, %c199], %24 {strides = array<i32>} : memref<4x342xf32, #tpu.memory_space<vmem>>, vector<4x16xf32>,
    %26 = vector.extract_strided_slice %3 {offsets = [0, 176], sizes = [4, 16], strides = [1, 1]} : vector<4x256xf32> to vector<4x16xf32>
    %c0_15 = arith.constant 0 : index
    %c217 = arith.constant 217 : index
    %27 = vector.load %arg5[%c0_15, %c217] : memref<4x342xf32, #tpu.memory_space<vmem>>, vector<4x16xf32>
    tpu.vector_store %arg5[%c0_15, %c217], %26 {strides = array<i32>} : memref<4x342xf32, #tpu.memory_space<vmem>>, vector<4x16xf32>,
    %28 = vector.extract_strided_slice %3 {offsets = [0, 192], sizes = [4, 16], strides = [1, 1]} : vector<4x256xf32> to vector<4x16xf32>
    %c0_16 = arith.constant 0 : index
    %c235 = arith.constant 235 : index
    %29 = vector.load %arg5[%c0_16, %c235] : memref<4x342xf32, #tpu.memory_space<vmem>>, vector<4x16xf32>
    tpu.vector_store %arg5[%c0_16, %c235], %28 {strides = array<i32>} : memref<4x342xf32, #tpu.memory_space<vmem>>, vector<4x16xf32>,
    %30 = vector.extract_strided_slice %3 {offsets = [0, 208], sizes = [4, 16], strides = [1, 1]} : vector<4x256xf32> to vector<4x16xf32>
    %c0_17 = arith.constant 0 : index
    %c253 = arith.constant 253 : index
    %31 = vector.load %arg5[%c0_17, %c253] : memref<4x342xf32, #tpu.memory_space<vmem>>, vector<4x16xf32>
    tpu.vector_store %arg5[%c0_17, %c253], %30 {strides = array<i32>} : memref<4x342xf32, #tpu.memory_space<vmem>>, vector<4x16xf32>,
    %32 = vector.extract_strided_slice %3 {offsets = [0, 224], sizes = [4, 16], strides = [1, 1]} : vector<4x256xf32> to vector<4x16xf32>
    %c0_18 = arith.constant 0 : index
    %c271 = arith.constant 271 : index
    %33 = vector.load %arg5[%c0_18, %c271] : memref<4x342xf32, #tpu.memory_space<vmem>>, vector<4x16xf32>
    tpu.vector_store %arg5[%c0_18, %c271], %32 {strides = array<i32>} : memref<4x342xf32, #tpu.memory_space<vmem>>, vector<4x16xf32>,
    %34 = vector.extract_strided_slice %3 {offsets = [0, 240], sizes = [4, 16], strides = [1, 1]} : vector<4x256xf32> to vector<4x16xf32>
    %c0_19 = arith.constant 0 : index
    %c289 = arith.constant 289 : index
    %35 = vector.load %arg5[%c0_19, %c289] : memref<4x342xf32, #tpu.memory_space<vmem>>, vector<4x16xf32>
    tpu.vector_store %arg5[%c0_19, %c289], %34 {strides = array<i32>} : memref<4x342xf32, #tpu.memory_space<vmem>>, vector<4x16xf32>,
    %cst_20 = arith.constant 0.000000e+00 : f32
    %36 = vector.broadcast %cst_20 : f32 to vector<32x288xf32>
    %c0_21 = arith.constant 0 : index
    %c0_22 = arith.constant 0 : index
    %c0_23 = arith.constant 0 : index
    %37 = vector.load %arg2[%c0_21, %c0_22, %c0_23] : memref<9x32x4xf32, #tpu.memory_space<vmem>>, vector<1x32x4xf32>
    %38 = vector.shape_cast %37 : vector<1x32x4xf32> to vector<32x4xf32>
    %c0_24 = arith.constant 0 : index
    %c0_25 = arith.constant 0 : index
    %39 = vector.load %arg5[%c0_24, %c0_25] : memref<4x342xf32, #tpu.memory_space<vmem>>, vector<4x288xf32>
    %cst_26 = arith.constant dense<0.000000e+00> : vector<32x288xf32>
    %40 = tpu.matmul %38, %39, %cst_26 {dimension_numbers = #tpu.dot_dimension_numbers<[1], [0], [0], [1], [0, 0, 1, 1], [], []>} : vector<32x4xf32>, vector<4x288xf32>, vector<32x288xf32> -> vector<32x288xf32>
    %41 = arith.addf %36, %40 : vector<32x288xf32>
    %c1 = arith.constant 1 : index
    %c0_27 = arith.constant 0 : index
    %c0_28 = arith.constant 0 : index
    %42 = vector.load %arg2[%c1, %c0_27, %c0_28] : memref<9x32x4xf32, #tpu.memory_space<vmem>>, vector<1x32x4xf32>
    %43 = vector.shape_cast %42 : vector<1x32x4xf32> to vector<32x4xf32>
    %c0_29 = arith.constant 0 : index
    %c1_30 = arith.constant 1 : index
    %44 = vector.load %arg5[%c0_29, %c1_30] : memref<4x342xf32, #tpu.memory_space<vmem>>, vector<4x288xf32>
    %cst_31 = arith.constant dense<0.000000e+00> : vector<32x288xf32>
    %45 = tpu.matmul %43, %44, %cst_31 {dimension_numbers = #tpu.dot_dimension_numbers<[1], [0], [0], [1], [0, 0, 1, 1], [], []>} : vector<32x4xf32>, vector<4x288xf32>, vector<32x288xf32> -> vector<32x288xf32>
    %46 = arith.addf %41, %45 : vector<32x288xf32>
    %c2 = arith.constant 2 : index
    %c0_32 = arith.constant 0 : index
    %c0_33 = arith.constant 0 : index
    %47 = vector.load %arg2[%c2, %c0_32, %c0_33] : memref<9x32x4xf32, #tpu.memory_space<vmem>>, vector<1x32x4xf32>
    %48 = vector.shape_cast %47 : vector<1x32x4xf32> to vector<32x4xf32>
    %c0_34 = arith.constant 0 : index
    %c2_35 = arith.constant 2 : index
    %49 = vector.load %arg5[%c0_34, %c2_35] : memref<4x342xf32, #tpu.memory_space<vmem>>, vector<4x288xf32>
    %cst_36 = arith.constant dense<0.000000e+00> : vector<32x288xf32>
    %50 = tpu.matmul %48, %49, %cst_36 {dimension_numbers = #tpu.dot_dimension_numbers<[1], [0], [0], [1], [0, 0, 1, 1], [], []>} : vector<32x4xf32>, vector<4x288xf32>, vector<32x288xf32> -> vector<32x288xf32>
    %51 = arith.addf %46, %50 : vector<32x288xf32>
    %c3 = arith.constant 3 : index
    %c0_37 = arith.constant 0 : index
    %c0_38 = arith.constant 0 : index
    %52 = vector.load %arg2[%c3, %c0_37, %c0_38] : memref<9x32x4xf32, #tpu.memory_space<vmem>>, vector<1x32x4xf32>
    %53 = vector.shape_cast %52 : vector<1x32x4xf32> to vector<32x4xf32>
    %c0_39 = arith.constant 0 : index
    %c18 = arith.constant 18 : index
    %54 = vector.load %arg5[%c0_39, %c18] : memref<4x342xf32, #tpu.memory_space<vmem>>, vector<4x288xf32>
    %cst_40 = arith.constant dense<0.000000e+00> : vector<32x288xf32>
    %55 = tpu.matmul %53, %54, %cst_40 {dimension_numbers = #tpu.dot_dimension_numbers<[1], [0], [0], [1], [0, 0, 1, 1], [], []>} : vector<32x4xf32>, vector<4x288xf32>, vector<32x288xf32> -> vector<32x288xf32>
    %56 = arith.addf %51, %55 : vector<32x288xf32>
    %c4 = arith.constant 4 : index
    %c0_41 = arith.constant 0 : index
    %c0_42 = arith.constant 0 : index
    %57 = vector.load %arg2[%c4, %c0_41, %c0_42] : memref<9x32x4xf32, #tpu.memory_space<vmem>>, vector<1x32x4xf32>
    %58 = vector.shape_cast %57 : vector<1x32x4xf32> to vector<32x4xf32>
    %c0_43 = arith.constant 0 : index
    %c19_44 = arith.constant 19 : index
    %59 = vector.load %arg5[%c0_43, %c19_44] : memref<4x342xf32, #tpu.memory_space<vmem>>, vector<4x288xf32>
    %cst_45 = arith.constant dense<0.000000e+00> : vector<32x288xf32>
    %60 = tpu.matmul %58, %59, %cst_45 {dimension_numbers = #tpu.dot_dimension_numbers<[1], [0], [0], [1], [0, 0, 1, 1], [], []>} : vector<32x4xf32>, vector<4x288xf32>, vector<32x288xf32> -> vector<32x288xf32>
    %61 = arith.addf %56, %60 : vector<32x288xf32>
    %c5 = arith.constant 5 : index
    %c0_46 = arith.constant 0 : index
    %c0_47 = arith.constant 0 : index
    %62 = vector.load %arg2[%c5, %c0_46, %c0_47] : memref<9x32x4xf32, #tpu.memory_space<vmem>>, vector<1x32x4xf32>
    %63 = vector.shape_cast %62 : vector<1x32x4xf32> to vector<32x4xf32>
    %c0_48 = arith.constant 0 : index
    %c20 = arith.constant 20 : index
    %64 = vector.load %arg5[%c0_48, %c20] : memref<4x342xf32, #tpu.memory_space<vmem>>, vector<4x288xf32>
    %cst_49 = arith.constant dense<0.000000e+00> : vector<32x288xf32>
    %65 = tpu.matmul %63, %64, %cst_49 {dimension_numbers = #tpu.dot_dimension_numbers<[1], [0], [0], [1], [0, 0, 1, 1], [], []>} : vector<32x4xf32>, vector<4x288xf32>, vector<32x288xf32> -> vector<32x288xf32>
    %66 = arith.addf %61, %65 : vector<32x288xf32>
    %c6 = arith.constant 6 : index
    %c0_50 = arith.constant 0 : index
    %c0_51 = arith.constant 0 : index
    %67 = vector.load %arg2[%c6, %c0_50, %c0_51] : memref<9x32x4xf32, #tpu.memory_space<vmem>>, vector<1x32x4xf32>
    %68 = vector.shape_cast %67 : vector<1x32x4xf32> to vector<32x4xf32>
    %c0_52 = arith.constant 0 : index
    %c36 = arith.constant 36 : index
    %69 = vector.load %arg5[%c0_52, %c36] : memref<4x342xf32, #tpu.memory_space<vmem>>, vector<4x288xf32>
    %cst_53 = arith.constant dense<0.000000e+00> : vector<32x288xf32>
    %70 = tpu.matmul %68, %69, %cst_53 {dimension_numbers = #tpu.dot_dimension_numbers<[1], [0], [0], [1], [0, 0, 1, 1], [], []>} : vector<32x4xf32>, vector<4x288xf32>, vector<32x288xf32> -> vector<32x288xf32>
    %71 = arith.addf %66, %70 : vector<32x288xf32>
    %c7 = arith.constant 7 : index
    %c0_54 = arith.constant 0 : index
    %c0_55 = arith.constant 0 : index
    %72 = vector.load %arg2[%c7, %c0_54, %c0_55] : memref<9x32x4xf32, #tpu.memory_space<vmem>>, vector<1x32x4xf32>
    %73 = vector.shape_cast %72 : vector<1x32x4xf32> to vector<32x4xf32>
    %c0_56 = arith.constant 0 : index
    %c37_57 = arith.constant 37 : index
    %74 = vector.load %arg5[%c0_56, %c37_57] : memref<4x342xf32, #tpu.memory_space<vmem>>, vector<4x288xf32>
    %cst_58 = arith.constant dense<0.000000e+00> : vector<32x288xf32>
    %75 = tpu.matmul %73, %74, %cst_58 {dimension_numbers = #tpu.dot_dimension_numbers<[1], [0], [0], [1], [0, 0, 1, 1], [], []>} : vector<32x4xf32>, vector<4x288xf32>, vector<32x288xf32> -> vector<32x288xf32>
    %76 = arith.addf %71, %75 : vector<32x288xf32>
    %c8 = arith.constant 8 : index
    %c0_59 = arith.constant 0 : index
    %c0_60 = arith.constant 0 : index
    %77 = vector.load %arg2[%c8, %c0_59, %c0_60] : memref<9x32x4xf32, #tpu.memory_space<vmem>>, vector<1x32x4xf32>
    %78 = vector.shape_cast %77 : vector<1x32x4xf32> to vector<32x4xf32>
    %c0_61 = arith.constant 0 : index
    %c38 = arith.constant 38 : index
    %79 = vector.load %arg5[%c0_61, %c38] : memref<4x342xf32, #tpu.memory_space<vmem>>, vector<4x288xf32>
    %cst_62 = arith.constant dense<0.000000e+00> : vector<32x288xf32>
    %80 = tpu.matmul %78, %79, %cst_62 {dimension_numbers = #tpu.dot_dimension_numbers<[1], [0], [0], [1], [0, 0, 1, 1], [], []>} : vector<32x4xf32>, vector<4x288xf32>, vector<32x288xf32> -> vector<32x288xf32>
    %81 = arith.addf %76, %80 : vector<32x288xf32>
    %cst_63 = arith.constant 0.000000e+00 : f32
    %82 = vector.broadcast %cst_63 : f32 to vector<32x288xf32>
    %83 = arith.maximumf %81, %82 : vector<32x288xf32>
    %cst_64 = arith.constant 0.000000e+00 : f32
    %84 = vector.broadcast %cst_64 : f32 to vector<32x19xf32>
    %c0_65 = arith.constant 0 : index
    %c0_66 = arith.constant 0 : index
    %85 = vector.load %arg6[%c0_65, %c0_66] : memref<32x342xf32, #tpu.memory_space<vmem>>, vector<32x19xf32>
    tpu.vector_store %arg6[%c0_65, %c0_66], %84 {strides = array<i32>} : memref<32x342xf32, #tpu.memory_space<vmem>>, vector<32x19xf32>,
    %cst_67 = arith.constant 0.000000e+00 : f32
    %86 = vector.broadcast %cst_67 : f32 to vector<32x35xf32>
    %c0_68 = arith.constant 0 : index
    %c307 = arith.constant 307 : index
    %87 = vector.load %arg6[%c0_68, %c307] : memref<32x342xf32, #tpu.memory_space<vmem>>, vector<32x35xf32>
    tpu.vector_store %arg6[%c0_68, %c307], %86 {strides = array<i32>} : memref<32x342xf32, #tpu.memory_space<vmem>>, vector<32x35xf32>,
    %c0_69 = arith.constant 0 : index
    %c19_70 = arith.constant 19 : index
    %88 = vector.load %arg6[%c0_69, %c19_70] : memref<32x342xf32, #tpu.memory_space<vmem>>, vector<32x288xf32>
    tpu.vector_store %arg6[%c0_69, %c19_70], %83 {strides = array<i32>} : memref<32x342xf32, #tpu.memory_space<vmem>>, vector<32x288xf32>,
    %cst_71 = arith.constant 0.000000e+00 : f32
    %89 = vector.broadcast %cst_71 : f32 to vector<32x2xf32>
    %c0_72 = arith.constant 0 : index
    %c35 = arith.constant 35 : index
    %90 = vector.load %arg6[%c0_72, %c35] : memref<32x342xf32, #tpu.memory_space<vmem>>, vector<32x2xf32>
    tpu.vector_store %arg6[%c0_72, %c35], %89 {strides = array<i32>} : memref<32x342xf32, #tpu.memory_space<vmem>>, vector<32x2xf32>,
    %cst_73 = arith.constant 0.000000e+00 : f32
    %91 = vector.broadcast %cst_73 : f32 to vector<32x2xf32>
    %c0_74 = arith.constant 0 : index
    %c53 = arith.constant 53 : index
    %92 = vector.load %arg6[%c0_74, %c53] : memref<32x342xf32, #tpu.memory_space<vmem>>, vector<32x2xf32>
    tpu.vector_store %arg6[%c0_74, %c53], %91 {strides = array<i32>} : memref<32x342xf32, #tpu.memory_space<vmem>>, vector<32x2xf32>,
    %cst_75 = arith.constant 0.000000e+00 : f32
    %93 = vector.broadcast %cst_75 : f32 to vector<32x2xf32>
    %c0_76 = arith.constant 0 : index
    %c71 = arith.constant 71 : index
    %94 = vector.load %arg6[%c0_76, %c71] : memref<32x342xf32, #tpu.memory_space<vmem>>, vector<32x2xf32>
    tpu.vector_store %arg6[%c0_76, %c71], %93 {strides = array<i32>} : memref<32x342xf32, #tpu.memory_space<vmem>>, vector<32x2xf32>,
    %cst_77 = arith.constant 0.000000e+00 : f32
    %95 = vector.broadcast %cst_77 : f32 to vector<32x2xf32>
    %c0_78 = arith.constant 0 : index
    %c89 = arith.constant 89 : index
    %96 = vector.load %arg6[%c0_78, %c89] : memref<32x342xf32, #tpu.memory_space<vmem>>, vector<32x2xf32>
    tpu.vector_store %arg6[%c0_78, %c89], %95 {strides = array<i32>} : memref<32x342xf32, #tpu.memory_space<vmem>>, vector<32x2xf32>,
    %cst_79 = arith.constant 0.000000e+00 : f32
    %97 = vector.broadcast %cst_79 : f32 to vector<32x2xf32>
    %c0_80 = arith.constant 0 : index
    %c107 = arith.constant 107 : index
    %98 = vector.load %arg6[%c0_80, %c107] : memref<32x342xf32, #tpu.memory_space<vmem>>, vector<32x2xf32>
    tpu.vector_store %arg6[%c0_80, %c107], %97 {strides = array<i32>} : memref<32x342xf32, #tpu.memory_space<vmem>>, vector<32x2xf32>,
    %cst_81 = arith.constant 0.000000e+00 : f32
    %99 = vector.broadcast %cst_81 : f32 to vector<32x2xf32>
    %c0_82 = arith.constant 0 : index
    %c125 = arith.constant 125 : index
    %100 = vector.load %arg6[%c0_82, %c125] : memref<32x342xf32, #tpu.memory_space<vmem>>, vector<32x2xf32>
    tpu.vector_store %arg6[%c0_82, %c125], %99 {strides = array<i32>} : memref<32x342xf32, #tpu.memory_space<vmem>>, vector<32x2xf32>,
    %cst_83 = arith.constant 0.000000e+00 : f32
    %101 = vector.broadcast %cst_83 : f32 to vector<32x2xf32>
    %c0_84 = arith.constant 0 : index
    %c143 = arith.constant 143 : index
    %102 = vector.load %arg6[%c0_84, %c143] : memref<32x342xf32, #tpu.memory_space<vmem>>, vector<32x2xf32>
    tpu.vector_store %arg6[%c0_84, %c143], %101 {strides = array<i32>} : memref<32x342xf32, #tpu.memory_space<vmem>>, vector<32x2xf32>,
    %cst_85 = arith.constant 0.000000e+00 : f32
    %103 = vector.broadcast %cst_85 : f32 to vector<32x2xf32>
    %c0_86 = arith.constant 0 : index
    %c161 = arith.constant 161 : index
    %104 = vector.load %arg6[%c0_86, %c161] : memref<32x342xf32, #tpu.memory_space<vmem>>, vector<32x2xf32>
    tpu.vector_store %arg6[%c0_86, %c161], %103 {strides = array<i32>} : memref<32x342xf32, #tpu.memory_space<vmem>>, vector<32x2xf32>,
    %cst_87 = arith.constant 0.000000e+00 : f32
    %105 = vector.broadcast %cst_87 : f32 to vector<32x2xf32>
    %c0_88 = arith.constant 0 : index
    %c179 = arith.constant 179 : index
    %106 = vector.load %arg6[%c0_88, %c179] : memref<32x342xf32, #tpu.memory_space<vmem>>, vector<32x2xf32>
    tpu.vector_store %arg6[%c0_88, %c179], %105 {strides = array<i32>} : memref<32x342xf32, #tpu.memory_space<vmem>>, vector<32x2xf32>,
    %cst_89 = arith.constant 0.000000e+00 : f32
    %107 = vector.broadcast %cst_89 : f32 to vector<32x2xf32>
    %c0_90 = arith.constant 0 : index
    %c197 = arith.constant 197 : index
    %108 = vector.load %arg6[%c0_90, %c197] : memref<32x342xf32, #tpu.memory_space<vmem>>, vector<32x2xf32>
    tpu.vector_store %arg6[%c0_90, %c197], %107 {strides = array<i32>} : memref<32x342xf32, #tpu.memory_space<vmem>>, vector<32x2xf32>,
    %cst_91 = arith.constant 0.000000e+00 : f32
    %109 = vector.broadcast %cst_91 : f32 to vector<32x2xf32>
    %c0_92 = arith.constant 0 : index
    %c215 = arith.constant 215 : index
    %110 = vector.load %arg6[%c0_92, %c215] : memref<32x342xf32, #tpu.memory_space<vmem>>, vector<32x2xf32>
    tpu.vector_store %arg6[%c0_92, %c215], %109 {strides = array<i32>} : memref<32x342xf32, #tpu.memory_space<vmem>>, vector<32x2xf32>,
    %cst_93 = arith.constant 0.000000e+00 : f32
    %111 = vector.broadcast %cst_93 : f32 to vector<32x2xf32>
    %c0_94 = arith.constant 0 : index
    %c233 = arith.constant 233 : index
    %112 = vector.load %arg6[%c0_94, %c233] : memref<32x342xf32, #tpu.memory_space<vmem>>, vector<32x2xf32>
    tpu.vector_store %arg6[%c0_94, %c233], %111 {strides = array<i32>} : memref<32x342xf32, #tpu.memory_space<vmem>>, vector<32x2xf32>,
    %cst_95 = arith.constant 0.000000e+00 : f32
    %113 = vector.broadcast %cst_95 : f32 to vector<32x2xf32>
    %c0_96 = arith.constant 0 : index
    %c251 = arith.constant 251 : index
    %114 = vector.load %arg6[%c0_96, %c251] : memref<32x342xf32, #tpu.memory_space<vmem>>, vector<32x2xf32>
    tpu.vector_store %arg6[%c0_96, %c251], %113 {strides = array<i32>} : memref<32x342xf32, #tpu.memory_space<vmem>>, vector<32x2xf32>,
    %cst_97 = arith.constant 0.000000e+00 : f32
    %115 = vector.broadcast %cst_97 : f32 to vector<32x2xf32>
    %c0_98 = arith.constant 0 : index
    %c269 = arith.constant 269 : index
    %116 = vector.load %arg6[%c0_98, %c269] : memref<32x342xf32, #tpu.memory_space<vmem>>, vector<32x2xf32>
    tpu.vector_store %arg6[%c0_98, %c269], %115 {strides = array<i32>} : memref<32x342xf32, #tpu.memory_space<vmem>>, vector<32x2xf32>,
    %cst_99 = arith.constant 0.000000e+00 : f32
    %117 = vector.broadcast %cst_99 : f32 to vector<32x2xf32>
    %c0_100 = arith.constant 0 : index
    %c287 = arith.constant 287 : index
    %118 = vector.load %arg6[%c0_100, %c287] : memref<32x342xf32, #tpu.memory_space<vmem>>, vector<32x2xf32>
    tpu.vector_store %arg6[%c0_100, %c287], %117 {strides = array<i32>} : memref<32x342xf32, #tpu.memory_space<vmem>>, vector<32x2xf32>,
    %cst_101 = arith.constant 0.000000e+00 : f32
    %119 = vector.broadcast %cst_101 : f32 to vector<32x2xf32>
    %c0_102 = arith.constant 0 : index
    %c305 = arith.constant 305 : index
    %120 = vector.load %arg6[%c0_102, %c305] : memref<32x342xf32, #tpu.memory_space<vmem>>, vector<32x2xf32>
    tpu.vector_store %arg6[%c0_102, %c305], %119 {strides = array<i32>} : memref<32x342xf32, #tpu.memory_space<vmem>>, vector<32x2xf32>,
    %cst_103 = arith.constant 0.000000e+00 : f32
    %121 = vector.broadcast %cst_103 : f32 to vector<4x288xf32>
    %c0_104 = arith.constant 0 : index
    %c0_105 = arith.constant 0 : index
    %c0_106 = arith.constant 0 : index
    %122 = vector.load %arg3[%c0_104, %c0_105, %c0_106] : memref<9x4x32xf32, #tpu.memory_space<vmem>>, vector<1x4x32xf32>
    %123 = vector.shape_cast %122 : vector<1x4x32xf32> to vector<4x32xf32>
    %c0_107 = arith.constant 0 : index
    %c0_108 = arith.constant 0 : index
    %124 = vector.load %arg6[%c0_107, %c0_108] : memref<32x342xf32, #tpu.memory_space<vmem>>, vector<32x288xf32>
    %cst_109 = arith.constant dense<0.000000e+00> : vector<4x288xf32>
    %125 = tpu.matmul %123, %124, %cst_109 {dimension_numbers = #tpu.dot_dimension_numbers<[1], [0], [0], [1], [0, 0, 1, 1], [], []>} : vector<4x32xf32>, vector<32x288xf32>, vector<4x288xf32> -> vector<4x288xf32>
    %126 = arith.addf %121, %125 : vector<4x288xf32>
    %c1_110 = arith.constant 1 : index
    %c0_111 = arith.constant 0 : index
    %c0_112 = arith.constant 0 : index
    %127 = vector.load %arg3[%c1_110, %c0_111, %c0_112] : memref<9x4x32xf32, #tpu.memory_space<vmem>>, vector<1x4x32xf32>
    %128 = vector.shape_cast %127 : vector<1x4x32xf32> to vector<4x32xf32>
    %c0_113 = arith.constant 0 : index
    %c1_114 = arith.constant 1 : index
    %129 = vector.load %arg6[%c0_113, %c1_114] : memref<32x342xf32, #tpu.memory_space<vmem>>, vector<32x288xf32>
    %cst_115 = arith.constant dense<0.000000e+00> : vector<4x288xf32>
    %130 = tpu.matmul %128, %129, %cst_115 {dimension_numbers = #tpu.dot_dimension_numbers<[1], [0], [0], [1], [0, 0, 1, 1], [], []>} : vector<4x32xf32>, vector<32x288xf32>, vector<4x288xf32> -> vector<4x288xf32>
    %131 = arith.addf %126, %130 : vector<4x288xf32>
    %c2_116 = arith.constant 2 : index
    %c0_117 = arith.constant 0 : index
    %c0_118 = arith.constant 0 : index
    %132 = vector.load %arg3[%c2_116, %c0_117, %c0_118] : memref<9x4x32xf32, #tpu.memory_space<vmem>>, vector<1x4x32xf32>
    %133 = vector.shape_cast %132 : vector<1x4x32xf32> to vector<4x32xf32>
    %c0_119 = arith.constant 0 : index
    %c2_120 = arith.constant 2 : index
    %134 = vector.load %arg6[%c0_119, %c2_120] : memref<32x342xf32, #tpu.memory_space<vmem>>, vector<32x288xf32>
    %cst_121 = arith.constant dense<0.000000e+00> : vector<4x288xf32>
    %135 = tpu.matmul %133, %134, %cst_121 {dimension_numbers = #tpu.dot_dimension_numbers<[1], [0], [0], [1], [0, 0, 1, 1], [], []>} : vector<4x32xf32>, vector<32x288xf32>, vector<4x288xf32> -> vector<4x288xf32>
    %136 = arith.addf %131, %135 : vector<4x288xf32>
    %c3_122 = arith.constant 3 : index
    %c0_123 = arith.constant 0 : index
    %c0_124 = arith.constant 0 : index
    %137 = vector.load %arg3[%c3_122, %c0_123, %c0_124] : memref<9x4x32xf32, #tpu.memory_space<vmem>>, vector<1x4x32xf32>
    %138 = vector.shape_cast %137 : vector<1x4x32xf32> to vector<4x32xf32>
    %c0_125 = arith.constant 0 : index
    %c18_126 = arith.constant 18 : index
    %139 = vector.load %arg6[%c0_125, %c18_126] : memref<32x342xf32, #tpu.memory_space<vmem>>, vector<32x288xf32>
    %cst_127 = arith.constant dense<0.000000e+00> : vector<4x288xf32>
    %140 = tpu.matmul %138, %139, %cst_127 {dimension_numbers = #tpu.dot_dimension_numbers<[1], [0], [0], [1], [0, 0, 1, 1], [], []>} : vector<4x32xf32>, vector<32x288xf32>, vector<4x288xf32> -> vector<4x288xf32>
    %141 = arith.addf %136, %140 : vector<4x288xf32>
    %c4_128 = arith.constant 4 : index
    %c0_129 = arith.constant 0 : index
    %c0_130 = arith.constant 0 : index
    %142 = vector.load %arg3[%c4_128, %c0_129, %c0_130] : memref<9x4x32xf32, #tpu.memory_space<vmem>>, vector<1x4x32xf32>
    %143 = vector.shape_cast %142 : vector<1x4x32xf32> to vector<4x32xf32>
    %c0_131 = arith.constant 0 : index
    %c19_132 = arith.constant 19 : index
    %144 = vector.load %arg6[%c0_131, %c19_132] : memref<32x342xf32, #tpu.memory_space<vmem>>, vector<32x288xf32>
    %cst_133 = arith.constant dense<0.000000e+00> : vector<4x288xf32>
    %145 = tpu.matmul %143, %144, %cst_133 {dimension_numbers = #tpu.dot_dimension_numbers<[1], [0], [0], [1], [0, 0, 1, 1], [], []>} : vector<4x32xf32>, vector<32x288xf32>, vector<4x288xf32> -> vector<4x288xf32>
    %146 = arith.addf %141, %145 : vector<4x288xf32>
    %c5_134 = arith.constant 5 : index
    %c0_135 = arith.constant 0 : index
    %c0_136 = arith.constant 0 : index
    %147 = vector.load %arg3[%c5_134, %c0_135, %c0_136] : memref<9x4x32xf32, #tpu.memory_space<vmem>>, vector<1x4x32xf32>
    %148 = vector.shape_cast %147 : vector<1x4x32xf32> to vector<4x32xf32>
    %c0_137 = arith.constant 0 : index
    %c20_138 = arith.constant 20 : index
    %149 = vector.load %arg6[%c0_137, %c20_138] : memref<32x342xf32, #tpu.memory_space<vmem>>, vector<32x288xf32>
    %cst_139 = arith.constant dense<0.000000e+00> : vector<4x288xf32>
    %150 = tpu.matmul %148, %149, %cst_139 {dimension_numbers = #tpu.dot_dimension_numbers<[1], [0], [0], [1], [0, 0, 1, 1], [], []>} : vector<4x32xf32>, vector<32x288xf32>, vector<4x288xf32> -> vector<4x288xf32>
    %151 = arith.addf %146, %150 : vector<4x288xf32>
    %c6_140 = arith.constant 6 : index
    %c0_141 = arith.constant 0 : index
    %c0_142 = arith.constant 0 : index
    %152 = vector.load %arg3[%c6_140, %c0_141, %c0_142] : memref<9x4x32xf32, #tpu.memory_space<vmem>>, vector<1x4x32xf32>
    %153 = vector.shape_cast %152 : vector<1x4x32xf32> to vector<4x32xf32>
    %c0_143 = arith.constant 0 : index
    %c36_144 = arith.constant 36 : index
    %154 = vector.load %arg6[%c0_143, %c36_144] : memref<32x342xf32, #tpu.memory_space<vmem>>, vector<32x288xf32>
    %cst_145 = arith.constant dense<0.000000e+00> : vector<4x288xf32>
    %155 = tpu.matmul %153, %154, %cst_145 {dimension_numbers = #tpu.dot_dimension_numbers<[1], [0], [0], [1], [0, 0, 1, 1], [], []>} : vector<4x32xf32>, vector<32x288xf32>, vector<4x288xf32> -> vector<4x288xf32>
    %156 = arith.addf %151, %155 : vector<4x288xf32>
    %c7_146 = arith.constant 7 : index
    %c0_147 = arith.constant 0 : index
    %c0_148 = arith.constant 0 : index
    %157 = vector.load %arg3[%c7_146, %c0_147, %c0_148] : memref<9x4x32xf32, #tpu.memory_space<vmem>>, vector<1x4x32xf32>
    %158 = vector.shape_cast %157 : vector<1x4x32xf32> to vector<4x32xf32>
    %c0_149 = arith.constant 0 : index
    %c37_150 = arith.constant 37 : index
    %159 = vector.load %arg6[%c0_149, %c37_150] : memref<32x342xf32, #tpu.memory_space<vmem>>, vector<32x288xf32>
    %cst_151 = arith.constant dense<0.000000e+00> : vector<4x288xf32>
    %160 = tpu.matmul %158, %159, %cst_151 {dimension_numbers = #tpu.dot_dimension_numbers<[1], [0], [0], [1], [0, 0, 1, 1], [], []>} : vector<4x32xf32>, vector<32x288xf32>, vector<4x288xf32> -> vector<4x288xf32>
    %161 = arith.addf %156, %160 : vector<4x288xf32>
    %c8_152 = arith.constant 8 : index
    %c0_153 = arith.constant 0 : index
    %c0_154 = arith.constant 0 : index
    %162 = vector.load %arg3[%c8_152, %c0_153, %c0_154] : memref<9x4x32xf32, #tpu.memory_space<vmem>>, vector<1x4x32xf32>
    %163 = vector.shape_cast %162 : vector<1x4x32xf32> to vector<4x32xf32>
    %c0_155 = arith.constant 0 : index
    %c38_156 = arith.constant 38 : index
    %164 = vector.load %arg6[%c0_155, %c38_156] : memref<32x342xf32, #tpu.memory_space<vmem>>, vector<32x288xf32>
    %cst_157 = arith.constant dense<0.000000e+00> : vector<4x288xf32>
    %165 = tpu.matmul %163, %164, %cst_157 {dimension_numbers = #tpu.dot_dimension_numbers<[1], [0], [0], [1], [0, 0, 1, 1], [], []>} : vector<4x32xf32>, vector<32x288xf32>, vector<4x288xf32> -> vector<4x288xf32>
    %166 = arith.addf %161, %165 : vector<4x288xf32>
    %167 = vector.extract_strided_slice %166 {offsets = [0, 0], sizes = [4, 16], strides = [1, 1]} : vector<4x288xf32> to vector<4x16xf32>
    %c0_158 = arith.constant 0 : index
    %c0_159 = arith.constant 0 : index
    %c0_160 = arith.constant 0 : index
    %168 = vector.load %arg4[%c0_158, %c0_159, %c0_160] : memref<1x4x256xf32, #tpu.memory_space<vmem>>, vector<1x4x16xf32>
    %169 = vector.shape_cast %168 : vector<1x4x16xf32> to vector<4x16xf32>
    %170 = vector.shape_cast %167 : vector<4x16xf32> to vector<1x4x16xf32>
    tpu.vector_store %arg4[%c0_158, %c0_159, %c0_160], %170 {strides = array<i32>} : memref<1x4x256xf32, #tpu.memory_space<vmem>>, vector<1x4x16xf32>,
    %171 = vector.extract_strided_slice %166 {offsets = [0, 18], sizes = [4, 16], strides = [1, 1]} : vector<4x288xf32> to vector<4x16xf32>
    %c0_161 = arith.constant 0 : index
    %c0_162 = arith.constant 0 : index
    %c16 = arith.constant 16 : index
    %172 = vector.load %arg4[%c0_161, %c0_162, %c16] : memref<1x4x256xf32, #tpu.memory_space<vmem>>, vector<1x4x16xf32>
    %173 = vector.shape_cast %172 : vector<1x4x16xf32> to vector<4x16xf32>
    %174 = vector.shape_cast %171 : vector<4x16xf32> to vector<1x4x16xf32>
    tpu.vector_store %arg4[%c0_161, %c0_162, %c16], %174 {strides = array<i32>} : memref<1x4x256xf32, #tpu.memory_space<vmem>>, vector<1x4x16xf32>,
    %175 = vector.extract_strided_slice %166 {offsets = [0, 36], sizes = [4, 16], strides = [1, 1]} : vector<4x288xf32> to vector<4x16xf32>
    %c0_163 = arith.constant 0 : index
    %c0_164 = arith.constant 0 : index
    %c32 = arith.constant 32 : index
    %176 = vector.load %arg4[%c0_163, %c0_164, %c32] : memref<1x4x256xf32, #tpu.memory_space<vmem>>, vector<1x4x16xf32>
    %177 = vector.shape_cast %176 : vector<1x4x16xf32> to vector<4x16xf32>
    %178 = vector.shape_cast %175 : vector<4x16xf32> to vector<1x4x16xf32>
    tpu.vector_store %arg4[%c0_163, %c0_164, %c32], %178 {strides = array<i32>} : memref<1x4x256xf32, #tpu.memory_space<vmem>>, vector<1x4x16xf32>,
    %179 = vector.extract_strided_slice %166 {offsets = [0, 54], sizes = [4, 16], strides = [1, 1]} : vector<4x288xf32> to vector<4x16xf32>
    %c0_165 = arith.constant 0 : index
    %c0_166 = arith.constant 0 : index
    %c48 = arith.constant 48 : index
    %180 = vector.load %arg4[%c0_165, %c0_166, %c48] : memref<1x4x256xf32, #tpu.memory_space<vmem>>, vector<1x4x16xf32>
    %181 = vector.shape_cast %180 : vector<1x4x16xf32> to vector<4x16xf32>
    %182 = vector.shape_cast %179 : vector<4x16xf32> to vector<1x4x16xf32>
    tpu.vector_store %arg4[%c0_165, %c0_166, %c48], %182 {strides = array<i32>} : memref<1x4x256xf32, #tpu.memory_space<vmem>>, vector<1x4x16xf32>,
    %183 = vector.extract_strided_slice %166 {offsets = [0, 72], sizes = [4, 16], strides = [1, 1]} : vector<4x288xf32> to vector<4x16xf32>
    %c0_167 = arith.constant 0 : index
    %c0_168 = arith.constant 0 : index
    %c64 = arith.constant 64 : index
    %184 = vector.load %arg4[%c0_167, %c0_168, %c64] : memref<1x4x256xf32, #tpu.memory_space<vmem>>, vector<1x4x16xf32>
    %185 = vector.shape_cast %184 : vector<1x4x16xf32> to vector<4x16xf32>
    %186 = vector.shape_cast %183 : vector<4x16xf32> to vector<1x4x16xf32>
    tpu.vector_store %arg4[%c0_167, %c0_168, %c64], %186 {strides = array<i32>} : memref<1x4x256xf32, #tpu.memory_space<vmem>>, vector<1x4x16xf32>,
    %187 = vector.extract_strided_slice %166 {offsets = [0, 90], sizes = [4, 16], strides = [1, 1]} : vector<4x288xf32> to vector<4x16xf32>
    %c0_169 = arith.constant 0 : index
    %c0_170 = arith.constant 0 : index
    %c80 = arith.constant 80 : index
    %188 = vector.load %arg4[%c0_169, %c0_170, %c80] : memref<1x4x256xf32, #tpu.memory_space<vmem>>, vector<1x4x16xf32>
    %189 = vector.shape_cast %188 : vector<1x4x16xf32> to vector<4x16xf32>
    %190 = vector.shape_cast %187 : vector<4x16xf32> to vector<1x4x16xf32>
    tpu.vector_store %arg4[%c0_169, %c0_170, %c80], %190 {strides = array<i32>} : memref<1x4x256xf32, #tpu.memory_space<vmem>>, vector<1x4x16xf32>,
    %191 = vector.extract_strided_slice %166 {offsets = [0, 108], sizes = [4, 16], strides = [1, 1]} : vector<4x288xf32> to vector<4x16xf32>
    %c0_171 = arith.constant 0 : index
    %c0_172 = arith.constant 0 : index
    %c96 = arith.constant 96 : index
    %192 = vector.load %arg4[%c0_171, %c0_172, %c96] : memref<1x4x256xf32, #tpu.memory_space<vmem>>, vector<1x4x16xf32>
    %193 = vector.shape_cast %192 : vector<1x4x16xf32> to vector<4x16xf32>
    %194 = vector.shape_cast %191 : vector<4x16xf32> to vector<1x4x16xf32>
    tpu.vector_store %arg4[%c0_171, %c0_172, %c96], %194 {strides = array<i32>} : memref<1x4x256xf32, #tpu.memory_space<vmem>>, vector<1x4x16xf32>,
    %195 = vector.extract_strided_slice %166 {offsets = [0, 126], sizes = [4, 16], strides = [1, 1]} : vector<4x288xf32> to vector<4x16xf32>
    %c0_173 = arith.constant 0 : index
    %c0_174 = arith.constant 0 : index
    %c112 = arith.constant 112 : index
    %196 = vector.load %arg4[%c0_173, %c0_174, %c112] : memref<1x4x256xf32, #tpu.memory_space<vmem>>, vector<1x4x16xf32>
    %197 = vector.shape_cast %196 : vector<1x4x16xf32> to vector<4x16xf32>
    %198 = vector.shape_cast %195 : vector<4x16xf32> to vector<1x4x16xf32>
    tpu.vector_store %arg4[%c0_173, %c0_174, %c112], %198 {strides = array<i32>} : memref<1x4x256xf32, #tpu.memory_space<vmem>>, vector<1x4x16xf32>,
    %199 = vector.extract_strided_slice %166 {offsets = [0, 144], sizes = [4, 16], strides = [1, 1]} : vector<4x288xf32> to vector<4x16xf32>
    %c0_175 = arith.constant 0 : index
    %c0_176 = arith.constant 0 : index
    %c128 = arith.constant 128 : index
    %200 = vector.load %arg4[%c0_175, %c0_176, %c128] : memref<1x4x256xf32, #tpu.memory_space<vmem>>, vector<1x4x16xf32>
    %201 = vector.shape_cast %200 : vector<1x4x16xf32> to vector<4x16xf32>
    %202 = vector.shape_cast %199 : vector<4x16xf32> to vector<1x4x16xf32>
    tpu.vector_store %arg4[%c0_175, %c0_176, %c128], %202 {strides = array<i32>} : memref<1x4x256xf32, #tpu.memory_space<vmem>>, vector<1x4x16xf32>,
    %203 = vector.extract_strided_slice %166 {offsets = [0, 162], sizes = [4, 16], strides = [1, 1]} : vector<4x288xf32> to vector<4x16xf32>
    %c0_177 = arith.constant 0 : index
    %c0_178 = arith.constant 0 : index
    %c144 = arith.constant 144 : index
    %204 = vector.load %arg4[%c0_177, %c0_178, %c144] : memref<1x4x256xf32, #tpu.memory_space<vmem>>, vector<1x4x16xf32>
    %205 = vector.shape_cast %204 : vector<1x4x16xf32> to vector<4x16xf32>
    %206 = vector.shape_cast %203 : vector<4x16xf32> to vector<1x4x16xf32>
    tpu.vector_store %arg4[%c0_177, %c0_178, %c144], %206 {strides = array<i32>} : memref<1x4x256xf32, #tpu.memory_space<vmem>>, vector<1x4x16xf32>,
    %207 = vector.extract_strided_slice %166 {offsets = [0, 180], sizes = [4, 16], strides = [1, 1]} : vector<4x288xf32> to vector<4x16xf32>
    %c0_179 = arith.constant 0 : index
    %c0_180 = arith.constant 0 : index
    %c160 = arith.constant 160 : index
    %208 = vector.load %arg4[%c0_179, %c0_180, %c160] : memref<1x4x256xf32, #tpu.memory_space<vmem>>, vector<1x4x16xf32>
    %209 = vector.shape_cast %208 : vector<1x4x16xf32> to vector<4x16xf32>
    %210 = vector.shape_cast %207 : vector<4x16xf32> to vector<1x4x16xf32>
    tpu.vector_store %arg4[%c0_179, %c0_180, %c160], %210 {strides = array<i32>} : memref<1x4x256xf32, #tpu.memory_space<vmem>>, vector<1x4x16xf32>,
    %211 = vector.extract_strided_slice %166 {offsets = [0, 198], sizes = [4, 16], strides = [1, 1]} : vector<4x288xf32> to vector<4x16xf32>
    %c0_181 = arith.constant 0 : index
    %c0_182 = arith.constant 0 : index
    %c176 = arith.constant 176 : index
    %212 = vector.load %arg4[%c0_181, %c0_182, %c176] : memref<1x4x256xf32, #tpu.memory_space<vmem>>, vector<1x4x16xf32>
    %213 = vector.shape_cast %212 : vector<1x4x16xf32> to vector<4x16xf32>
    %214 = vector.shape_cast %211 : vector<4x16xf32> to vector<1x4x16xf32>
    tpu.vector_store %arg4[%c0_181, %c0_182, %c176], %214 {strides = array<i32>} : memref<1x4x256xf32, #tpu.memory_space<vmem>>, vector<1x4x16xf32>,
    %215 = vector.extract_strided_slice %166 {offsets = [0, 216], sizes = [4, 16], strides = [1, 1]} : vector<4x288xf32> to vector<4x16xf32>
    %c0_183 = arith.constant 0 : index
    %c0_184 = arith.constant 0 : index
    %c192 = arith.constant 192 : index
    %216 = vector.load %arg4[%c0_183, %c0_184, %c192] : memref<1x4x256xf32, #tpu.memory_space<vmem>>, vector<1x4x16xf32>
    %217 = vector.shape_cast %216 : vector<1x4x16xf32> to vector<4x16xf32>
    %218 = vector.shape_cast %215 : vector<4x16xf32> to vector<1x4x16xf32>
    tpu.vector_store %arg4[%c0_183, %c0_184, %c192], %218 {strides = array<i32>} : memref<1x4x256xf32, #tpu.memory_space<vmem>>, vector<1x4x16xf32>,
    %219 = vector.extract_strided_slice %166 {offsets = [0, 234], sizes = [4, 16], strides = [1, 1]} : vector<4x288xf32> to vector<4x16xf32>
    %c0_185 = arith.constant 0 : index
    %c0_186 = arith.constant 0 : index
    %c208 = arith.constant 208 : index
    %220 = vector.load %arg4[%c0_185, %c0_186, %c208] : memref<1x4x256xf32, #tpu.memory_space<vmem>>, vector<1x4x16xf32>
    %221 = vector.shape_cast %220 : vector<1x4x16xf32> to vector<4x16xf32>
    %222 = vector.shape_cast %219 : vector<4x16xf32> to vector<1x4x16xf32>
    tpu.vector_store %arg4[%c0_185, %c0_186, %c208], %222 {strides = array<i32>} : memref<1x4x256xf32, #tpu.memory_space<vmem>>, vector<1x4x16xf32>,
    %223 = vector.extract_strided_slice %166 {offsets = [0, 252], sizes = [4, 16], strides = [1, 1]} : vector<4x288xf32> to vector<4x16xf32>
    %c0_187 = arith.constant 0 : index
    %c0_188 = arith.constant 0 : index
    %c224 = arith.constant 224 : index
    %224 = vector.load %arg4[%c0_187, %c0_188, %c224] : memref<1x4x256xf32, #tpu.memory_space<vmem>>, vector<1x4x16xf32>
    %225 = vector.shape_cast %224 : vector<1x4x16xf32> to vector<4x16xf32>
    %226 = vector.shape_cast %223 : vector<4x16xf32> to vector<1x4x16xf32>
    tpu.vector_store %arg4[%c0_187, %c0_188, %c224], %226 {strides = array<i32>} : memref<1x4x256xf32, #tpu.memory_space<vmem>>, vector<1x4x16xf32>,
    %227 = vector.extract_strided_slice %166 {offsets = [0, 270], sizes = [4, 16], strides = [1, 1]} : vector<4x288xf32> to vector<4x16xf32>
    %c0_189 = arith.constant 0 : index
    %c0_190 = arith.constant 0 : index
    %c240 = arith.constant 240 : index
    %228 = vector.load %arg4[%c0_189, %c0_190, %c240] : memref<1x4x256xf32, #tpu.memory_space<vmem>>, vector<1x4x16xf32>
    %229 = vector.shape_cast %228 : vector<1x4x16xf32> to vector<4x16xf32>
    %230 = vector.shape_cast %227 : vector<4x16xf32> to vector<1x4x16xf32>
    tpu.vector_store %arg4[%c0_189, %c0_190, %c240], %230 {strides = array<i32>} : memref<1x4x256xf32, #tpu.memory_space<vmem>>, vector<1x4x16xf32>,
    return
  }
  func.func @transform_0(%arg0: i32) -> (i32, i32, i32) {
    %c0_i32 = arith.constant 0 : i32
    %c0_i32_0 = arith.constant 0 : i32
    %c0_i32_1 = arith.constant 0 : i32
    return %arg0, %c0_i32, %c0_i32_0 : i32, i32, i32
  }
  func.func @transform_1(%arg0: i32) -> (i32, i32, i32) {
    %c0_i32 = arith.constant 0 : i32
    %c0_i32_0 = arith.constant 0 : i32
    %c0_i32_1 = arith.constant 0 : i32
    %c0_i32_2 = arith.constant 0 : i32
    return %c0_i32, %c0_i32_0, %c0_i32_1 : i32, i32, i32
  }
  func.func @transform_2(%arg0: i32) -> (i32, i32, i32) {
    %c0_i32 = arith.constant 0 : i32
    %c0_i32_0 = arith.constant 0 : i32
    %c0_i32_1 = arith.constant 0 : i32
    %c0_i32_2 = arith.constant 0 : i32
    return %c0_i32, %c0_i32_0, %c0_i32_1 : i32, i32, i32
  }
  func.func @transform_3(%arg0: i32) -> (i32, i32, i32) {
    %c0_i32 = arith.constant 0 : i32
    %c0_i32_0 = arith.constant 0 : i32
    %c0_i32_1 = arith.constant 0 : i32
    return %arg0, %c0_i32, %c0_i32_0 : i32, i32, i32
  }
}

</mosaic_0001>

<bundles_post_ra>
// kernel: basic_unit_nchw.1
= control target key start
LH: loop header
LB: loop body
LE: loop exit
PB: predicated region body
PF: predicated region fallthrough
CT: control target
= control target key end

     0   :  { %s3372_s12 = smov 0   ;;  %s4550_s0 = inlined_call_operand.vmem [shape: f32[2,4,256], index: 0, kind: input, shape index: {}]   ;;  %s4551_s1 = inlined_call_operand.vmem [shape: f32[9,32,4], index: 1, kind: input, shape index: {}]   ;;  %s4552_s2 = inlined_call_operand.vmem [shape: f32[9,4,32], index: 2, kind: input, shape index: {}]   ;;  %s4553_s3 = inlined_call_operand.vmem [shape: f32[2,4,256], index: 3, kind: output, shape index: {}]  }
   0x1 LB: > { %s2807_s13 = sadd.s32 4294967295, %s3313_s12   ;;  %p2811_p0 = scmp.ge.s32.totalorder %s3313_s12, 1  ;;  %s3313_s12 = sphi %s3372_s12, %s13_s12  }
   0x2   : > { %p137_p1 = scmp.lt.s32.totalorder %s3313_s12, 3 }
   0x4   : > { %p138_p2 = pnand %p2811_p0, %p137_p1 }
   0x5   : > { %p161_p3 = scmp.lt.s32.totalorder (!%p138_p2), %s2807_s13, 1  ;;  %s3315_s18 = smov (!%p138_p2), 23  }
   0x6   : > { %141 = sbr.rel (%p138_p2) target bundleno = 1314 (0x522), region = 32  ;;  %s3316_s19 = smov (!%p138_p2), 19  }
   0x7   : > { %s3317_s20 = smov (!%p138_p2), 31   ;;  %s3318_s21 = smov (!%p138_p2), 25  }
   0x8   : > { %s3319_s22 = smov (!%p138_p2), 21   ;;  %s3320_s23 = smov (!%p138_p2), 27  }
   0x9   : > { %s3321_s24 = smov (!%p138_p2), 35   ;;  %s3322_s25 = smov (!%p138_p2), 29  }
   0xa   : > { %s3323_s26 = smov (!%p138_p2), 37   ;;  %s3324_s27 = smov (!%p138_p2), 39  }
   0xb   : > { %s4639_s13 = smov (!%p161_p3, %s2807_s13), 1  ;;  %s3325_s28 = smov 33   ;;  %v3331_v1 = vmov 0.0   ;;  %vm179_vm0 = vcmask 281752   ;;  %vm172_vm1 = vcmask 699392   ;;  %vm184_vm2 = vcmask 429352  }
   0xc   : > { %s3020_s14 = sshll.u32 %s4639_s13, 3  ;;  %s3326_s29 = smov 41   ;;  %171 = vst [vmem:[#allocation2] sm:$0xff] %v3331_v1  ;;  %vm189_vm3 = vcmask 576952   ;;  %vm194_vm4 = vcmask 724552   ;;  %vm199_vm5 = vcmask 872152  }
   0xd   : > { %s165_s17 = scalar_lea.vmem %s4550_s0, %s3020_s14  ;;  %s3327_s30 = smov 45   ;;  %173 = vst.msk [vmem:[#allocation2 + $0x8] sm:$0xf] %vm172_vm1, %v3331_v1  ;;  %vm212_vm6 = vcmask 1044472   ;;  %vm213_vm7 = vcmask 121860   ;;  %vm209_vm8 = vcmask 252928  }
   0xe   : > { %v174_v0 = vld [vmem:[%s165_s17] sm:$0xff]  ;;  %s3328_s4 = smov 43   ;;  %s3329_s5 = smov 47   ;;  %vm204_vm9 = vcmask 1019752   ;;  %vm214_vm10 = vmor %vm213_vm7, %vm212_vm6  ;;  %vm224_vm11 = vcmask 285696   ;;  %vm219_vm12 = vcmask 265352  }
   0xf   : > { %186 = vrot.lane.b32.xlu1 %v174_v0, %s3315_s18  ;;  %176 = vrot.lane.b32.xlu0 %v174_v0, %s3316_s19  ;;  %s3330_s6 = smov 49   ;;  %vm232_vm13 = vcmask 302080   ;;  %vm227_vm14 = vcmask 412952   ;;  %vm248_vm15 = vcmask 334848   ;;  %vm235_vm1 = vcmask 560552   ;;  %s3332_s7 = smov 127  }
  0x10   : > { %206 = vrot.lane.b32.xlu2 %v174_v0, %s3317_s20  ;;  %vm264_vm6 = vcmask 367616   ;;  %vm256_vm7 = vcmask 351232   ;;  %s3333_s8 = smov 126   ;;  %s3334_s9 = smov 110   ;;  %v3421_v57 = vld [vmem:[%s4551_s1] sm:$0xff] }
  0x11   : > { %s3335_s10 = smov 109   ;;  %s3336_s11 = smov 108  }
  0x12   : > { %s3337_s17 = smov 92   ;;  %s3338_s18 = smov 91  }
  0x13   : > { %s3342_s13 = smov 120  }
  0x17   : > { %191 = vrot.lane.b32.xlu1 %v174_v0, %s3318_s21  ;;  %181 = vrot.lane.b32.xlu0 %v174_v0, %s3319_s22  ;;  %s3339_s22 = smov 90  }
  0x18   : > { %196 = vrot.lane.b32.xlu2 %v174_v0, %s3320_s23 }
  0x1f   : > { %221 = vrot.lane.b32.xlu1 %v174_v0, %s3321_s24  ;;  %201 = vrot.lane.b32.xlu0 %v174_v0, %s3322_s25 }
  0x20   : > { %229 = vrot.lane.b32.xlu2 %v174_v0, %s3323_s26 }
  0x27   : > { %237 = vrot.lane.b32.xlu1 %v174_v0, %s3324_s27  ;;  %216 = vrot.lane.b32.xlu0 %v174_v0, %s3325_s28 }
  0x28   : > { %245 = vrot.lane.b32.xlu2 %v174_v0, %s3326_s29 }
  0x2f   : > { %261 = vrot.lane.b32.xlu1 %v174_v0, %s3327_s30  ;;  %253 = vrot.lane.b32.xlu0 %v174_v0, %s3328_s4  ;;  %s4510_s30 = scalar_lea.vmem %s4553_s3, %s3020_s14  ;;  %s3343_s14 = smov 112  }
  0x30   : > { %271 = vrot.lane.b32.xlu2 %v174_v0, %s3329_s5  ;;  %s3350_s4 = smov 102   ;;  %s3351_s5 = smov 116  }
  0x37   : > { %277 = vrot.lane.b32.xlu0 %v174_v0, %s3330_s6 }
  0x6a   : > { %v207_v2 = vpop.permute.xlu2 %206 }
  0x6b   : > { %v208_v9 = vrot.slane %v207_v2, 4 }
  0x6d   : > { %v210_v12 = vsel %vm209_vm8, %v208_v9, %v207_v2  ;;  %vm259_vm8 = vcmask 1003352  }
  0x72   : > { %v197_v3 = vpop.permute.xlu2 %196 }
  0x7a   : > { %v230_v8 = vpop.permute.xlu2 %229 }
  0x7b   : > { %v231_v15 = vrot.slane %v230_v8, 4 }
  0x7d   : > { %v233_v21 = vsel %vm232_vm13, %v230_v8, %v231_v15  ;;  %vm311_vm13 = vcmask 31744  }
  0x81   : > { %v187_v4 = vpop.permute.xlu1 %186  ;;  %v177_v5 = vpop.permute.xlu0 %176 }
  0x82   : > { %180 = vst.msk [vmem:[#allocation2] sm:$0xf] %vm179_vm0, %v177_v5  ;;  %v246_v13 = vpop.permute.xlu2 %245  ;;  %vm240_vm0 = vcmask 318464  }
  0x83   : > { %v247_v16 = vrot.slane %v246_v13, 4 }
  0x85   : > { %v249_v22 = vsel %vm248_vm15, %v246_v13, %v247_v16  ;;  %vm4562_vm15 = vcmask 1031168  }
  0x89   : > { %v192_v6 = vpop.permute.xlu1 %191  ;;  %v182_v7 = vpop.permute.xlu0 %181 }
  0x8a   : > { %185 = vst.msk [vmem:[#allocation2] sm:$0xf] %vm184_vm2, %v182_v7  ;;  %vm243_vm2 = vcmask 708152   ;;  %v272_v24 = vpop.permute.xlu2 %271  ;;  %v3446_v7 = vld [vmem:[%s4551_s1 + $0x10] sm:$0xff] }
  0x8b   : > { %190 = vst.msk [vmem:[#allocation2] sm:$0xf] %vm189_vm3, %v187_v4  ;;  %vm251_vm3 = vcmask 855752   ;;  %v273_v29 = vrot.slane %v272_v24, 4  ;;  %v2818_v24 = vld [vmem:[%s4551_s1 + $0x30] sm:$0xff] }
  0x8c   : > { %195 = vst.msk [vmem:[#allocation2] sm:$0xf] %vm194_vm4, %v192_v6  ;;  %vm267_vm4 = vcmask 1044456  }
  0x8d   : > { %200 = vst.msk [vmem:[#allocation2] sm:$0xf] %vm199_vm5, %v197_v3  ;;  %vm268_vm5 = vcmask 105476   ;;  %v3436_v3 = vld [vmem:[%s4551_s1 + $0x8] sm:$0xff] }
  0x91   : > { %v222_v10 = vpop.permute.xlu1 %221  ;;  %v202_v11 = vpop.permute.xlu0 %201 }
  0x92   : > { %205 = vst.msk [vmem:[#allocation2] sm:$0xf] %vm204_vm9, %v202_v11  ;;  %v223_v14 = vrot.slane %v222_v10, 4  ;;  %vm269_vm9 = vmor %vm268_vm5, %vm267_vm4  ;;  %vm4556_vm4 = vcmask 744448   ;;  %vm4555_vm5 = vcmask 736256  }
  0x93   : > { %215 = vst.msk [vmem:[#allocation2] sm:$0xff] %vm214_vm10, %v210_v12  ;;  %vm275_vm10 = vcmask 248952  }
  0x94   : > { %v225_v19 = vsel %vm224_vm11, %v222_v10, %v223_v14  ;;  %vm281_vm11 = vcmask 396552   ;;  %v3455_v10 = vld [vmem:[%s4551_s1 + $0x18] sm:$0xff]  ;;  %v2816_v14 = vld [vmem:[%s4551_s1 + $0x20] sm:$0xff] }
  0x99   : > { %v238_v17 = vpop.permute.xlu1 %237  ;;  %v217_v18 = vpop.permute.xlu0 %216 }
  0x9a   : > { %v239_v20 = vrot.slane %v238_v17, 4  ;;  %220 = vst.msk [vmem:[#allocation2 + $0x4] sm:$0xf] %vm219_vm12, %v217_v18  ;;  %vm4554_vm12 = vcmask 1043456  }
  0x9b   : > { %228 = vst.msk [vmem:[#allocation2 + $0x4] sm:$0xf] %vm227_vm14, %v225_v19  ;;  %vm4560_vm14 = vcmask 1039360  }
  0x9c   : > { %v241_v23 = vsel %vm240_vm0, %v238_v17, %v239_v20  ;;  %236 = vst.msk [vmem:[#allocation2 + $0x4] sm:$0xf] %vm235_vm1, %v233_v21  ;;  %v3466_v17 = vld [vmem:[%s4551_s1 + $0x40] sm:$0xff]  ;;  %v2817_v21 = vld [vmem:[%s4551_s1 + $0x28] sm:$0xff]  ;;  %vm4561_vm0 = vcmask 900096   ;;  %vm4559_vm1 = vcmask 891904  }
  0x9d   : > { %244 = vst.msk [vmem:[#allocation2 + $0x4] sm:$0xf] %vm243_vm2, %v241_v23  ;;  %vm4557_vm2 = vcmask 752640  }
  0x9e   : > { %252 = vst.msk [vmem:[#allocation2 + $0x4] sm:$0xf] %vm251_vm3, %v249_v22  ;;  %v3488_v22 = vld [vmem:[%s4551_s1 + $0x48] sm:$0xff]  ;;  %vm4558_vm3 = vcmask 883712  }
  0xa1   : > { %v262_v25 = vpop.permute.xlu1 %261  ;;  %v254_v26 = vpop.permute.xlu0 %253 }
  0xa2   : > { %v263_v27 = vrot.slane %v262_v25, 4  ;;  %v255_v28 = vrot.slane %v254_v26, 4 }
  0xa4   : > { %v265_v30 = vsel %vm264_vm6, %v262_v25, %v263_v27  ;;  %v257_v31 = vsel %vm256_vm7, %v254_v26, %v255_v28  ;;  %v3504_v26 = vld [vmem:[%s4551_s1 + $0x50] sm:$0xff]  ;;  %vm1528_vm6 = vcmask 154624   ;;  %vm1533_vm7 = vcmask 703896  }
  0xa5   : > { %260 = vst.msk [vmem:[#allocation2 + $0x4] sm:$0xf] %vm259_vm8, %v257_v31  ;;  %vm1594_vm8 = vcmask 1047704  }
  0xa6   : > { %270 = vst.msk [vmem:[#allocation2 + $0x4] sm:$0xff] %vm269_vm9, %v265_v30  ;;  %v2819_v30 = vld [vmem:[%s4551_s1 + $0x38] sm:$0xff]  ;;  %vm1608_vm9 = vcmask 302360  }
  0xa7   : > { %276 = vst.msk [vmem:[#allocation2 + $0x8] sm:$0xf] %vm275_vm10, %v273_v29  ;;  %vm1613_vm10 = vcmask 449960  }
  0xa8   : > { %1529 = vst.msk [vmem:[#allocation3] sm:$0xff] %vm1528_vm6, %v3331_v1 }
  0xa9   : > { %v278_v32 = vpop.permute.xlu0 %277  ;;  %1530 = vst.msk [vmem:[#allocation3 + $0x18] sm:$0xff] %vm1528_vm6, %v3331_v1 }
  0xaa   : > { %v279_v33 = vrot.slane %v278_v32, 4  ;;  %v3519_v32 = vld [vmem:[%s4551_s1 + $0x58] sm:$0xff]  ;;  %1531 = vst.msk [vmem:[#allocation3 + $0x30] sm:$0xff] %vm1528_vm6, %v3331_v1 }
  0xab   : > { %1532 = vst.msk [vmem:[#allocation3 + $0x48] sm:$0xff] %vm1528_vm6, %v3331_v1 }
  0xac   : > { %282 = vst.msk [vmem:[#allocation2 + $0x8] sm:$0xf] %vm281_vm11, %v279_v33  ;;  %vm1618_vm11 = vcmask 597560  }
  0xad   : > { %v3391_v34 = vld [vmem:[#allocation2] sm:$0xff]  ;;  %1534 = vst.msk [vmem:[#allocation3 + $0x10] sm:$0xff] %vm1533_vm7, %v3331_v1 }
  0xae   : > { %296 = vst [vmem:[#allocation1] ss:$2 sm:$0xff] %v3391_v34 }
  0xaf   : > { %1535 = vst.msk [vmem:[#allocation3 + $0x28] sm:$0xff] %vm1533_vm7, %v3331_v1 }
  0xb0   : > { %1536 = vst.msk [vmem:[#allocation3 + $0x40] sm:$0xff] %vm1533_vm7, %v3331_v1 }
  0xb1   : > { %1537 = vst.msk [vmem:[#allocation3 + $0x58] sm:$0xff] %vm1533_vm7, %v3331_v1  ;;  %vm1633_vm7 = vcmask 1040360  }
  0xb3   : > { %v288_v35 = vld [vmem:[#allocation2 + $0x8] sm:$0xf] }
  0xb4   : > { %298 = vst [vmem:[#allocation1 + $0x10] ss:$2 sm:$0xff] %v288_v35  ;;  %v535_v42 = vld [vmem:[#allocation2 + $0x8] sm:$0xf] }
  0xb5   : > { %v300_v36 = vld.sshfl [vmem:[#allocation1 + $0x8] sm:$0xff pattern:$0x75316420]  ;;  %v299_v37 = vld.sshfl [vmem:[#allocation1] sm:$0xff pattern:$0x75316420] }
  0xb6   : > { %304 = vrot.lane.b32.xlu2 %v300_v36, %s3332_s7  ;;  %302 = vrot.lane.b32.xlu1 %v299_v37, %s3332_s7  ;;  %418 = vst [vmem:[#allocation1] ss:$2 sm:$0xff] %v3391_v34  ;;  %v676_v46 = vld [vmem:[#allocation2 + $0x8] sm:$0xf] }
  0xb7   : > { %v817_v50 = vld [vmem:[#allocation2 + $0x8] sm:$0xf] }
  0xb8   : > { %v958_v54 = vld [vmem:[#allocation2 + $0x8] sm:$0xf] }
  0xb9   : > { %v1099_v59 = vld [vmem:[#allocation2 + $0x8] sm:$0xf] }
  0xba   : > { %v1240_v62 = vld [vmem:[#allocation2 + $0x8] sm:$0xf] }
  0xbb   : > { %v301_v38 = vld.sshfl [vmem:[#allocation1 + $0x10] sm:$0xff pattern:$0x75316420] }
  0xbc   : > { %306 = vrot.lane.b32.xlu0 %v301_v38, %s3332_s7  ;;  %420 = vst [vmem:[#allocation1 + $0x10] ss:$2 sm:$0xff] %v288_v35  ;;  %v1381_v4 = vld [vmem:[#allocation2 + $0x8] sm:$0xf]  ;;  %v2869_v38 = vld [vmem:[%s4551_s1 + $0x60] sm:$0xff] }
  0xbd   : > { %v421_v39 = vld.sshfl [vmem:[#allocation1] sm:$0xff pattern:$0x75316420]  ;;  %v3398_v40 = vld.sshfl [vmem:[#allocation1 + $0x8] sm:$0xff pattern:$0x75316420] }
  0xbe   : > { %2835 = vmatpush.msk.msra.mxu3 %vm4554_vm12, %v421_v39  ;;  %538 = vst [vmem:[#allocation1] ss:$2 sm:$0xff] %v3391_v34 }
  0xbf   : > { %2836 = vmatmul.msk.f32.vlgmr.msra.gmra.mxu3 %vm311_vm13, %v3421_v57 }
  0xc3   : > { %v3402_v41 = vld.sshfl [vmem:[#allocation1 + $0x10] sm:$0xff pattern:$0x75316420] }
  0xc4   : > { %540 = vst [vmem:[#allocation1 + $0x10] ss:$2 sm:$0xff] %v535_v42  ;;  %v2870_v42 = vld [vmem:[%s4551_s1 + $0x68] sm:$0xff] }
  0xc5   : > { %v542_v43 = vld.sshfl [vmem:[#allocation1 + $0x8] sm:$0xff pattern:$0x75316420]  ;;  %v541_v44 = vld.sshfl [vmem:[#allocation1] sm:$0xff pattern:$0x75316420] }
  0xc6   : > { %546 = vrot.lane.b32.xlu2 %v542_v43, %s3333_s8  ;;  %544 = vrot.lane.b32.xlu1 %v541_v44, %s3333_s8  ;;  %679 = vst [vmem:[#allocation1] ss:$2 sm:$0xff] %v3391_v34 }
  0xc7   : > { %2837 = vmatmul.msk.f32.gmra.mxu3 %vm311_vm13, %v3436_v3 }
  0xcb   : > { %v543_v45 = vld.sshfl [vmem:[#allocation1 + $0x10] sm:$0xff pattern:$0x75316420] }
  0xcc   : > { %681 = vst [vmem:[#allocation1 + $0x10] ss:$2 sm:$0xff] %v676_v46 }
  0xcd   : > { %v683_v47 = vld.sshfl [vmem:[#allocation1 + $0x8] sm:$0xff pattern:$0x75316420]  ;;  %v682_v48 = vld.sshfl [vmem:[#allocation1] sm:$0xff pattern:$0x75316420] }
  0xce   : > { %687 = vrot.lane.b32.xlu1 %v683_v47, %s3334_s9  ;;  %820 = vst [vmem:[#allocation1] ss:$2 sm:$0xff] %v3391_v34  ;;  %685 = vrot.lane.b32.xlu0 %v682_v48, %s3334_s9  ;;  %v2871_v47 = vld [vmem:[%s4551_s1 + $0x70] sm:$0xff] }
  0xcf   : > { %548 = vrot.lane.b32.xlu2 %v543_v45, %s3333_s8  ;;  %2838 = vmatmul.msk.f32.gmra.mxu3 %vm311_vm13, %v3446_v7 }
  0xd3   : > { %v684_v49 = vld.sshfl [vmem:[#allocation1 + $0x10] sm:$0xff pattern:$0x75316420] }
  0xd4   : > { %822 = vst [vmem:[#allocation1 + $0x10] ss:$2 sm:$0xff] %v817_v50 }
  0xd5   : > { %v823_v51 = vld.sshfl [vmem:[#allocation1] sm:$0xff pattern:$0x75316420]  ;;  %v824_v52 = vld.sshfl [vmem:[#allocation1 + $0x8] sm:$0xff pattern:$0x75316420] }
  0xd6   : > { %826 = vrot.lane.b32.xlu1 %v823_v51, %s3335_s10  ;;  %961 = vst [vmem:[#allocation1] ss:$2 sm:$0xff] %v3391_v34  ;;  %689 = vrot.lane.b32.xlu0 %v684_v49, %s3334_s9  ;;  %v2872_v49 = vld [vmem:[%s4551_s1 + $0x78] sm:$0xff]  ;;  %v3582_v51 = vld [vmem:[%s4551_s1 + $0xa0] sm:$0xff] }
  0xd7   : > { %828 = vrot.lane.b32.xlu2 %v824_v52, %s3335_s10  ;;  %2839 = vmatmul.msk.f32.gmra.mxu3 %vm311_vm13, %v3455_v10 }
  0xdb   : > { %v825_v53 = vld.sshfl [vmem:[#allocation1 + $0x10] sm:$0xff pattern:$0x75316420] }
  0xdc   : > { %963 = vst [vmem:[#allocation1 + $0x10] ss:$2 sm:$0xff] %v958_v54 }
  0xdd   : > { %v965_v55 = vld.sshfl [vmem:[#allocation1 + $0x8] sm:$0xff pattern:$0x75316420]  ;;  %v964_v56 = vld.sshfl [vmem:[#allocation1] sm:$0xff pattern:$0x75316420] }
  0xde   : > { %969 = vrot.lane.b32.xlu1 %v965_v55, %s3336_s11  ;;  %1102 = vst [vmem:[#allocation1] ss:$2 sm:$0xff] %v3391_v34  ;;  %830 = vrot.lane.b32.xlu0 %v825_v53, %s3335_s10 }
  0xe3   : > { %v966_v58 = vld.sshfl [vmem:[#allocation1 + $0x10] sm:$0xff pattern:$0x75316420] }
  0xe4   : > { %971 = vrot.lane.b32.xlu2 %v966_v58, %s3336_s11  ;;  %1104 = vst [vmem:[#allocation1 + $0x10] ss:$2 sm:$0xff] %v1099_v59  ;;  %v3621_v58 = vld [vmem:[%s4551_s1 + $0xb8] sm:$0xff]  ;;  %v2888_v59 = vld [vmem:[%s4551_s1 + $0x80] sm:$0xff] }
  0xe5   : > { %v1105_v60 = vld.sshfl [vmem:[#allocation1] sm:$0xff pattern:$0x75316420]  ;;  %v1106_v61 = vld.sshfl [vmem:[#allocation1 + $0x8] sm:$0xff pattern:$0x75316420] }
  0xe6   : > { %1108 = vrot.lane.b32.xlu1 %v1105_v60, %s3337_s17  ;;  %967 = vrot.lane.b32.xlu0 %v964_v56, %s3336_s11  ;;  %1243 = vst [vmem:[#allocation1] ss:$2 sm:$0xff] %v3391_v34  ;;  %v3598_v56 = vld [vmem:[%s4551_s1 + $0xa8] sm:$0xff]  ;;  %v3635_v60 = vld [vmem:[%s4551_s1 + $0xc0] sm:$0xff] }
  0xeb   : > { %v1107_v63 = vld.sshfl [vmem:[#allocation1 + $0x10] sm:$0xff pattern:$0x75316420] }
  0xec   : > { %1110 = vrot.lane.b32.xlu2 %v1106_v61, %s3337_s17  ;;  %1245 = vst [vmem:[#allocation1 + $0x10] ss:$2 sm:$0xff] %v1240_v62 }
  0xed   : > { %v1247_v0 = vld.sshfl [vmem:[#allocation1 + $0x8] sm:$0xff pattern:$0x75316420]  ;;  %v1246_v2 = vld.sshfl [vmem:[#allocation1] sm:$0xff pattern:$0x75316420] }
  0xee   : > { %1251 = vrot.lane.b32.xlu1 %v1247_v0, %s3338_s18  ;;  %1249 = vrot.lane.b32.xlu0 %v1246_v2, %s3338_s18  ;;  %1384 = vst [vmem:[#allocation1] ss:$2 sm:$0xff] %v3391_v34  ;;  %v3652_v2 = vld [vmem:[%s4551_s1 + $0xc8] sm:$0xff] }
  0xf3   : > { %v1248_v5 = vld.sshfl [vmem:[#allocation1 + $0x10] sm:$0xff pattern:$0x75316420] }
  0xf4   : > { %1112 = vrot.lane.b32.xlu2 %v1107_v63, %s3337_s17  ;;  %1386 = vst [vmem:[#allocation1 + $0x10] ss:$2 sm:$0xff] %v1381_v4  ;;  %v2889_v63 = vld [vmem:[%s4551_s1 + $0x88] sm:$0xff]  ;;  %v2890_v4 = vld [vmem:[%s4551_s1 + $0x90] sm:$0xff] }
  0xf5   : > { %v1387_v6 = vld.sshfl [vmem:[#allocation1] sm:$0xff pattern:$0x75316420]  ;;  %v1388_v8 = vld.sshfl [vmem:[#allocation1 + $0x8] sm:$0xff pattern:$0x75316420] }
  0xf6   : > { %1390 = vrot.lane.b32.xlu1 %v1387_v6, %s3339_s22  ;;  %1253 = vrot.lane.b32.xlu0 %v1248_v5, %s3338_s18  ;;  %v3668_v5 = vld [vmem:[%s4551_s1 + $0xd0] sm:$0xff] }
  0xfb   : > { %v1389_v9 = vld.sshfl [vmem:[#allocation1 + $0x10] sm:$0xff pattern:$0x75316420] }
  0xfc   : > { %1392 = vrot.lane.b32.xlu2 %v1388_v8, %s3339_s22  ;;  %v3683_v8 = vld [vmem:[%s4551_s1 + $0xd8] sm:$0xff] }
  0xfe   : > { %1394 = vrot.lane.b32.xlu0 %v1389_v9, %s3339_s22 }
 0x110   : > { %v305_v11 = vpop.permute.xlu2 %304 }
 0x120   : > { %v547_v12 = vpop.permute.xlu2 %546 }
 0x128   : > { %v303_v13 = vpop.permute.xlu1 %302 }
 0x129   : > { %v549_v15 = vpop.permute.xlu2 %548  ;;  %v309_v16 = vsel %vm4560_vm14, %v303_v13, %v305_v11 }
 0x12a   : > { %2820 = vmatpush.msk.msra.mxu0 %vm4554_vm12, %v309_v16  ;;  %v552_v18 = vsel %vm4562_vm15, %v547_v12, %v549_v15 }
 0x12b   : > { %2859 = vmatpush.msk.msrb.mxu3 %vm4554_vm12, %v552_v18  ;;  %2821 = vmatmul.msk.f32.vlgmr.msra.gmra.mxu0 %vm311_vm13, %v2816_v14 }
 0x12c   : > { %2840 = vmatpush.msk.msrb.mxu0 %vm4554_vm12, %v3398_v40  ;;  %2860 = vmatmul.msk.f32.vlgmr.msrb.gmra.mxu3 %vm311_vm13, %v3466_v17 }
 0x12e   : > { %2864 = vmatpush.msk.msra.mxu0 %vm4554_vm12, %v549_v15  ;;  %v307_v19 = vpop.permute.xlu0 %306 }
 0x12f   : > { %2830 = vmatpush.msk.msra.mxu2 %vm4554_vm12, %v307_v19  ;;  %v310_v20 = vsel %vm4560_vm14, %v305_v11, %v307_v19  ;;  %vm1663_vm14 = vcmask 876360  }
 0x130   : > { %2825 = vmatpush.msk.msra.mxu1 %vm4554_vm12, %v310_v20  ;;  %2831 = vmatmul.msk.f32.vlgmr.msra.gmra.mxu2 %vm311_vm13, %v2816_v14  ;;  %v2946_v20 = vld [vmem:[%s4551_s1 + $0xe8] sm:$0xff] }
 0x131   : > { %2826 = vmatmul.msk.f32.vlgmr.msra.gmra.mxu1 %vm311_vm13, %v2816_v14  ;;  %v829_v27 = vpop.permute.xlu2 %828 }
 0x132   : > { %2845 = vmatpush.msk.msrb.mxu1 %vm4554_vm12, %v3402_v41 }
 0x133   : > { %2822 = vmatmul.msk.f32.gmra.mxu0 %vm311_vm13, %v2817_v21 }
 0x134   : > { %2861 = vmatmul.msk.f32.gmra.mxu3 %vm311_vm13, %v3488_v22 }
 0x138   : > { %v545_v23 = vpop.permute.xlu1 %544  ;;  %2832 = vmatmul.msk.f32.gmra.mxu2 %vm311_vm13, %v2817_v21 }
 0x139   : > { %2827 = vmatmul.msk.f32.gmra.mxu1 %vm311_vm13, %v2817_v21  ;;  %v551_v25 = vsel %vm4562_vm15, %v545_v23, %v547_v12  ;;  %v2945_v12 = vld [vmem:[%s4551_s1 + $0xe0] sm:$0xff]  ;;  %vm1597_vm15 = vcmask 416768  }
 0x13a   : > { %2854 = vmatpush.msk.msrb.mxu2 %vm4554_vm12, %v551_v25 }
 0x13b   : > { %2823 = vmatmul.msk.f32.gmra.mxu0 %vm311_vm13, %v2818_v24 }
 0x13c   : > { %2862 = vmatmul.msk.f32.gmra.mxu3 %vm311_vm13, %v3504_v26 }
 0x13e   : > { %v972_v33 = vpop.permute.xlu2 %971 }
 0x140   : > { %v688_v28 = vpop.permute.xlu1 %687  ;;  %2833 = vmatmul.msk.f32.gmra.mxu2 %vm311_vm13, %v2818_v24  ;;  %v686_v29 = vpop.permute.xlu0 %685 }
 0x141   : > { %v692_v31 = vsel %vm4561_vm0, %v686_v29, %v688_v28  ;;  %2828 = vmatmul.msk.f32.gmra.mxu1 %vm311_vm13, %v2818_v24  ;;  %v2947_v24 = vld [vmem:[%s4551_s1 + $0xf0] sm:$0xff]  ;;  %v2948_v29 = vld [vmem:[%s4551_s1 + $0xf8] sm:$0xff] }
 0x142   : > { %2873 = vmatpush.msk.msra.mxu1 %vm4554_vm12, %v692_v31 }
 0x143   : > { %2824 = vmatmul.msk.f32.gmra.mxu0 %vm311_vm13, %v2819_v30 }
 0x144   : > { %2863 = vmatmul.msk.f32.gmra.mxu3 %vm311_vm13, %v3519_v32 }
 0x146   : > { %v1111_v39 = vpop.permute.xlu2 %1110 }
 0x148   : > { %v827_v34 = vpop.permute.xlu1 %826  ;;  %2834 = vmatmul.msk.f32.gmra.mxu2 %vm311_vm13, %v2819_v30  ;;  %v690_v35 = vpop.permute.xlu0 %689 }
 0x149   : > { %v833_v36 = vsel %vm4559_vm1, %v827_v34, %v829_v27  ;;  %v693_v37 = vsel %vm4561_vm0, %v688_v28, %v690_v35  ;;  %2829 = vmatmul.msk.f32.gmra.mxu1 %vm311_vm13, %v2819_v30  ;;  %2883 = vmatpush.msk.msra.mxu3 %vm4554_vm12, %v690_v35  ;;  %vm1668_vm0 = vcmask 1023960  }
 0x14a   : > { %2878 = vmatpush.msk.msra.mxu2 %vm4554_vm12, %v693_v37 }
 0x14b   : > { %2841 = vmatmul.msk.f32.vlgmr.msrb.gmra.mxu0 %vm311_vm13, %v3421_v57 }
 0x14c   : > { %2884 = vmatmul.msk.f32.vlgmr.msra.gmra.mxu3 %vm311_vm13, %v2869_v38  ;;  %2892 = vmatpush.msk.msrb.mxu0 %vm4554_vm12, %v833_v36 }
 0x14e   : > { %v1113_v43 = vpop.permute.xlu2 %1112 }
 0x14f   : > { %v1116_v48 = vsel %vm4557_vm2, %v1111_v39, %v1113_v43 }
 0x150   : > { %2855 = vmatmul.msk.f32.vlgmr.msrb.gmra.mxu2 %vm311_vm13, %v3466_v17  ;;  %v831_v40 = vpop.permute.xlu0 %830  ;;  %v970_v44 = vpop.permute.xlu1 %969 }
 0x151   : > { %v834_v41 = vsel %vm4559_vm1, %v829_v27, %v831_v40  ;;  %2846 = vmatmul.msk.f32.vlgmr.msrb.gmra.mxu1 %vm311_vm13, %v3421_v57  ;;  %2902 = vmatpush.msk.msrb.mxu2 %vm4554_vm12, %v831_v40  ;;  %v975_v52 = vsel %vm4558_vm3, %v970_v44, %v972_v33  ;;  %v3610_v57 = vld [vmem:[%s4551_s1 + $0xb0] sm:$0xff]  ;;  %vm1658_vm1 = vcmask 728760  }
 0x152   : > { %2897 = vmatpush.msk.msrb.mxu1 %vm4554_vm12, %v834_v41 }
 0x153   : > { %2842 = vmatmul.msk.f32.gmra.mxu0 %vm311_vm13, %v3436_v3 }
 0x154   : > { %2885 = vmatmul.msk.f32.gmra.mxu3 %vm311_vm13, %v2870_v42 }
 0x156   : > { %v1393_v13 = vpop.permute.xlu2 %1392 }
 0x158   : > { %2856 = vmatmul.msk.f32.gmra.mxu2 %vm311_vm13, %v3488_v22  ;;  %v968_v45 = vpop.permute.xlu0 %967  ;;  %v1109_v54 = vpop.permute.xlu1 %1108 }
 0x159   : > { %v974_v46 = vsel %vm4558_vm3, %v968_v45, %v970_v44  ;;  %2847 = vmatmul.msk.f32.gmra.mxu1 %vm311_vm13, %v3436_v3  ;;  %v1115_v55 = vsel %vm4557_vm2, %v1109_v54, %v1111_v39  ;;  %v3655_v3 = vpop.f32.mrf.mxu3  ;;  %vm4564_vm2 = vcmask 433560   ;;  %vm1653_vm3 = vcmask 581160  }
 0x15a   : > { %2911 = vmatpush.msk.msrb.mxu3 %vm4554_vm12, %v974_v46 }
 0x15b   : > { %2843 = vmatmul.msk.f32.gmra.mxu0 %vm311_vm13, %v3446_v7 }
 0x15c   : > { %2935 = vmatpush.msk.msra.mxu3 %vm4554_vm12, %v1116_v48 }
 0x15d   : > { %2886 = vmatmul.msk.f32.gmra.mxu3 %vm311_vm13, %v2871_v47 }
 0x160   : > { %2857 = vmatmul.msk.f32.gmra.mxu2 %vm311_vm13, %v3504_v26  ;;  %v1250_v50 = vpop.permute.xlu0 %1249  ;;  %v1252_v61 = vpop.permute.xlu1 %1251 }
 0x161   : > { %2848 = vmatmul.msk.f32.gmra.mxu1 %vm311_vm13, %v3446_v7  ;;  %v1256_v0 = vsel %vm4556_vm4, %v1250_v50, %v1252_v61  ;;  %v3671_v6 = vpop.f32.mrf.mxu3  ;;  %v2891_v7 = vld [vmem:[%s4551_s1 + $0x98] sm:$0xff] }
 0x163   : > { %2844 = vmatmul.msk.f32.gmra.mxu0 %vm311_vm13, %v3455_v10 }
 0x165   : > { %2887 = vmatmul.msk.f32.gmra.mxu3 %vm311_vm13, %v2872_v49 }
 0x168   : > { %2858 = vmatmul.msk.f32.gmra.mxu2 %vm311_vm13, %v3519_v32  ;;  %v1254_v53 = vpop.permute.xlu0 %1253 }
 0x169   : > { %2849 = vmatmul.msk.f32.gmra.mxu1 %vm311_vm13, %v3455_v10  ;;  %v1257_v62 = vsel %vm4556_vm4, %v1252_v61, %v1254_v53  ;;  %v3688_v9 = vpop.f32.mrf.mxu3  ;;  %v1391_v10 = vpop.permute.xlu1 %1390  ;;  %vm4563_vm4 = vcmask 285960  }
 0x16a   : > { %v1397_v14 = vsel %vm4555_vm5, %v1391_v10, %v1393_v13 }
 0x16b   : > { %2865 = vmatmul.msk.f32.vlgmr.msra.gmra.mxu0 %vm311_vm13, %v3466_v17 }
 0x16c   : > { %2916 = vmatpush.msk.msra.mxu0 %vm4554_vm12, %v975_v52 }
 0x16d   : > { %2912 = vmatmul.msk.f32.vlgmr.msrb.gmra.mxu3 %vm311_vm13, %v3582_v51 }
 0x16e   : > { %2959 = vmatpush.msk.msrb.mxu3 %vm4554_vm12, %v1254_v53 }
 0x170   : > { %2879 = vmatmul.msk.f32.vlgmr.msra.gmra.mxu2 %vm311_vm13, %v2869_v38  ;;  %v1395_v15 = vpop.permute.xlu0 %1394 }
 0x171   : > { %2930 = vmatpush.msk.msra.mxu2 %vm4554_vm12, %v1115_v55  ;;  %2874 = vmatmul.msk.f32.vlgmr.msra.gmra.mxu1 %vm311_vm13, %v2869_v38  ;;  %v3708_v18 = vpop.f32.mrf.mxu3  ;;  %v1398_v19 = vsel %vm4555_vm5, %v1393_v13, %v1395_v15  ;;  %v2965_v55 = vld [vmem:[%s4551_s1 + $0x108] sm:$0xff]  ;;  %v2967_v13 = vld [vmem:[%s4551_s1 + $0x118] sm:$0xff]  ;;  %vm4565_vm5 = vcmask 138360  }
 0x172   : > { %2921 = vmatpush.msk.msra.mxu1 %vm4554_vm12, %v972_v33 }
 0x173   : > { %2866 = vmatmul.msk.f32.gmra.mxu0 %vm311_vm13, %v3488_v22 }
 0x175   : > { %2913 = vmatmul.msk.f32.gmra.mxu3 %vm311_vm13, %v3598_v56 }
 0x178   : > { %2880 = vmatmul.msk.f32.gmra.mxu2 %vm311_vm13, %v2870_v42 }
 0x179   : > { %2875 = vmatmul.msk.f32.gmra.mxu1 %vm311_vm13, %v2870_v42 }
 0x17b   : > { %2867 = vmatmul.msk.f32.gmra.mxu0 %vm311_vm13, %v3504_v26 }
 0x17d   : > { %2914 = vmatmul.msk.f32.gmra.mxu3 %vm311_vm13, %v3610_v57 }
 0x180   : > { %2881 = vmatmul.msk.f32.gmra.mxu2 %vm311_vm13, %v2871_v47 }
 0x181   : > { %2876 = vmatmul.msk.f32.gmra.mxu1 %vm311_vm13, %v2871_v47 }
 0x183   : > { %2868 = vmatmul.msk.f32.gmra.mxu0 %vm311_vm13, %v3519_v32 }
 0x185   : > { %2915 = vmatmul.msk.f32.gmra.mxu3 %vm311_vm13, %v3621_v58 }
 0x188   : > { %2882 = vmatmul.msk.f32.gmra.mxu2 %vm311_vm13, %v2872_v49 }
 0x189   : > { %2877 = vmatmul.msk.f32.gmra.mxu1 %vm311_vm13, %v2872_v49  ;;  %v2964_v49 = vld [vmem:[%s4551_s1 + $0x100] sm:$0xff] }
 0x18b   : > { %2893 = vmatmul.msk.f32.vlgmr.msrb.gmra.mxu0 %vm311_vm13, %v2888_v59 }
 0x18c   : > { %2940 = vmatpush.msk.msrb.mxu0 %vm4554_vm12, %v1113_v43 }
 0x18d   : > { %2936 = vmatmul.msk.f32.vlgmr.msra.gmra.mxu3 %vm311_vm13, %v3635_v60 }
 0x190   : > { %2903 = vmatmul.msk.f32.vlgmr.msrb.gmra.mxu2 %vm311_vm13, %v2888_v59 }
 0x191   : > { %2954 = vmatpush.msk.msrb.mxu2 %vm4554_vm12, %v1257_v62  ;;  %2898 = vmatmul.msk.f32.vlgmr.msrb.gmra.mxu1 %vm311_vm13, %v2888_v59 }
 0x192   : > { %2949 = vmatpush.msk.msrb.mxu1 %vm4554_vm12, %v1256_v0 }
 0x193   : > { %2894 = vmatmul.msk.f32.gmra.mxu0 %vm311_vm13, %v2889_v63 }
 0x195   : > { %2937 = vmatmul.msk.f32.gmra.mxu3 %vm311_vm13, %v3652_v2 }
 0x198   : > { %2904 = vmatmul.msk.f32.gmra.mxu2 %vm311_vm13, %v2889_v63 }
 0x199   : > { %2899 = vmatmul.msk.f32.gmra.mxu1 %vm311_vm13, %v2889_v63  ;;  %v2966_v63 = vld [vmem:[%s4551_s1 + $0x110] sm:$0xff] }
 0x19b   : > { %2895 = vmatmul.msk.f32.gmra.mxu0 %vm311_vm13, %v2890_v4 }
 0x19d   : > { %2938 = vmatmul.msk.f32.gmra.mxu3 %vm311_vm13, %v3668_v5 }
 0x1a0   : > { %2905 = vmatmul.msk.f32.gmra.mxu2 %vm311_vm13, %v2890_v4 }
 0x1a1   : > { %2900 = vmatmul.msk.f32.gmra.mxu1 %vm311_vm13, %v2890_v4 }
 0x1a3   : > { %2896 = vmatmul.msk.f32.gmra.mxu0 %vm311_vm13, %v2891_v7 }
 0x1a5   : > { %2939 = vmatmul.msk.f32.gmra.mxu3 %vm311_vm13, %v3683_v8 }
 0x1a8   : > { %v3690_v11 = vpop.f32.mrf.mxu0  ;;  %2906 = vmatmul.msk.f32.gmra.mxu2 %vm311_vm13, %v2891_v7 }
 0x1a9   : > { %2901 = vmatmul.msk.f32.gmra.mxu1 %vm311_vm13, %v2891_v7 }
 0x1ab   : > { %2917 = vmatmul.msk.f32.vlgmr.msra.gmra.mxu0 %vm311_vm13, %v3582_v51 }
 0x1ac   : > { %2968 = vmatpush.msk.msra.mxu0 %vm4554_vm12, %v1397_v14 }
 0x1ad   : > { %2960 = vmatmul.msk.f32.vlgmr.msrb.gmra.mxu3 %vm311_vm13, %v2945_v12 }
 0x1ae   : > { %v3702_v16 = vpop.f32.mrf.mxu1 }
 0x1af   : > { %v3734_v25 = vpop.f32.mrf.mxu3 }
 0x1b0   : > { %v3704_v17 = vpop.f32.mrf.mxu0  ;;  %2931 = vmatmul.msk.f32.vlgmr.msra.gmra.mxu2 %vm311_vm13, %v3635_v60 }
 0x1b1   : > { %2978 = vmatpush.msk.msra.mxu2 %vm4554_vm12, %v1395_v15  ;;  %2922 = vmatmul.msk.f32.vlgmr.msra.gmra.mxu1 %vm311_vm13, %v3582_v51 }
 0x1b2   : > { %2973 = vmatpush.msk.msra.mxu1 %vm4554_vm12, %v1398_v19  ;;  %vm1628_vm12 = vcmask 892760  }
 0x1b3   : > { %v3718_v21 = vpop.f32.mrf.mxu2  ;;  %2918 = vmatmul.msk.f32.gmra.mxu0 %vm311_vm13, %v3598_v56 }
 0x1b5   : > { %2961 = vmatmul.msk.f32.gmra.mxu3 %vm311_vm13, %v2946_v20 }
 0x1b6   : > { %v3723_v22 = vpop.f32.mrf.mxu1 }
 0x1b7   : > { %v3752_v31 = vpop.f32.mrf.mxu3 }
 0x1b8   : > { %v3725_v23 = vpop.f32.mrf.mxu0  ;;  %2932 = vmatmul.msk.f32.gmra.mxu2 %vm311_vm13, %v3652_v2 }
 0x1b9   : > { %2923 = vmatmul.msk.f32.gmra.mxu1 %vm311_vm13, %v3598_v56 }
 0x1bb   : > { %v409_v26 = vpop.f32.mrf.mxu2  ;;  %2919 = vmatmul.msk.f32.gmra.mxu0 %vm311_vm13, %v3610_v57 }
 0x1bd   : > { %2962 = vmatmul.msk.f32.gmra.mxu3 %vm311_vm13, %v2947_v24 }
 0x1be   : > { %v3739_v27 = vpop.f32.mrf.mxu1 }
 0x1bf   : > { %v623_v36 = vpop.f32.mrf.mxu3 }
 0x1c0   : > { %v3741_v28 = vpop.f32.mrf.mxu0  ;;  %2933 = vmatmul.msk.f32.gmra.mxu2 %vm311_vm13, %v3668_v5 }
 0x1c1   : > { %2924 = vmatmul.msk.f32.gmra.mxu1 %vm311_vm13, %v3610_v57 }
 0x1c3   : > { %v412_v30 = vpop.f32.mrf.mxu2  ;;  %2920 = vmatmul.msk.f32.gmra.mxu0 %vm311_vm13, %v3621_v58 }
 0x1c5   : > { %2963 = vmatmul.msk.f32.gmra.mxu3 %vm311_vm13, %v2948_v29 }
 0x1c6   : > { %v3755_v32 = vpop.f32.mrf.mxu1 }
 0x1c7   : > { %v626_v41 = vpop.f32.mrf.mxu3 }
 0x1c8   : > { %v3757_v33 = vpop.f32.mrf.mxu0  ;;  %2934 = vmatmul.msk.f32.gmra.mxu2 %vm311_vm13, %v3683_v8 }
 0x1c9   : > { %2925 = vmatmul.msk.f32.gmra.mxu1 %vm311_vm13, %v3621_v58 }
 0x1cb   : > { %v415_v34 = vpop.f32.mrf.mxu2  ;;  %2941 = vmatmul.msk.f32.vlgmr.msrb.gmra.mxu0 %vm311_vm13, %v3635_v60 }
 0x1ce   : > { %v3765_v35 = vpop.f32.mrf.mxu1 }
 0x1cf   : > { %v3783_v45 = vpop.f32.mrf.mxu3 }
 0x1d0   : > { %v3767_v37 = vpop.f32.mrf.mxu0  ;;  %2955 = vmatmul.msk.f32.vlgmr.msrb.gmra.mxu2 %vm311_vm13, %v2945_v12 }
 0x1d1   : > { %2950 = vmatmul.msk.f32.vlgmr.msrb.gmra.mxu1 %vm311_vm13, %v2945_v12 }
 0x1d3   : > { %v3771_v38 = vpop.f32.mrf.mxu2  ;;  %2942 = vmatmul.msk.f32.gmra.mxu0 %vm311_vm13, %v3652_v2 }
 0x1d6   : > { %v520_v39 = vpop.f32.mrf.mxu1 }
 0x1d7   : > { %v790_v51 = vpop.f32.mrf.mxu3  ;;  %v521_v53 = vadd.f32 %v520_v39, %v409_v26 }
 0x1d8   : > { %v494_v40 = vpop.f32.mrf.mxu0  ;;  %2956 = vmatmul.msk.f32.gmra.mxu2 %vm311_vm13, %v2946_v20 }
 0x1d9   : > { %2951 = vmatmul.msk.f32.gmra.mxu1 %vm311_vm13, %v2946_v20 }
 0x1db   : > { %v3777_v42 = vpop.f32.mrf.mxu2  ;;  %2943 = vmatmul.msk.f32.gmra.mxu0 %vm311_vm13, %v3668_v5  ;;  %v495_v5 = vadd.f32 %v494_v40, %v3739_v27  ;;  %v518_v40 = vadd.f32 %v3765_v35, %v3718_v21 }
 0x1dd   : > { %v665_v15 = vadd.f32 %v623_v36, %v495_v5 }
 0x1de   : > { %v523_v43 = vpop.f32.mrf.mxu1 }
 0x1df   : > { %v524_v61 = vadd.f32 %v523_v43, %v412_v30 }
 0x1e0   : > { %v497_v44 = vpop.f32.mrf.mxu0  ;;  %2957 = vmatmul.msk.f32.gmra.mxu2 %vm311_vm13, %v2947_v24  ;;  %v793_v60 = vpop.f32.mrf.mxu3 }
 0x1e1   : > { %2952 = vmatmul.msk.f32.gmra.mxu1 %vm311_vm13, %v2947_v24  ;;  %v498_v26 = vadd.f32 %v497_v44, %v3755_v32 }
 0x1e3   : > { %v3785_v46 = vpop.f32.mrf.mxu2  ;;  %2944 = vmatmul.msk.f32.gmra.mxu0 %vm311_vm13, %v3683_v8 }
 0x1e6   : > { %v526_v47 = vpop.f32.mrf.mxu1 }
 0x1e7   : > { %v527_v8 = vadd.f32 %v526_v47, %v415_v34  ;;  %v668_v34 = vadd.f32 %v626_v41, %v498_v26  ;;  %v466_v41 = vadd.f32 %v3688_v9, %v3725_v23 }
 0x1e8   : > { %v646_v48 = vpop.f32.mrf.mxu0  ;;  %2958 = vmatmul.msk.f32.gmra.mxu2 %vm311_vm13, %v2948_v29  ;;  %v796_v12 = vpop.f32.mrf.mxu3 }
 0x1e9   : > { %2953 = vmatmul.msk.f32.gmra.mxu1 %vm311_vm13, %v2948_v29  ;;  %v489_v29 = vadd.f32 %v3757_v33, %v3702_v16  ;;  %v660_v32 = vadd.f32 %v646_v48, %v518_v40  ;;  %v492_v16 = vadd.f32 %v3767_v37, %v3723_v22  ;;  %v664_v21 = vadd.f32 %v3785_v46, %v466_v41 }
 0x1eb   : > { %v3794_v50 = vpop.f32.mrf.mxu2  ;;  %2969 = vmatmul.msk.f32.vlgmr.msra.gmra.mxu0 %vm311_vm13, %v2964_v49  ;;  %v659_v36 = vadd.f32 %v3734_v25, %v489_v29  ;;  %v662_v25 = vadd.f32 %v3752_v31, %v492_v16 }
 0x1ee   : > { %v3797_v52 = vpop.f32.mrf.mxu1 }
 0x1f0   : > { %v649_v54 = vpop.f32.mrf.mxu0  ;;  %2979 = vmatmul.msk.f32.vlgmr.msra.gmra.mxu2 %vm311_vm13, %v2964_v49 }
 0x1f1   : > { %v663_v56 = vadd.f32 %v649_v54, %v521_v53  ;;  %2974 = vmatmul.msk.f32.vlgmr.msra.gmra.mxu1 %vm311_vm13, %v2964_v49 }
 0x1f3   : > { %v804_v57 = vadd.f32 %v790_v51, %v663_v56  ;;  %v758_v58 = vpop.f32.mrf.mxu2  ;;  %2970 = vmatmul.msk.f32.gmra.mxu0 %vm311_vm13, %v2965_v55  ;;  %v801_v51 = vadd.f32 %v3783_v45, %v660_v32  ;;  %v469_v45 = vadd.f32 %v3708_v18, %v3741_v28 }
 0x1f4   : > { %v800_v47 = vadd.f32 %v758_v58, %v659_v36  ;;  %v1011_v58 = vpop.f32.mrf.mxu3 }
 0x1f5   : > { %v667_v23 = vadd.f32 %v3794_v50, %v469_v45 }
 0x1f6   : > { %v3805_v59 = vpop.f32.mrf.mxu1 }
 0x1f8   : > { %v652_v62 = vpop.f32.mrf.mxu0  ;;  %2980 = vmatmul.msk.f32.gmra.mxu2 %vm311_vm13, %v2965_v55 }
 0x1f9   : > { %v666_v0 = vadd.f32 %v652_v62, %v524_v61  ;;  %2975 = vmatmul.msk.f32.gmra.mxu1 %vm311_vm13, %v2965_v55 }
 0x1fb   : > { %v807_v2 = vadd.f32 %v793_v60, %v666_v0  ;;  %v761_v4 = vpop.f32.mrf.mxu2  ;;  %2971 = vmatmul.msk.f32.gmra.mxu0 %vm311_vm13, %v2966_v63 }
 0x1fc   : > { %v803_v35 = vadd.f32 %v761_v4, %v662_v25  ;;  %v1014_v4 = vpop.f32.mrf.mxu3 }
 0x1fe   : > { %v735_v7 = vpop.f32.mrf.mxu1 }
 0x1ff   : > { %v805_v55 = vadd.f32 %v735_v7, %v664_v21 }
 0x200   : > { %v655_v10 = vpop.f32.mrf.mxu0  ;;  %2981 = vmatmul.msk.f32.gmra.mxu2 %vm311_vm13, %v2966_v63 }
 0x201   : > { %v669_v14 = vadd.f32 %v655_v10, %v527_v8  ;;  %2976 = vmatmul.msk.f32.gmra.mxu1 %vm311_vm13, %v2966_v63 }
 0x203   : > { %v810_v19 = vadd.f32 %v796_v12, %v669_v14  ;;  %v764_v20 = vpop.f32.mrf.mxu2  ;;  %2972 = vmatmul.msk.f32.gmra.mxu0 %vm311_vm13, %v2967_v13 }
 0x204   : > { %v806_v24 = vadd.f32 %v764_v20, %v665_v15  ;;  %v3850_v28 = vpop.f32.mrf.mxu3 }
 0x206   : > { %v738_v27 = vpop.f32.mrf.mxu1 }
 0x207   : > { %v808_v61 = vadd.f32 %v738_v27, %v667_v23 }
 0x208   : > { %v3823_v30 = vpop.f32.mrf.mxu0  ;;  %2982 = vmatmul.msk.f32.gmra.mxu2 %vm311_vm13, %v2967_v13 }
 0x209   : > { %2977 = vmatmul.msk.f32.gmra.mxu1 %vm311_vm13, %v2967_v13  ;;  %vm1623_vm13 = vcmask 745160  }
 0x20b   : > { %v767_v39 = vpop.f32.mrf.mxu2 }
 0x20c   : > { %v809_v43 = vadd.f32 %v767_v39, %v668_v34 }
 0x20e   : > { %v899_v44 = vpop.f32.mrf.mxu1 }
 0x20f   : > { %v941_v33 = vadd.f32 %v899_v44, %v800_v47 }
 0x210   : > { %v3832_v49 = vpop.f32.mrf.mxu0 }
 0x213   : > { %v928_v53 = vpop.f32.mrf.mxu2 }
 0x214   : > { %v3838_v54 = vadd.f32 %v928_v53, %v801_v51 }
 0x216   : > { %v902_v48 = vpop.f32.mrf.mxu1 }
 0x217   : > { %v944_v56 = vadd.f32 %v902_v48, %v803_v35  ;;  %v460_v35 = vadd.f32 %v3655_v3, %v3690_v11 }
 0x218   : > { %v876_v22 = vpop.f32.mrf.mxu0 }
 0x219   : > { %v3841_v37 = vadd.f32 %v876_v22, %v805_v55  ;;  %v658_v48 = vadd.f32 %v3771_v38, %v460_v35 }
 0x21b   : > { %v931_v60 = vpop.f32.mrf.mxu2 }
 0x21c   : > { %v3845_v9 = vadd.f32 %v931_v60, %v804_v57 }
 0x21e   : > { %v905_v31 = vpop.f32.mrf.mxu1 }
 0x21f   : > { %v947_v62 = vadd.f32 %v905_v31, %v806_v24  ;;  %v3854_v24 = vpop.f32.mrf.mxu3  ;;  %v463_v31 = vadd.f32 %v3671_v6, %v3704_v17 }
 0x220   : > { %v879_v46 = vpop.f32.mrf.mxu0 }
 0x221   : > { %v3848_v63 = vadd.f32 %v879_v46, %v808_v61  ;;  %v661_v61 = vadd.f32 %v3777_v42, %v463_v31 }
 0x223   : > { %v934_v0 = vpop.f32.mrf.mxu2  ;;  %v802_v3 = vadd.f32 %v3805_v59, %v661_v61 }
 0x224   : > { %v948_v5 = vadd.f32 %v934_v0, %v807_v2 }
 0x226   : > { %v908_v7 = vpop.f32.mrf.mxu1 }
 0x227   : > { %v950_v8 = vadd.f32 %v908_v7, %v809_v43 }
 0x228   : > { %v1040_v10 = vpop.f32.mrf.mxu0 }
 0x229   : > { %v1082_v12 = vadd.f32 %v1040_v10, %v941_v33 }
 0x22b   : > { %v937_v13 = vpop.f32.mrf.mxu2 }
 0x22c   : > { %v951_v18 = vadd.f32 %v937_v13, %v810_v19  ;;  %v1181_v19 = vpop.f32.mrf.mxu3 }
 0x22d   : > { %v1223_v10 = vadd.f32 %v1181_v19, %v1082_v12 }
 0x22e   : > { %v1069_v57 = vpop.f32.mrf.mxu1 }
 0x22f   : > { %v1083_v6 = vadd.f32 %v1069_v57, %v3838_v54 }
 0x230   : > { %v1043_v14 = vpop.f32.mrf.mxu0 }
 0x231   : > { %v1085_v50 = vadd.f32 %v1043_v14, %v944_v56  ;;  %v799_v56 = vadd.f32 %v3797_v52, %v658_v48  ;;  %v943_v52 = vadd.f32 %v3832_v49, %v802_v3 }
 0x233   : > { %v1152_v15 = vpop.f32.mrf.mxu2  ;;  %v940_v45 = vadd.f32 %v3823_v30, %v799_v56 }
 0x234   : > { %v1184_v16 = vpop.f32.mrf.mxu3 }
 0x235   : > { %v1226_v12 = vadd.f32 %v1184_v16, %v1085_v50 }
 0x236   : > { %v3852_v20 = vpop.f32.mrf.mxu1 }
 0x237   : > { %v1086_v54 = vadd.f32 %v3852_v20, %v3845_v9  ;;  %v1090_v9 = vadd.f32 %v3854_v24, %v3848_v63 }
 0x238   : > { %v1046_v26 = vpop.f32.mrf.mxu0 }
 0x239   : > { %v3856_v27 = vadd.f32 %v1046_v26, %v947_v62  ;;  %v1081_v62 = vadd.f32 %v1011_v58, %v940_v45 }
 0x23b   : > { %v1155_v2 = vpop.f32.mrf.mxu2  ;;  %v1222_v11 = vadd.f32 %v1152_v15, %v1081_v62 }
 0x23c   : > { %v1187_v25 = vpop.f32.mrf.mxu3 }
 0x23d   : > { %v1229_v20 = vadd.f32 %v1187_v25, %v3856_v27 }
 0x23e   : > { %v1075_v29 = vpop.f32.mrf.mxu1 }
 0x23f   : > { %v3858_v34 = vadd.f32 %v1075_v29, %v948_v5 }
 0x240   : > { %v1049_v36 = vpop.f32.mrf.mxu0 }
 0x241   : > { %v3860_v39 = vadd.f32 %v1049_v36, %v950_v8  ;;  %v1084_v8 = vadd.f32 %v1014_v4, %v943_v52  ;;  %v1087_v4 = vadd.f32 %v3850_v28, %v3841_v37 }
 0x243   : > { %v1158_v40 = vpop.f32.mrf.mxu2  ;;  %v1225_v17 = vadd.f32 %v1155_v2, %v1084_v8 }
 0x244   : > { %v3873_v60 = vpop.f32.mrf.mxu3 }
 0x245   : > { %v1232_v27 = vadd.f32 %v3873_v60, %v3860_v39 }
 0x246   : > { %v1078_v43 = vpop.f32.mrf.mxu1 }
 0x247   : > { %v3862_v47 = vadd.f32 %v1078_v43, %v951_v18 }
 0x248   : > { %v1210_v32 = vpop.f32.mrf.mxu0 }
 0x249   : > { %v1224_v58 = vadd.f32 %v1210_v32, %v1083_v6  ;;  %v1228_v32 = vadd.f32 %v1158_v40, %v1087_v4 }
 0x24b   : > { %v3864_v44 = vpop.f32.mrf.mxu2 }
 0x24c   : > { %v1351_v7 = vpop.f32.mrf.mxu3  ;;  %v1231_v45 = vadd.f32 %v3864_v44, %v1090_v9 }
 0x24d   : > { %v1365_v36 = vadd.f32 %v1351_v7, %v1224_v58 }
 0x24e   : > { %v1293_v33 = vpop.f32.mrf.mxu1 }
 0x24f   : > { %v1363_v0 = vadd.f32 %v1293_v33, %v1222_v11 }
 0x250   : > { %v1213_v51 = vpop.f32.mrf.mxu0 }
 0x253   : > { %v1322_v41 = vpop.f32.mrf.mxu2 }
 0x254   : > { %v1364_v42 = vadd.f32 %v1322_v41, %v1223_v10  ;;  %v1354_v57 = vpop.f32.mrf.mxu3  ;;  %v1227_v41 = vadd.f32 %v1213_v51, %v1086_v54 }
 0x256   : > { %v1296_v53 = vpop.f32.mrf.mxu1  ;;  %v1368_v16 = vadd.f32 %v1354_v57, %v1227_v41 }
 0x257   : > { %v1366_v14 = vadd.f32 %v1296_v53, %v1225_v17 }
 0x258   : > { %v3866_v21 = vpop.f32.mrf.mxu0 }
 0x259   : > { %v1230_v63 = vadd.f32 %v3866_v21, %v3858_v34 }
 0x25b   : > { %v1325_v55 = vpop.f32.mrf.mxu2 }
 0x25c   : > { %v1367_v33 = vadd.f32 %v1325_v55, %v1226_v12  ;;  %v1357_v31 = vpop.f32.mrf.mxu3 }
 0x25e   : > { %v1299_v22 = vpop.f32.mrf.mxu1 }
 0x25f   : > { %v1369_v48 = vadd.f32 %v1299_v22, %v1228_v32 }
 0x260   : > { %v3875_v23 = vpop.f32.mrf.mxu0 }
 0x263   : > { %v1328_v46 = vpop.f32.mrf.mxu2 }
 0x264   : > { %v1370_v22 = vadd.f32 %v1328_v46, %v1229_v20  ;;  %v1360_v34 = vpop.f32.mrf.mxu3 }
 0x266   : > { %v1302_v38 = vpop.f32.mrf.mxu1 }
 0x267   : > { %v1372_v3 = vadd.f32 %v1302_v38, %v1231_v45 }
 0x268   : > { %v1434_v5 = vpop.f32.mrf.mxu0 }
 0x269   : > { %v1504_v30 = vadd.f32 %v1434_v5, %v1363_v0  ;;  %v1371_v0 = vadd.f32 %v1357_v31, %v1230_v63 }
 0x26b   : > { %v1516_v13 = vmax.f32 %v1504_v30, 0.0  ;;  %v1331_v18 = vpop.f32.mrf.mxu2  ;;  %v1233_v30 = vadd.f32 %v3875_v23, %v3862_v47 }
 0x26c   : > { %v1373_v5 = vadd.f32 %v1331_v18, %v1232_v27 }
 0x26d   : > { %1550 = vrot.lane.b32.xlu1 %v1516_v13, %s3316_s19  ;;  %v1374_v10 = vadd.f32 %v1360_v34, %v1233_v30 }
 0x26e   : > { %v1463_v59 = vpop.f32.mrf.mxu1 }
 0x26f   : > { %v1505_v15 = vadd.f32 %v1463_v59, %v1364_v42 }
 0x270   : > { %v1437_v26 = vpop.f32.mrf.mxu0 }
 0x271   : > { %v1517_v49 = vmax.f32 %v1505_v15, 0.0  ;;  %v1507_v29 = vadd.f32 %v1437_v26, %v1366_v14 }
 0x273   : > { %v1519_v19 = vmax.f32 %v1507_v29, 0.0  ;;  %v1492_v43 = vpop.f32.mrf.mxu2  ;;  %1552 = vrot.lane.b32.xlu2 %v1517_v49, %s3316_s19 }
 0x274   : > { %v1506_v2 = vadd.f32 %v1492_v43, %v1365_v36 }
 0x275   : > { %1556 = vrot.lane.b32.xlu1 %v1519_v19, %s3316_s19 }
 0x276   : > { %v1518_v53 = vmax.f32 %v1506_v2, 0.0  ;;  %v1466_v35 = vpop.f32.mrf.mxu1 }
 0x277   : > { %v1508_v56 = vadd.f32 %v1466_v35, %v1367_v33 }
 0x278   : > { %v1440_v37 = vpop.f32.mrf.mxu0  ;;  %1554 = vrot.lane.b32.xlu0 %v1518_v53, %s3316_s19 }
 0x279   : > { %v1520_v28 = vmax.f32 %v1508_v56, 0.0  ;;  %v1510_v50 = vadd.f32 %v1440_v37, %v1369_v48 }
 0x27b   : > { %v1522_v40 = vmax.f32 %v1510_v50, 0.0  ;;  %v1495_v55 = vpop.f32.mrf.mxu2  ;;  %1558 = vrot.lane.b32.xlu2 %v1520_v28, %s3316_s19 }
 0x27c   : > { %v1509_v51 = vadd.f32 %v1495_v55, %v1368_v16 }
 0x27d   : > { %1562 = vrot.lane.b32.xlu1 %v1522_v40, %s3316_s19 }
 0x27e   : > { %v1521_v61 = vmax.f32 %v1509_v51, 0.0  ;;  %v1469_v62 = vpop.f32.mrf.mxu1 }
 0x27f   : > { %v1511_v11 = vadd.f32 %v1469_v62, %v1370_v22 }
 0x280   : > { %v1443_v52 = vpop.f32.mrf.mxu0  ;;  %1560 = vrot.lane.b32.xlu0 %v1521_v61, %s3316_s19 }
 0x281   : > { %v1513_v24 = vadd.f32 %v1443_v52, %v1372_v3  ;;  %v1523_v25 = vmax.f32 %v1511_v11, 0.0 }
 0x283   : > { %v1525_v44 = vmax.f32 %v1513_v24, 0.0  ;;  %v1498_v46 = vpop.f32.mrf.mxu2 }
 0x284   : > { %v1512_v7 = vadd.f32 %v1498_v46, %v1371_v0 }
 0x285   : > { %1564 = vrot.lane.b32.xlu1 %v1523_v25, %s3316_s19  ;;  %1568 = vrot.lane.b32.xlu2 %v1525_v44, %s3316_s19 }
 0x286   : > { %v1472_v38 = vpop.f32.mrf.mxu1  ;;  %v1524_v13 = vmax.f32 %v1512_v7, 0.0 }
 0x287   : > { %v1514_v8 = vadd.f32 %v1472_v38, %v1373_v5 }
 0x289   : > { %v1526_v21 = vmax.f32 %v1514_v8, 0.0 }
 0x28b   : > { %v1501_v39 = vpop.f32.mrf.mxu2  ;;  %1570 = vrot.lane.b32.xlu0 %v1526_v21, %s3316_s19 }
 0x28c   : > { %v1515_v60 = vadd.f32 %v1501_v39, %v1374_v10 }
 0x28d   : > { %1566 = vrot.lane.b32.xlu2 %v1524_v13, %s3316_s19 }
 0x28e   : > { %v1527_v18 = vmax.f32 %v1515_v60, 0.0 }
 0x293   : > { %1572 = vrot.lane.b32.xlu0 %v1527_v18, %s3316_s19  ;;  %s3340_s19 = smov 122  }
 0x2cd   : > { %v3917_v47 = vpop.permute.xlu2 %1552 }
 0x2d5   : > { %v3930_v17 = vpop.permute.xlu2 %1558 }
 0x2df   : > { %v1551_v23 = vpop.permute.xlu1 %1550  ;;  %v3950_v42 = vpop.permute.xlu2 %1568 }
 0x2e0   : > { %v1574_v6 = vsel %vm1528_vm6, %v1551_v23, %v3917_v47  ;;  %1595 = vst.msk [vmem:[#allocation3] sm:$0xff] %vm1594_vm8, %v1551_v23 }
 0x2e1   : > { %1596 = vst [vmem:[#allocation3 + $0x8] sm:$0xff] %v1574_v6 }
 0x2e2   : > { %1609 = vst.msk [vmem:[#allocation3] sm:$0xff] %vm1608_vm9, %v3331_v1 }
 0x2e3   : > { %1614 = vst.msk [vmem:[#allocation3] sm:$0xff] %vm1613_vm10, %v3331_v1 }
 0x2e4   : > { %1619 = vst.msk [vmem:[#allocation3] sm:$0xff] %vm1618_vm11, %v3331_v1 }
 0x2e5   : > { %1624 = vst.msk [vmem:[#allocation3] sm:$0xff] %vm1623_vm13, %v3331_v1 }
 0x2e6   : > { %1629 = vst.msk [vmem:[#allocation3] sm:$0xff] %vm1628_vm12, %v3331_v1 }
 0x2e7   : > { %1634 = vst.msk [vmem:[#allocation3] sm:$0xff] %vm1633_vm7, %v3331_v1  ;;  %v1557_v58 = vpop.permute.xlu1 %1556  ;;  %v1567_v2 = vpop.permute.xlu2 %1566 }
 0x2e8   : > { %1639 = vst.msk [vmem:[#allocation3 + $0x8] sm:$0xff] %vm4565_vm5, %v3331_v1  ;;  %v1576_v14 = vsel %vm1528_vm6, %v1557_v58, %v3930_v17 }
 0x2e9   : > { %1644 = vst.msk [vmem:[#allocation3 + $0x8] sm:$0xff] %vm4563_vm4, %v3331_v1 }
 0x2ea   : > { %1649 = vst.msk [vmem:[#allocation3 + $0x8] sm:$0xff] %vm4564_vm2, %v3331_v1  ;;  %v1555_v49 = vpop.permute.xlu0 %1554 }
 0x2eb   : > { %1654 = vst.msk [vmem:[#allocation3 + $0x8] sm:$0xff] %vm1653_vm3, %v3331_v1  ;;  %v1575_v29 = vsel %vm1528_vm6, %v3917_v47, %v1555_v49 }
 0x2ec   : > { %1659 = vst.msk [vmem:[#allocation3 + $0x8] sm:$0xff] %vm1658_vm1, %v3331_v1 }
 0x2ed   : > { %1664 = vst.msk [vmem:[#allocation3 + $0x8] sm:$0xff] %vm1663_vm14, %v3331_v1 }
 0x2ee   : > { %1669 = vst.msk [vmem:[#allocation3 + $0x8] sm:$0xff] %vm1668_vm0, %v3331_v1  ;;  %v3966_v59 = vld [vmem:[#allocation3] sm:$0xff] }
 0x2ef   : > { %1605 = vst.msk [vmem:[#allocation3 + $0x48] sm:$0xff] %vm1594_vm8, %v3950_v42  ;;  %v1563_v36 = vpop.permute.xlu1 %1562 }
 0x2f0   : > { %1612 = vst.msk [vmem:[#allocation3 + $0x48] sm:$0xff] %vm1608_vm9, %v3331_v1 }
 0x2f1   : > { %1617 = vst.msk [vmem:[#allocation3 + $0x48] sm:$0xff] %vm1613_vm10, %v3331_v1 }
 0x2f2   : > { %1622 = vst.msk [vmem:[#allocation3 + $0x48] sm:$0xff] %vm1618_vm11, %v3331_v1  ;;  %v1561_v4 = vpop.permute.xlu0 %1560 }
 0x2f3   : > { %1627 = vst.msk [vmem:[#allocation3 + $0x48] sm:$0xff] %vm1623_vm13, %v3331_v1  ;;  %v1577_v12 = vsel %vm1528_vm6, %v3930_v17, %v1561_v4 }
 0x2f4   : > { %1632 = vst.msk [vmem:[#allocation3 + $0x48] sm:$0xff] %vm1628_vm12, %v3331_v1 }
 0x2f5   : > { %1637 = vst.msk [vmem:[#allocation3 + $0x48] sm:$0xff] %vm1633_vm7, %v3331_v1  ;;  %v3974_v15 = vld [vmem:[#allocation3 + $0x8] sm:$0xff] }
 0x2f6   : > { %1599 = vst.msk [vmem:[#allocation3 + $0x18] sm:$0xff] %vm1594_vm8, %v1557_v58  ;;  %v3979_v26 = vpack.i.bf16 %v3974_v15, %v3966_v59  ;;  %v3192_v25 = vpack.i.bf16 %v3966_v59, %v3974_v15 }
 0x2f7   : > { %1600 = vst [vmem:[#allocation3 + $0x20] sm:$0xff] %v1576_v14  ;;  %v1565_v43 = vpop.permute.xlu1 %1564 }
 0x2f8   : > { %1610 = vst.msk [vmem:[#allocation3 + $0x18] sm:$0xff] %vm1608_vm9, %v3331_v1  ;;  %3068 = vrot.lane.b32.xlu1 %v3979_v26, %s3332_s7  ;;  %v1578_v32 = vsel %vm1528_vm6, %v1563_v36, %v1565_v43  ;;  %v1579_v33 = vsel %vm1528_vm6, %v1565_v43, %v1567_v2 }
 0x2f9   : > { %1615 = vst.msk [vmem:[#allocation3 + $0x18] sm:$0xff] %vm1613_vm10, %v3331_v1 }
 0x2fa   : > { %1620 = vst.msk [vmem:[#allocation3 + $0x18] sm:$0xff] %vm1618_vm11, %v3331_v1 }
 0x2fb   : > { %1625 = vst.msk [vmem:[#allocation3 + $0x18] sm:$0xff] %vm1623_vm13, %v3331_v1 }
 0x2fc   : > { %1630 = vst.msk [vmem:[#allocation3 + $0x18] sm:$0xff] %vm1628_vm12, %v3331_v1  ;;  %v4114_v51 = vld [vmem:[#allocation3 + $0x48] sm:$0xff] }
 0x2fd   : > { %1635 = vst.msk [vmem:[#allocation3 + $0x18] sm:$0xff] %vm1633_vm7, %v3331_v1  ;;  %v1571_v41 = vpop.permute.xlu0 %1570 }
 0x2fe   : > { %1640 = vst.msk [vmem:[#allocation3 + $0x20] sm:$0xff] %vm4565_vm5, %v3331_v1  ;;  %vm1683_vm5 = vcmask 417160   ;;  %v1580_v37 = vsel %vm1528_vm6, %v3950_v42, %v1571_v41 }
 0x2ff   : > { %1645 = vst.msk [vmem:[#allocation3 + $0x20] sm:$0xff] %vm4563_vm4, %v3331_v1  ;;  %vm1673_vm4 = vcmask 121960  }
 0x300   : > { %1650 = vst.msk [vmem:[#allocation3 + $0x20] sm:$0xff] %vm4564_vm2, %v3331_v1  ;;  %3073 = vrot.lane.b32.xlu1 %v3979_v26, %s3333_s8  ;;  %vm1678_vm2 = vcmask 269560  }
 0x301   : > { %1655 = vst.msk [vmem:[#allocation3 + $0x20] sm:$0xff] %vm1653_vm3, %v3331_v1 }
 0x302   : > { %1660 = vst.msk [vmem:[#allocation3 + $0x20] sm:$0xff] %vm1658_vm1, %v3331_v1 }
 0x303   : > { %1665 = vst.msk [vmem:[#allocation3 + $0x20] sm:$0xff] %vm1663_vm14, %v3331_v1 }
 0x304   : > { %1670 = vst.msk [vmem:[#allocation3 + $0x20] sm:$0xff] %vm1668_vm0, %v3331_v1  ;;  %v4031_v19 = vld [vmem:[#allocation3 + $0x18] sm:$0xff] }
 0x305   : > { %1598 = vst.msk [vmem:[#allocation3 + $0x10] sm:$0xff] %vm1597_vm15, %v1575_v29  ;;  %v1573_v50 = vpop.permute.xlu0 %1572  ;;  %v3272_v13 = vpack.i.bf16 %v3966_v59, %v4031_v19 }
 0x306   : > { %1674 = vst.msk [vmem:[#allocation3 + $0x10] sm:$0xff] %vm1673_vm4, %v3331_v1  ;;  %v1581_v40 = vsel %vm1528_vm6, %v1571_v41, %v1573_v50  ;;  %v4258_v50 = vld [vmem:[%s4552_s2] sm:$0xf] }
 0x307   : > { %1679 = vst.msk [vmem:[#allocation3 + $0x10] sm:$0xff] %vm1678_vm2, %v3331_v1 }
 0x308   : > { %1684 = vst.msk [vmem:[#allocation3 + $0x10] sm:$0xff] %vm1683_vm5, %v3331_v1 }
 0x309   : > { %1602 = vst.msk [vmem:[#allocation3 + $0x30] sm:$0xff] %vm1594_vm8, %v1563_v36  ;;  %vm4567_vm8 = vcmask 285960  }
 0x30a   : > { %1611 = vst.msk [vmem:[#allocation3 + $0x30] sm:$0xff] %vm1608_vm9, %v3331_v1  ;;  %vm4568_vm9 = vcmask 433560  }
 0x30b   : > { %1616 = vst.msk [vmem:[#allocation3 + $0x30] sm:$0xff] %vm1613_vm10, %v3331_v1  ;;  %v4058_v53 = vld [vmem:[#allocation3 + $0x20] sm:$0xff] }
 0x30c   : > { %1621 = vst.msk [vmem:[#allocation3 + $0x30] sm:$0xff] %vm1618_vm11, %v3331_v1  ;;  %vm4570_vm11 = vmmov %vm4567_vm8  ;;  %v3177_v24 = vpack.i.bf16 %v4031_v19, %v4058_v53  ;;  %v3182_v27 = vpack.i.bf16 %v4058_v53, %v4031_v19 }
 0x30d   : > { %1626 = vst.msk [vmem:[#allocation3 + $0x30] sm:$0xff] %vm1623_vm13, %v3331_v1  ;;  %vm4571_vm13 = vmmov %vm4568_vm9 }
 0x30e   : > { %1631 = vst.msk [vmem:[#allocation3 + $0x30] sm:$0xff] %vm1628_vm12, %v3331_v1  ;;  %vm4566_vm12 = vcmask 138360  }
 0x30f   : > { %1636 = vst.msk [vmem:[#allocation3 + $0x30] sm:$0xff] %vm1633_vm7, %v3331_v1  ;;  %v4037_v54 = vld [vmem:[#allocation3 + $0x10] sm:$0xff]  ;;  %vm4569_vm10 = vmmov %vm4566_vm12 }
 0x310   : > { %1601 = vst.msk [vmem:[#allocation3 + $0x28] sm:$0xff] %vm1597_vm15, %v1577_v12  ;;  %v3077_v57 = vpack.i.bf16 %v4031_v19, %v4037_v54  ;;  %v4132_v62 = vpack.i.bf16 %v4114_v51, %v4037_v54  ;;  %v3257_v7 = vpack.i.bf16 %v4037_v54, %v3974_v15 }
 0x311   : > { %1675 = vst.msk [vmem:[#allocation3 + $0x28] sm:$0xff] %vm1673_vm4, %v3331_v1 }
 0x312   : > { %1680 = vst.msk [vmem:[#allocation3 + $0x28] sm:$0xff] %vm1678_vm2, %v3331_v1  ;;  %3078 = vrot.lane.b32.xlu2 %v3077_v57, %s3332_s7 }
 0x313   : > { %1685 = vst.msk [vmem:[#allocation3 + $0x28] sm:$0xff] %vm1683_vm5, %v3331_v1 }
 0x314   : > { %1603 = vst [vmem:[#allocation3 + $0x38] sm:$0xff] %v1578_v32 }
 0x315   : > { %1604 = vst.msk [vmem:[#allocation3 + $0x40] sm:$0xff] %vm1597_vm15, %v1579_v33 }
 0x316   : > { %1641 = vst.msk [vmem:[#allocation3 + $0x38] sm:$0xff] %vm4566_vm12, %v3331_v1  ;;  %v4090_v28 = vld [vmem:[#allocation3 + $0x30] sm:$0xff] }
 0x317   : > { %1646 = vst.msk [vmem:[#allocation3 + $0x38] sm:$0xff] %vm4567_vm8, %v3331_v1  ;;  %v3102_v45 = vpack.i.bf16 %v4031_v19, %v4090_v28  ;;  %v3267_v39 = vpack.i.bf16 %v4090_v28, %v4114_v51 }
 0x318   : > { %1651 = vst.msk [vmem:[#allocation3 + $0x38] sm:$0xff] %vm4568_vm9, %v3331_v1 }
 0x319   : > { %1656 = vst.msk [vmem:[#allocation3 + $0x38] sm:$0xff] %vm1653_vm3, %v3331_v1 }
 0x31a   : > { %1661 = vst.msk [vmem:[#allocation3 + $0x38] sm:$0xff] %vm1658_vm1, %v3331_v1  ;;  %v4064_v35 = vld [vmem:[#allocation3 + $0x28] sm:$0xff]  ;;  %3083 = vrot.lane.b32.xlu2 %v3077_v57, %s3333_s8 }
 0x31b   : > { %1666 = vst.msk [vmem:[#allocation3 + $0x38] sm:$0xff] %vm1663_vm14, %v3331_v1  ;;  %v4071_v48 = vpack.i.bf16 %v4064_v35, %v4058_v53  ;;  %v3097_v56 = vpack.i.bf16 %v3974_v15, %v4064_v35  ;;  %v3222_v5 = vpack.i.bf16 %v4037_v54, %v4064_v35 }
 0x31c   : > { %1671 = vst.msk [vmem:[#allocation3 + $0x38] sm:$0xff] %vm1668_vm0, %v3331_v1 }
 0x31d   : > { %1676 = vst.msk [vmem:[#allocation3 + $0x40] sm:$0xff] %vm1673_vm4, %v3331_v1  ;;  %3088 = vrot.lane.b32.xlu0 %v4071_v48, %s3332_s7  ;;  %3098 = vrot.lane.b32.xlu1 %v3097_v56, %s3334_s9 }
 0x31e   : > { %1681 = vst.msk [vmem:[#allocation3 + $0x40] sm:$0xff] %vm1678_vm2, %v3331_v1 }
 0x31f   : > { %1686 = vst.msk [vmem:[#allocation3 + $0x40] sm:$0xff] %vm1683_vm5, %v3331_v1 }
 0x320   : > { %1606 = vst [vmem:[#allocation3 + $0x50] sm:$0xff] %v1580_v37 }
 0x321   : > { %1642 = vst.msk [vmem:[#allocation3 + $0x50] sm:$0xff] %vm4569_vm10, %v3331_v1 }
 0x322   : > { %1647 = vst.msk [vmem:[#allocation3 + $0x50] sm:$0xff] %vm4570_vm11, %v3331_v1 }
 0x323   : > { %1652 = vst.msk [vmem:[#allocation3 + $0x50] sm:$0xff] %vm4571_vm13, %v3331_v1  ;;  %v1696_v16 = vld [vmem:[#allocation3 + $0x38] sm:$0xff] }
 0x324   : > { %1657 = vst.msk [vmem:[#allocation3 + $0x50] sm:$0xff] %vm1653_vm3, %v3331_v1  ;;  %v4099_v9 = vpack.i.bf16 %v4090_v28, %v1696_v16  ;;  %v3107_v20 = vpack.i.bf16 %v1696_v16, %v4090_v28 }
 0x325   : > { %1662 = vst.msk [vmem:[#allocation3 + $0x50] sm:$0xff] %vm1658_vm1, %v3331_v1  ;;  %3093 = vrot.lane.b32.xlu0 %v4071_v48, %s3333_s8  ;;  %vm4574_vm1 = vcmask 1039360  }
 0x326   : > { %1667 = vst.msk [vmem:[#allocation3 + $0x50] sm:$0xff] %vm1663_vm14, %v3331_v1  ;;  %3118 = vrot.lane.b32.xlu2 %v4099_v9, %s3335_s10  ;;  %3108 = vrot.lane.b32.xlu1 %v3107_v20, %s3332_s7  ;;  %v1697_v55 = vld [vmem:[#allocation3 + $0x40] sm:$0xff]  ;;  %vm4572_vm14 = vcmask 1031168   ;;  %vm4576_vm3 = vmmov %vm4574_vm1 }
 0x327   : > { %1672 = vst.msk [vmem:[#allocation3 + $0x50] sm:$0xff] %vm1668_vm0, %v3331_v1  ;;  %v3127_v22 = vpack.i.bf16 %v4114_v51, %v1697_v55  ;;  %v3122_v61 = vpack.i.bf16 %v4058_v53, %v1697_v55  ;;  %v3227_v46 = vpack.i.bf16 %v1697_v55, %v1696_v16  ;;  %vm1759_vm0 = vcmask 261120   ;;  %vm4580_vm7 = vmmov %vm4574_vm1 }
 0x328   : > { %1607 = vst.msk [vmem:[#allocation3 + $0x58] sm:$0xff] %vm1597_vm15, %v1581_v40  ;;  %vm4573_vm15 = vcmask 900096   ;;  %vm4581_vm12 = vmmov %vm4574_vm1 }
 0x329   : > { %1677 = vst.msk [vmem:[#allocation3 + $0x58] sm:$0xff] %vm1673_vm4, %v3331_v1  ;;  %vm4582_vm8 = vmmov %vm4574_vm1 }
 0x32a   : > { %1682 = vst.msk [vmem:[#allocation3 + $0x58] sm:$0xff] %vm1678_vm2, %v3331_v1  ;;  %vm4575_vm2 = vmmov %vm4573_vm15 }
 0x32b   : > { %1687 = vst.msk [vmem:[#allocation3 + $0x58] sm:$0xff] %vm1683_vm5, %v3331_v1  ;;  %vm4577_vm4 = vmmov %vm4575_vm2 }
 0x32c   : > { %vm4578_vm5 = vmmov %vm4574_vm1 }
 0x32d   : > { %3103 = vrot.lane.b32.xlu0 %v3102_v45, %s3334_s9  ;;  %vm4579_vm6 = vmmov %vm4575_vm2 }
 0x32e   : > { %3128 = vrot.lane.b32.xlu2 %v3127_v22, %s3332_s7  ;;  %3113 = vrot.lane.b32.xlu1 %v3107_v20, %s3333_s8  ;;  %v1699_v31 = vld [vmem:[#allocation3 + $0x50] sm:$0xff]  ;;  %vm4583_vm9 = vmmov %vm4574_vm1 }
 0x32f   : > { %1858 = vmatpush.msrb.mxu0 %v1699_v31  ;;  %v3157_v1 = vpack.i.bf16 %v1699_v31, %v4114_v51  ;;  %v3147_v11 = vpack.i.bf16 %v1699_v31, %v3966_v59  ;;  %v3152_v63 = vpack.i.bf16 %v1699_v31, %v4064_v35  ;;  %vm4584_vm10 = vmmov %vm4574_vm1 }
 0x330   : > { %vm4585_vm11 = vmmov %vm4572_vm14 }
 0x331   : > { %1859 = vmatpush.msrb.mxu0 %v1696_v16  ;;  %vm4586_vm13 = vmmov %vm4585_vm11 }
 0x332   : > { %v1700_v3 = vld [vmem:[#allocation3 + $0x58] sm:$0xff] }
 0x333   : > { %1878 = vmatpush.msrb.mxu1 %v1700_v3  ;;  %1860 = vmatpush.msrb.mxu0 %v4058_v53  ;;  %v3162_v52 = vpack.i.bf16 %v1700_v3, %v1699_v31  ;;  %v3247_v44 = vpack.i.bf16 %v1697_v55, %v1700_v3  ;;  %v3212_v0 = vpack.i.bf16 %v1696_v16, %v1700_v3 }
 0x335   : > { %3123 = vrot.lane.b32.xlu0 %v3122_v61, %s3334_s9  ;;  %1879 = vmatpush.msrb.mxu1 %v1697_v55 }
 0x336   : > { %3133 = vrot.lane.b32.xlu2 %v3127_v22, %s3333_s8  ;;  %3143 = vrot.lane.b32.xlu1 %v4132_v62, %s3335_s10 }
 0x337   : > { %1880 = vmatpush.msrb.mxu1 %v4064_v35  ;;  %1861 = vmatpush.msrb.mxu0 %v3974_v15 }
 0x338   : > { %2988 = vmatmul.msk.f32.vlgmr.msrb.gmra.mxu0 %vm1759_vm0, %v4258_v50 }
 0x339   : > { %1881 = vmatpush.msrb.mxu1 %v4037_v54 }
 0x33a   : > { %2989 = vmatmul.msk.f32.vlgmr.msrb.gmra.mxu1 %vm1759_vm0, %v4258_v50 }
 0x33d   : > { %3158 = vrot.lane.b32.xlu0 %v3157_v1, %s3336_s11 }
 0x33e   : > { %3138 = vrot.lane.b32.xlu2 %v4132_v62, %s3334_s9  ;;  %3148 = vrot.lane.b32.xlu1 %v3147_v11, %s3334_s9 }
 0x345   : > { %3163 = vrot.lane.b32.xlu0 %v3162_v52, %s3332_s7  ;;  %s3341_s7 = smov 124  }
 0x346   : > { %3153 = vrot.lane.b32.xlu2 %v3152_v63, %s3335_s10  ;;  %3173 = vrot.lane.b32.xlu1 %v3157_v1, %s3337_s17 }
 0x34d   : > { %3168 = vrot.lane.b32.xlu0 %v3107_v20, %s3336_s11 }
 0x34e   : > { %3178 = vrot.lane.b32.xlu2 %v3177_v24, %s3335_s10  ;;  %3188 = vrot.lane.b32.xlu1 %v3107_v20, %s3337_s17 }
 0x355   : > { %3183 = vrot.lane.b32.xlu0 %v3182_v27, %s3336_s11 }
 0x356   : > { %3193 = vrot.lane.b32.xlu2 %v3192_v25, %s3335_s10  ;;  %3208 = vrot.lane.b32.xlu1 %v3182_v27, %s3337_s17 }
 0x35d   : > { %3198 = vrot.lane.b32.xlu0 %v3162_v52, %s3333_s8 }
 0x35e   : > { %3228 = vrot.lane.b32.xlu1 %v3227_v46, %s3338_s18  ;;  %3213 = vrot.lane.b32.xlu2 %v3212_v0, %s3334_s9 }
 0x365   : > { %3203 = vrot.lane.b32.xlu0 %v3979_v26, %s3336_s11 }
 0x366   : > { %3243 = vrot.lane.b32.xlu1 %v3247_v44, %s3335_s10  ;;  %3218 = vrot.lane.b32.xlu2 %v3979_v26, %s3337_s17  ;;  %s3344_s10 = smov 118  }
 0x36a   : > { %v4176_v30 = vpop.permute.xlu1 %3068 }
 0x36b   : > { %v3070_v3 = vunpack.i.l.bf16 %v4176_v30 }
 0x36c   : > { %v4174_v38 = vpop.permute.xlu2 %3078 }
 0x36d   : > { %3223 = vrot.lane.b32.xlu0 %v3222_v5, %s3337_s17  ;;  %v3081_v61 = vunpack.i.h.bf16 %v4174_v38 }
 0x36e   : > { %3253 = vrot.lane.b32.xlu1 %v3247_v44, %s3336_s11  ;;  %3233 = vrot.lane.b32.xlu2 %v3222_v5, %s3336_s11 }
 0x372   : > { %v4189_v34 = vpop.permute.xlu1 %3073 }
 0x373   : > { %v3076_v10 = vunpack.i.h.bf16 %v4189_v34 }
 0x374   : > { %v4186_v8 = vpop.permute.xlu2 %3083 }
 0x375   : > { %3238 = vrot.lane.b32.xlu0 %v4071_v48, %s3338_s18  ;;  %v3085_v21 = vunpack.i.l.bf16 %v4186_v8 }
 0x376   : > { %3258 = vrot.lane.b32.xlu1 %v3257_v7, %s3338_s18  ;;  %3263 = vrot.lane.b32.xlu2 %v3162_v52, %s3338_s18 }
 0x377   : > { %v4202_v60 = vsel %vm4572_vm14, %v3076_v10, %v3085_v21  ;;  %vm4587_vm14 = vmmov %vm4585_vm11 }
 0x37d   : > { %3248 = vrot.lane.b32.xlu0 %v3247_v44, %s3337_s17  ;;  %s3345_s17 = smov 106  }
 0x37e   : > { %3273 = vrot.lane.b32.xlu1 %v3272_v13, %s3338_s18  ;;  %3268 = vrot.lane.b32.xlu2 %v3267_v39, %s3338_s18  ;;  %v3080_v13 = vunpack.i.l.bf16 %v4174_v38  ;;  %s3348_s18 = smov 100  }
 0x380   : > { %v4207_v18 = vpop.permute.xlu2 %3118 }
 0x385   : > { %3283 = vrot.lane.b32.xlu0 %v3247_v44, %s3339_s22  ;;  %v2983_v44 = vld [vmem:[%s4552_s2 + $0x4] sm:$0xf] }
 0x386   : > { %3293 = vrot.lane.b32.xlu1 %v4099_v9, %s3339_s22  ;;  %3278 = vrot.lane.b32.xlu2 %v3152_v63, %s3339_s22 }
 0x388   : > { %v4213_v47 = vpop.permute.xlu2 %3128 }
 0x389   : > { %v3131_v33 = vunpack.i.h.bf16 %v4213_v47  ;;  %v3130_v46 = vunpack.i.l.bf16 %v4213_v47  ;;  %v4301_v47 = vld [vmem:[%s4552_s2 + $0xc] sm:$0xf] }
 0x38d   : > { %3288 = vrot.lane.b32.xlu0 %v4132_v62, %s3339_s22  ;;  %v3071_v62 = vunpack.i.h.bf16 %v4176_v30 }
 0x38e   : > { %3298 = vrot.lane.b32.xlu2 %v3177_v24, %s3339_s22 }
 0x38f   : > { %v4218_v23 = vpop.permute.xlu0 %3088  ;;  %v4220_v6 = vpop.permute.xlu1 %3098  ;;  %v1739_v5 = vsel %vm4580_vm7, %v3070_v3, %v3071_v62  ;;  %v1740_v38 = vsel %vm4584_vm10, %v3071_v62, %v3080_v13 }
 0x390   : > { %v4222_v17 = vpop.permute.xlu2 %3133  ;;  %v3090_v40 = vunpack.i.l.bf16 %v4218_v23  ;;  %v3101_v11 = vunpack.i.h.bf16 %v4220_v6  ;;  %v3091_v30 = vunpack.i.h.bf16 %v4218_v23 }
 0x392   : > { %v1741_v24 = vsel %vm4578_vm5, %v3081_v61, %v3090_v40  ;;  %v1742_v23 = vsel %vm4583_vm9, %v3090_v40, %v3091_v30  ;;  %v3135_v40 = vunpack.i.l.bf16 %v4222_v17 }
 0x395   : > { %3303 = vrot.lane.b32.xlu0 %v3192_v25, %s3339_s22  ;;  %s3349_s22 = smov 98  }
 0x397   : > { %v4225_v42 = vpop.permute.xlu0 %3093 }
 0x398   : > { %v4227_v58 = vpop.permute.xlu2 %3138  ;;  %v3109_v14 = vpop.permute.xlu1 %3108 }
 0x399   : > { %v3141_v12 = vunpack.i.h.bf16 %v4227_v58  ;;  %v3111_v53 = vunpack.i.h.bf16 %v3109_v14  ;;  %v3110_v35 = vunpack.i.l.bf16 %v3109_v14 }
 0x39b   : > { %v1743_v1 = vsel %vm4576_vm3, %v3110_v35, %v3111_v53  ;;  %v1744_v39 = vsel %vm4582_vm8, %v3111_v53, %v3130_v46  ;;  %vm4591_vm3 = vmmov %vm4577_vm4 }
 0x39c   : > { %vm4598_vm9 = vmmov %vm4591_vm3 }
 0x39f   : > { %v3104_v15 = vpop.permute.xlu0 %3103 }
 0x3a0   : > { %v4229_v26 = vpop.permute.xlu1 %3113  ;;  %v4231_v49 = vpop.permute.xlu2 %3153  ;;  %v3105_v16 = vunpack.i.l.bf16 %v3104_v15  ;;  %v3106_v45 = vunpack.i.h.bf16 %v3104_v15 }
 0x3a1   : > { %v3115_v53 = vunpack.i.l.bf16 %v4229_v26 }
 0x3a7   : > { %v4233_v29 = vpop.permute.xlu0 %3123 }
 0x3a8   : > { %v4235_v36 = vpop.permute.xlu1 %3143  ;;  %v4237_v4 = vpop.permute.xlu2 %3178  ;;  %v3126_v9 = vunpack.i.h.bf16 %v4233_v29 }
 0x3a9   : > { %v3146_v61 = vunpack.i.h.bf16 %v4235_v36 }
 0x3aa   : > { %v2026_v52 = vsel %vm4577_vm4, %v3106_v45, %v3126_v9 }
 0x3af   : > { %v4240_v43 = vpop.permute.xlu0 %3158 }
 0x3b0   : > { %v4242_v54 = vpop.permute.xlu2 %3193  ;;  %v4244_v57 = vpop.permute.xlu1 %3148 }
 0x3b1   : > { %v3151_v2 = vunpack.i.h.bf16 %v4244_v57  ;;  %v3150_v22 = vunpack.i.l.bf16 %v4244_v57  ;;  %v3100_v57 = vunpack.i.l.bf16 %v4220_v6 }
 0x3b3   : > { %v2030_v32 = vsel %vm4573_vm15, %v3141_v12, %v3151_v2  ;;  %v2024_v25 = vsel %vm4579_vm6, %v3150_v22, %v3101_v11  ;;  %v3086_v22 = vunpack.i.h.bf16 %v4186_v8  ;;  %vm4588_vm15 = vmmov %vm4585_vm11 }
 0x3b4   : > { %2059 = vmatpush.msra.mxu1 %v2030_v32  ;;  %v3136_v32 = vunpack.i.h.bf16 %v4222_v17  ;;  %v3156_v17 = vunpack.i.h.bf16 %v4231_v49 }
 0x3b7   : > { %v3164_v41 = vpop.permute.xlu0 %3163 }
 0x3b8   : > { %v3165_v48 = vunpack.i.l.bf16 %v3164_v41  ;;  %v4251_v56 = vpop.permute.xlu1 %3173  ;;  %v4253_v37 = vpop.permute.xlu2 %3213  ;;  %v3166_v63 = vunpack.i.h.bf16 %v3164_v41  ;;  %v3116_v41 = vunpack.i.h.bf16 %v4229_v26  ;;  %v3075_v26 = vunpack.i.l.bf16 %v4189_v34 }
 0x3b9   : > { %v3216_v20 = vunpack.i.h.bf16 %v4253_v37  ;;  %v3215_v62 = vunpack.i.l.bf16 %v4253_v37  ;;  %v3125_v34 = vunpack.i.l.bf16 %v4233_v29  ;;  %v3195_v37 = vunpack.i.l.bf16 %v4242_v54 }
 0x3ba   : > { %v1745_v55 = vsel %vm4574_vm1, %v3131_v33, %v3165_v48  ;;  %v1746_v7 = vsel %vm4581_vm12, %v3165_v48, %v3166_v63  ;;  %vm4589_vm1 = vmmov %vm4585_vm11 }
 0x3bb   : > { %1775 = vmatpush.msra.mxu3 %v1745_v55  ;;  %v2028_v31 = vsel %vm4575_vm2, %v3105_v16, %v3216_v20  ;;  %v3095_v55 = vunpack.i.l.bf16 %v4225_v42  ;;  %vm4590_vm2 = vcmask 891904   ;;  %v2031_v8 = vsel %vm4591_vm3, %v3151_v2, %v3215_v62  ;;  %vm4592_vm4 = vmmov %vm4589_vm1 }
 0x3bc   : > { %2060 = vmatpush.msra.mxu1 %v2028_v31  ;;  %v3096_v31 = vunpack.i.h.bf16 %v4225_v42  ;;  %v3121_v42 = vunpack.i.h.bf16 %v4207_v18  ;;  %vm4593_vm5 = vmmov %vm4590_vm2  ;;  %v3140_v2 = vunpack.i.l.bf16 %v4227_v58 }
 0x3bd   : > { %1776 = vmatpush.msra.mxu3 %v1743_v1  ;;  %v1914_v1 = vsel %vm4587_vm14, %v3086_v22, %v3095_v55  ;;  %vm4594_vm6 = vmmov %vm4590_vm2 }
 0x3be   : > { %2061 = vmatpush.msra.mxu1 %v2026_v52  ;;  %vm4595_vm7 = vmmov %vm4589_vm1 }
 0x3bf   : > { %v4281_v27 = vpop.permute.xlu0 %3168  ;;  %1777 = vmatpush.msra.mxu3 %v1741_v24  ;;  %vm4596_vm12 = vmmov %vm4591_vm3 }
 0x3c0   : > { %v4290_v0 = vpop.permute.xlu1 %3188  ;;  %2062 = vmatpush.msra.mxu1 %v2024_v25  ;;  %v4312_v12 = vpop.permute.xlu2 %3218  ;;  %v3181_v25 = vunpack.i.h.bf16 %v4237_v4  ;;  %vm4597_vm8 = vmmov %vm4590_vm2 }
 0x3c1   : > { %1778 = vmatpush.msra.mxu3 %v1739_v5  ;;  %2995 = vmatmul.msk.f32.vlgmr.msra.gmra.mxu1 %vm1759_vm0, %v4301_v47  ;;  %vm4599_vm10 = vmmov %vm4590_vm2 }
 0x3c2   : > { %2984 = vmatmul.msk.f32.vlgmr.msra.gmra.mxu3 %vm1759_vm0, %v2983_v44  ;;  %vm4602_vm14 = vmmov %vm4590_vm2 }
 0x3c3   : > { %1795 = vmatpush.msrb.mxu3 %v1746_v7  ;;  %v1915_v7 = vsel %vm4595_vm7, %v3095_v55, %v3096_v31 }
 0x3c5   : > { %1796 = vmatpush.msrb.mxu3 %v1744_v39 }
 0x3c7   : > { %1797 = vmatpush.msrb.mxu3 %v1742_v23  ;;  %v4306_v14 = vpop.permute.xlu0 %3183  ;;  %v3155_v23 = vunpack.i.l.bf16 %v4231_v49 }
 0x3c8   : > { %v4308_v15 = vpop.permute.xlu1 %3208  ;;  %v4332_v3 = vpop.permute.xlu2 %3233  ;;  %v3186_v55 = vunpack.i.h.bf16 %v4306_v14 }
 0x3c9   : > { %1798 = vmatpush.msrb.mxu3 %v1740_v38 }
 0x3ca   : > { %2985 = vmatmul.msk.f32.vlgmr.msrb.gmra.mxu3 %vm1759_vm0, %v2983_v44 }
 0x3cb   : > { %1815 = vmatpush.msra.mxu3 %v3166_v63 }
 0x3cd   : > { %1816 = vmatpush.msra.mxu3 %v3130_v46 }
 0x3cf   : > { %1817 = vmatpush.msra.mxu3 %v3091_v30  ;;  %v3199_v33 = vpop.permute.xlu0 %3198 }
 0x3d0   : > { %v3201_v35 = vunpack.i.h.bf16 %v3199_v33  ;;  %v3200_v48 = vunpack.i.l.bf16 %v3199_v33  ;;  %v4317_v16 = vpop.permute.xlu1 %3228  ;;  %v4376_v58 = vpop.permute.xlu2 %3263  ;;  %v3160_v33 = vunpack.i.l.bf16 %v4240_v43 }
 0x3d1   : > { %1818 = vmatpush.msra.mxu3 %v3080_v13  ;;  %v3196_v13 = vunpack.i.h.bf16 %v4242_v54 }
 0x3d2   : > { %1987 = vmatpush.msra.mxu0 %v3201_v35  ;;  %v1918_v45 = vsel %vm4585_vm11, %v3136_v32, %v3200_v48  ;;  %2986 = vmatmul.msk.f32.vlgmr.msra.gmra.mxu3 %vm1759_vm0, %v2983_v44  ;;  %v1919_v63 = vsel %vm4588_vm15, %v3200_v48, %v3201_v35  ;;  %v2142_v44 = vsel %vm4590_vm2, %v3146_v61, %v3156_v17  ;;  %v3145_v32 = vunpack.i.l.bf16 %v4235_v36  ;;  %vm4600_vm11 = vmmov %vm4591_vm3 }
 0x3d3   : > { %1838 = vmatpush.msrb.mxu3 %v4114_v51  ;;  %1947 = vmatpush.msrb.mxu2 %v1918_v45  ;;  %v1916_v51 = vsel %vm4586_vm13, %v3115_v53, %v3116_v41  ;;  %v2025_v29 = vsel %vm4600_vm11, %v3101_v11, %v3140_v2  ;;  %vm4601_vm13 = vmmov %vm4590_vm2  ;;  %v3170_v53 = vunpack.i.l.bf16 %v4281_v27  ;;  %v3176_v48 = vunpack.i.h.bf16 %v4251_v56 }
 0x3d4   : > { %1988 = vmatpush.msra.mxu0 %v3135_v40  ;;  %v2136_v54 = vsel %vm4601_vm13, %v3196_v13, %v3195_v37  ;;  %vm4603_vm15 = vmmov %vm4590_vm2  ;;  %v3235_v45 = vunpack.i.l.bf16 %v4332_v3  ;;  %v3191_v61 = vunpack.i.h.bf16 %v4290_v0 }
 0x3d5   : > { %1839 = vmatpush.msrb.mxu3 %v4090_v28  ;;  %1948 = vmatpush.msrb.mxu2 %v1916_v51  ;;  %v3120_v28 = vunpack.i.l.bf16 %v4207_v18  ;;  %v2990_v18 = vld [vmem:[%s4552_s2 + $0x8] sm:$0xf]  ;;  %v2137_v6 = vsel %vm4603_vm15, %v3195_v37, %v3145_v32 }
 0x3d6   : > { %1989 = vmatpush.msra.mxu0 %v3096_v31 }
 0x3d7   : > { %1840 = vmatpush.msrb.mxu3 %v4031_v19  ;;  %v4338_v52 = vpop.permute.xlu0 %3203  ;;  %1949 = vmatpush.msrb.mxu2 %v1914_v1  ;;  %v1912_v19 = vsel %vm4589_vm1, %v3075_v26, %v3076_v10  ;;  %v3180_v10 = vunpack.i.l.bf16 %v4237_v4  ;;  %v2140_v5 = vsel %vm4593_vm5, %v3121_v42, %v3120_v28  ;;  %v2029_v4 = vsel %vm4596_vm12, %v3216_v20, %v3125_v34 }
 0x3d8   : > { %v4342_v24 = vpop.permute.xlu1 %3243  ;;  %1990 = vmatpush.msra.mxu0 %v3085_v21  ;;  %v1917_v21 = vsel %vm4592_vm4, %v3116_v41, %v3135_v40  ;;  %vm4604_vm1 = vcmask 883712   ;;  %v3175_v40 = vunpack.i.l.bf16 %v4251_v56  ;;  %v3185_v26 = vunpack.i.l.bf16 %v4306_v14  ;;  %v3269_v31 = vpop.permute.xlu2 %3268 }
 0x3d9   : > { %1841 = vmatpush.msrb.mxu3 %v3966_v59  ;;  %v3245_v59 = vunpack.i.l.bf16 %v4342_v24  ;;  %1950 = vmatpush.msrb.mxu2 %v1912_v19  ;;  %v3246_v46 = vunpack.i.h.bf16 %v4342_v24  ;;  %v2138_v39 = vsel %vm4597_vm8, %v3181_v25, %v3180_v10  ;;  %v2139_v36 = vsel %vm4602_vm14, %v3180_v10, %v3155_v23  ;;  %vm4605_vm2 = vmmov %vm4604_vm1 }
 0x3da   : > { %2171 = vmatpush.msrb.mxu0 %v2142_v44  ;;  %2991 = vmatmul.msk.f32.vlgmr.msrb.gmra.mxu2 %vm1759_vm0, %v2990_v18  ;;  %vm4606_vm3 = vmmov %vm4604_vm1  ;;  %v3270_v1 = vunpack.i.l.bf16 %v3269_v31  ;;  %v3190_v42 = vunpack.i.l.bf16 %v4290_v0  ;;  %v3206_v14 = vunpack.i.h.bf16 %v4338_v52  ;;  %v3205_v24 = vunpack.i.l.bf16 %v4338_v52 }
 0x3db   : > { %1967 = vmatpush.msra.mxu3 %v1919_v63  ;;  %2079 = vmatpush.msra.mxu2 %v2031_v8  ;;  %v2143_v30 = vsel %vm4594_vm6, %v3156_v17, %v3245_v59  ;;  %v2141_v20 = vsel %vm4599_vm10, %v3120_v28, %v3246_v46  ;;  %v3236_v28 = vunpack.i.h.bf16 %v4332_v3  ;;  %vm4607_vm4 = vmmov %vm4604_vm1  ;;  %vm4609_vm6 = vcmask 752640  }
 0x3dc   : > { %2987 = vmatmul.msk.f32.vlgmr.msrb.gmra.mxu3 %vm1759_vm0, %v4258_v50  ;;  %2172 = vmatpush.msrb.mxu0 %v2140_v5  ;;  %v2027_v50 = vsel %vm4598_vm9, %v3126_v9, %v3100_v57  ;;  %vm4608_vm5 = vmmov %vm4604_vm1  ;;  %v3211_v0 = vunpack.i.h.bf16 %v4308_v15  ;;  %v3210_v25 = vunpack.i.l.bf16 %v4308_v15  ;;  %v3271_v44 = vunpack.i.h.bf16 %v3269_v31 }
 0x3dd   : > { %1968 = vmatpush.msra.mxu3 %v1917_v21  ;;  %2080 = vmatpush.msra.mxu2 %v2029_v4  ;;  %v2251_v19 = vsel %vm4608_vm5, %v3186_v55, %v3235_v45  ;;  %vm4610_vm7 = vmmov %vm4604_vm1  ;;  %vm4611_vm12 = vcmask 744448   ;;  %v3266_v8 = vunpack.i.h.bf16 %v4376_v58  ;;  %v3221_v15 = vunpack.i.h.bf16 %v4312_v12 }
 0x3de   : > { %2191 = vmatpush.msrb.mxu1 %v2143_v30  ;;  %2173 = vmatpush.msrb.mxu0 %v2138_v39  ;;  %v2250_v3 = vsel %vm4610_vm7, %v3185_v26, %v3186_v55  ;;  %vm4612_vm8 = vmmov %vm4604_vm1  ;;  %v3220_v10 = vunpack.i.l.bf16 %v4312_v12  ;;  %v3231_v39 = vunpack.i.h.bf16 %v4317_v16 }
 0x3df   : > { %1969 = vmatpush.msra.mxu3 %v1915_v7  ;;  %2081 = vmatpush.msra.mxu2 %v2027_v50  ;;  %v4384_v38 = vpop.permute.xlu0 %3223  ;;  %vm4613_vm9 = vmmov %vm4609_vm6 }
 0x3e0   : > { %2192 = vmatpush.msrb.mxu1 %v2141_v20  ;;  %v3254_v49 = vpop.permute.xlu1 %3253  ;;  %2993 = vmatmul.msk.f32.vlgmr.msra.gmra.mxu0 %vm1759_vm0, %v2990_v18  ;;  %v2364_v21 = vsel %vm4613_vm9, %v3190_v42, %v3191_v61  ;;  %vm4614_vm10 = vmmov %vm4604_vm1  ;;  %v4445_v7 = vpop.permute.xlu2 %3278  ;;  %v3225_v37 = vunpack.i.l.bf16 %v4384_v38  ;;  %vm4628_vm9 = vcmask 736256  }
 0x3e1   : > { %1970 = vmatpush.msra.mxu3 %v4202_v60  ;;  %v3255_v9 = vunpack.i.l.bf16 %v3254_v49  ;;  %2082 = vmatpush.msra.mxu2 %v2025_v29  ;;  %v3161_v60 = vunpack.i.h.bf16 %v4240_v43  ;;  %v3256_v41 = vunpack.i.h.bf16 %v3254_v49  ;;  %v3171_v43 = vunpack.i.h.bf16 %v4281_v27  ;;  %v2998_v27 = vld [vmem:[%s4552_s2 + $0x10] sm:$0xf]  ;;  %vm4615_vm11 = vmmov %vm4609_vm6 }
 0x3e2   : > { %2174 = vmatpush.msrb.mxu0 %v2136_v54  ;;  %2193 = vmatpush.msrb.mxu1 %v2139_v36  ;;  %v2362_v12 = vsel %vm4615_vm11, %v3210_v25, %v3211_v0  ;;  %vm4616_vm13 = vmmov %vm4611_vm12  ;;  %v3280_v26 = vunpack.i.l.bf16 %v4445_v7 }
 0x3e3   : > { %2099 = vmatpush.msrb.mxu3 %v3215_v62  ;;  %2211 = vmatpush.msrb.mxu2 %v3245_v59  ;;  %v2255_v11 = vsel %vm4604_vm1, %v3161_v60, %v3255_v9  ;;  %v2254_v35 = vsel %vm4605_vm2, %v3160_v33, %v3161_v60  ;;  %v2253_v51 = vsel %vm4606_vm3, %v3171_v43, %v3256_v41  ;;  %v3265_v62 = vunpack.i.l.bf16 %v4376_v58  ;;  %vm4617_vm14 = vmmov %vm4611_vm12 }
 0x3e4   : > { %2992 = vmatmul.msk.f32.vlgmr.msra.gmra.mxu3 %vm1759_vm0, %v2990_v18  ;;  %2996 = vmatmul.msk.f32.vlgmr.msra.gmra.mxu2 %vm1759_vm0, %v4301_v47  ;;  %v2252_v63 = vsel %vm4607_vm4, %v3170_v53, %v3171_v43  ;;  %v2366_v18 = vsel %vm4609_vm6, %v3175_v40, %v3176_v48  ;;  %v3230_v59 = vunpack.i.l.bf16 %v4317_v16  ;;  %vm4618_vm15 = vmmov %vm4609_vm6  ;;  %v3226_v16 = vunpack.i.h.bf16 %v4384_v38  ;;  %v3006_v38 = vld [vmem:[%s4552_s2 + $0x18] sm:$0xf] }
 0x3e5   : > { %2100 = vmatpush.msrb.mxu3 %v3125_v34  ;;  %2194 = vmatpush.msrb.mxu1 %v2137_v6  ;;  %v2478_v52 = vsel %vm4611_vm12, %v3270_v1, %v3265_v62  ;;  %v2249_v34 = vsel %vm4612_vm8, %v3206_v14, %v3236_v28  ;;  %vm4619_vm1 = vmmov %vm4609_vm6  ;;  %v3281_v6 = vunpack.i.h.bf16 %v4445_v7 }
 0x3e6   : > { %2212 = vmatpush.msrb.mxu2 %v3246_v46  ;;  %2303 = vmatpush.msra.mxu0 %v2255_v11  ;;  %v2248_v46 = vsel %vm4614_vm10, %v3205_v24, %v3206_v14  ;;  %v2476_v4 = vsel %vm4616_vm13, %v3271_v44, %v3230_v59  ;;  %vm4620_vm2 = vmmov %vm4619_vm1 }
 0x3e7   : > { %2101 = vmatpush.msrb.mxu3 %v3100_v57  ;;  %2323 = vmatpush.msra.mxu1 %v3255_v9  ;;  %v4407_v22 = vpop.permute.xlu0 %3238  ;;  %vm4621_vm3 = vmmov %vm4611_vm12 }
 0x3e8   : > { %2213 = vmatpush.msrb.mxu2 %v3155_v23  ;;  %v4414_v17 = vpop.permute.xlu1 %3258  ;;  %2304 = vmatpush.msra.mxu0 %v2253_v51  ;;  %v2479_v23 = vsel %vm4617_vm14, %v3265_v62, %v3266_v8  ;;  %v3240_v20 = vunpack.i.l.bf16 %v4407_v22  ;;  %v3241_v29 = vunpack.i.h.bf16 %v4407_v22  ;;  %vm4622_vm4 = vmmov %vm4621_vm3  ;;  %v3299_v55 = vpop.permute.xlu2 %3298  ;;  %v3010_v22 = vld [vmem:[%s4552_s2 + $0x1c] sm:$0xf] }
 0x3e9   : > { %2102 = vmatpush.msrb.mxu3 %v3140_v2  ;;  %2324 = vmatpush.msra.mxu1 %v3256_v41  ;;  %v3002_v2 = vld [vmem:[%s4552_s2 + $0x14] sm:$0xf]  ;;  %v3260_v56 = vunpack.i.l.bf16 %v4414_v17  ;;  %v3261_v60 = vunpack.i.h.bf16 %v4414_v17  ;;  %v2477_v33 = vsel %vm4622_vm4, %v3230_v59, %v3231_v39  ;;  %vm4623_vm5 = vmmov %vm4619_vm1  ;;  %v3300_v51 = vunpack.i.l.bf16 %v3299_v55 }
 0x3ea   : > { %2999 = vmatmul.msk.f32.vlgmr.msrb.gmra.mxu0 %vm1759_vm0, %v2998_v27  ;;  %2214 = vmatpush.msrb.mxu2 %v3145_v32  ;;  %v2360_v32 = vsel %vm4619_vm1, %v3220_v10, %v3221_v15  ;;  %v2363_v41 = vsel %vm4623_vm5, %v3211_v0, %v3225_v37  ;;  %vm4624_vm6 = vmmov %vm4621_vm3  ;;  %v3301_v1 = vunpack.i.h.bf16 %v3299_v55  ;;  %vm2676_vm5 = vcmask 257152  }
 0x3eb   : > { %2283 = vmatpush.msra.mxu3 %v2254_v35  ;;  %2325 = vmatpush.msra.mxu1 %v3235_v45  ;;  %v2475_v43 = vsel %vm4624_vm6, %v3240_v20, %v3241_v29  ;;  %vm4625_vm7 = vmmov %vm4619_vm1  ;;  %vm2681_vm6 = vcmask 388352  }
 0x3ec   : > { %2305 = vmatpush.msra.mxu0 %v2251_v19  ;;  %2395 = vmatpush.msra.mxu2 %v2366_v18  ;;  %v2361_v35 = vsel %vm4625_vm7, %v3221_v15, %v3226_v16  ;;  %vm4626_vm12 = vmmov %vm4621_vm3  ;;  %v3014_v19 = vld [vmem:[%s4552_s2 + $0x20] sm:$0xf]  ;;  %vm2686_vm7 = vcmask 519552  }
 0x3ed   : > { %2284 = vmatpush.msra.mxu3 %v2252_v63  ;;  %2326 = vmatpush.msra.mxu1 %v3236_v28  ;;  %vm4627_vm8 = vmmov %vm4621_vm3 }
 0x3ee   : > { %2997 = vmatmul.msk.f32.vlgmr.msrb.gmra.mxu3 %vm1759_vm0, %v4301_v47  ;;  %3000 = vmatmul.msk.f32.vlgmr.msrb.gmra.mxu1 %vm1759_vm0, %v2998_v27  ;;  %v2473_v40 = vsel %vm4627_vm8, %v3260_v56, %v3261_v60  ;;  %vm4629_vm10 = vmmov %vm4628_vm9  ;;  %vm2696_vm8 = vcmask 781952  }
 0x3ef   : > { %2285 = vmatpush.msra.mxu3 %v2250_v3  ;;  %2306 = vmatpush.msra.mxu0 %v2249_v34  ;;  %v3249_v5 = vpop.permute.xlu0 %3248  ;;  %vm4630_vm11 = vmmov %vm4628_vm9  ;;  %v1863_v34 = vpop.f32.mrf.mxu0 }
 0x3f0   : > { %2396 = vmatpush.msra.mxu2 %v2364_v21  ;;  %2507 = vmatpush.msrb.mxu1 %v2478_v52  ;;  %v3251_v30 = vunpack.i.h.bf16 %v3249_v5  ;;  %v3250_v57 = vunpack.i.l.bf16 %v3249_v5  ;;  %v3274_v47 = vpop.permute.xlu1 %3273  ;;  %v2587_v42 = vsel %vm4630_vm11, %v3300_v51, %v3280_v26  ;;  %vm4631_vm13 = vmmov %vm4628_vm9  ;;  %v1883_v21 = vpop.f32.mrf.mxu1  ;;  %vm2712_vm11 = vcmask 1044352  }
 0x3f1   : > { %2286 = vmatpush.msra.mxu3 %v2248_v46  ;;  %3001 = vmatmul.msk.f32.vlgmr.msrb.gmra.mxu2 %vm1759_vm0, %v2998_v27  ;;  %v3275_v13 = vunpack.i.l.bf16 %v3274_v47  ;;  %v3276_v54 = vunpack.i.h.bf16 %v3274_v47  ;;  %vm4632_vm14 = vmmov %vm4628_vm9 }
 0x3f2   : > { %2397 = vmatpush.msra.mxu2 %v2362_v12  ;;  %2508 = vmatpush.msrb.mxu1 %v2476_v4  ;;  %v2367_v50 = vsel %vm4618_vm15, %v3176_v48, %v3250_v57  ;;  %v2365_v49 = vsel %vm4620_vm2, %v3191_v61, %v3251_v30  ;;  %vm4633_vm15 = vmmov %vm4628_vm9 }
 0x3f3   : > { %3004 = vmatmul.msk.f32.vlgmr.msra.gmra.mxu0 %vm1759_vm0, %v3002_v2  ;;  %2415 = vmatpush.msrb.mxu3 %v2367_v50  ;;  %v2474_v9 = vsel %vm4621_vm3, %v3275_v13, %v3240_v20  ;;  %v2472_v48 = vsel %vm4626_vm12, %v3276_v54, %v3260_v56  ;;  %v2586_v24 = vsel %vm4633_vm15, %v3301_v1, %v3300_v51  ;;  %vm4634_vm1 = vmmov %vm4628_vm9  ;;  %vm4636_vm3 = vcmask 1043456  }
 0x3f4   : > { %2398 = vmatpush.msra.mxu2 %v2360_v32  ;;  %2435 = vmatpush.msrb.mxu0 %v3250_v57  ;;  %vm4635_vm2 = vmmov %vm4634_vm1  ;;  %vm2691_vm12 = vcmask 650752  }
 0x3f5   : > { %2416 = vmatpush.msrb.mxu3 %v2365_v49  ;;  %2509 = vmatpush.msrb.mxu1 %v2474_v9  ;;  %vm4637_vm4 = vmmov %vm4636_vm3 }
 0x3f6   : > { %2527 = vmatpush.msrb.mxu2 %v2479_v23  ;;  %3003 = vmatmul.msk.f32.vlgmr.msra.gmra.mxu3 %vm1759_vm0, %v3002_v2 }
 0x3f7   : > { %3005 = vmatmul.msk.f32.vlgmr.msra.gmra.mxu1 %vm1759_vm0, %v3002_v2  ;;  %2436 = vmatpush.msrb.mxu0 %v3251_v30  ;;  %v3284_v36 = vpop.permute.xlu0 %3283 }
 0x3f8   : > { %2528 = vmatpush.msrb.mxu2 %v2477_v33  ;;  %2417 = vmatpush.msrb.mxu3 %v2363_v41  ;;  %v3294_v11 = vpop.permute.xlu1 %3293  ;;  %v3285_v53 = vunpack.i.l.bf16 %v3284_v36  ;;  %v3286_v45 = vunpack.i.h.bf16 %v3284_v36 }
 0x3f9   : > { %3007 = vmatmul.msk.f32.vlgmr.msra.gmra.mxu2 %vm1759_vm0, %v3006_v38  ;;  %2437 = vmatpush.msrb.mxu0 %v3225_v37  ;;  %v3295_v27 = vunpack.i.l.bf16 %v3294_v11  ;;  %v3296_v58 = vunpack.i.h.bf16 %v3294_v11 }
 0x3fa   : > { %2529 = vmatpush.msrb.mxu2 %v2475_v43  ;;  %2418 = vmatpush.msrb.mxu3 %v2361_v35  ;;  %v2591_v31 = vsel %vm4628_vm9, %v3281_v6, %v3285_v53  ;;  %vm2701_vm9 = vcmask 913152  }
 0x3fb   : > { %2438 = vmatpush.msrb.mxu0 %v3226_v16  ;;  %2510 = vmatpush.msrb.mxu1 %v2472_v48  ;;  %v2589_v61 = vsel %vm4629_vm10, %v3295_v27, %v3286_v45  ;;  %v2588_v63 = vsel %vm4632_vm14, %v3296_v58, %v3295_v27  ;;  %vm2709_vm10 = vcmask 932864  }
 0x3fc   : > { %2547 = vmatpush.msra.mxu3 %v3266_v8  ;;  %3009 = vmatmul.msk.f32.vlgmr.msrb.gmra.mxu0 %vm1759_vm0, %v3006_v38 }
 0x3fd   : > { %2530 = vmatpush.msrb.mxu2 %v2473_v40  ;;  %2639 = vmatpush.msra.mxu1 %v2591_v31 }
 0x3fe   : > { %2548 = vmatpush.msra.mxu3 %v3231_v39 }
 0x3ff   : > { %3008 = vmatmul.msk.f32.vlgmr.msrb.gmra.mxu3 %vm1759_vm0, %v3006_v38  ;;  %3011 = vmatmul.msk.f32.vlgmr.msrb.gmra.mxu1 %vm1759_vm0, %v3010_v22  ;;  %v3289_v17 = vpop.permute.xlu0 %3288 }
 0x400   : > { %2659 = vmatpush.msra.mxu2 %v3285_v53  ;;  %2549 = vmatpush.msra.mxu3 %v3241_v29  ;;  %v3291_v62 = vunpack.i.h.bf16 %v3289_v17  ;;  %v3290_v28 = vunpack.i.l.bf16 %v3289_v17 }
 0x401   : > { %3012 = vmatmul.msk.f32.vlgmr.msrb.gmra.mxu2 %vm1759_vm0, %v3010_v22  ;;  %2640 = vmatpush.msra.mxu1 %v2589_v61 }
 0x402   : > { %2550 = vmatpush.msra.mxu3 %v3261_v60  ;;  %2660 = vmatpush.msra.mxu2 %v3286_v45  ;;  %v2590_v14 = vsel %vm4631_vm13, %v3291_v62, %v3281_v6  ;;  %vm2744_vm13 = vcmask 818176  }
 0x403   : > { %2619 = vmatpush.msra.mxu0 %v2590_v14  ;;  %2641 = vmatpush.msra.mxu1 %v2587_v42 }
 0x404   : > { %2661 = vmatpush.msra.mxu2 %v3280_v26 }
 0x405   : > { %2620 = vmatpush.msra.mxu0 %v2588_v63 }
 0x406   : > { %2662 = vmatpush.msra.mxu2 %v3290_v28 }
 0x407   : > { %3013 = vmatmul.msk.f32.vlgmr.msra.gmra.mxu3 %vm1759_vm0, %v3010_v22  ;;  %v3304_v18 = vpop.permute.xlu0 %3303  ;;  %2621 = vmatpush.msra.mxu0 %v2586_v24 }
 0x408   : > { %v3306_v0 = vunpack.i.h.bf16 %v3304_v18  ;;  %v3305_v3 = vunpack.i.l.bf16 %v3304_v18 }
 0x409   : > { %3017 = vmatmul.msk.f32.vlgmr.msra.gmra.mxu2 %vm1759_vm0, %v3014_v19 }
 0x40a   : > { %v2584_v25 = vsel %vm4634_vm1, %v3306_v0, %v3305_v3  ;;  %v2585_v59 = vsel %vm4635_vm2, %v3305_v3, %v3290_v28 }
 0x40b   : > { %2622 = vmatpush.msra.mxu0 %v2584_v25  ;;  %2642 = vmatpush.msra.mxu1 %v2585_v59 }
 0x40c   : > { %3015 = vmatmul.msk.f32.vlgmr.msra.gmra.mxu0 %vm1759_vm0, %v3014_v19  ;;  %3016 = vmatmul.msk.f32.vlgmr.msra.gmra.mxu1 %vm1759_vm0, %v3014_v19  ;;  %vm2670_vm0 = vcmask 125952  }
 0x43e   : > { %v2064_v5 = vpop.f32.mrf.mxu1 }
 0x445   : > { %v1780_v44 = vpop.f32.mrf.mxu3 }
 0x44d   : > { %v1800_v52 = vpop.f32.mrf.mxu3 }
 0x44e   : > { %v1864_v37 = vadd.f32 %v1863_v34, %v1800_v52 }
 0x455   : > { %v1820_v8 = vpop.f32.mrf.mxu3 }
 0x456   : > { %v1884_v33 = vadd.f32 %v1883_v21, %v1820_v8 }
 0x45d   : > { %v1952_v10 = vpop.f32.mrf.mxu2  ;;  %v1992_v46 = vpop.f32.mrf.mxu0 }
 0x45e   : > { %v1997_v11 = vadd.f32 %v1992_v46, %v1884_v33 }
 0x45f   : > { %v1843_v15 = vpop.f32.mrf.mxu3 }
 0x460   : > { %v1844_v7 = vadd.f32 %v1843_v15, %v1780_v44 }
 0x462   : > { %v1995_v4 = vadd.f32 %v1952_v10, %v1844_v7 }
 0x464   : > { %v2107_v23 = vadd.f32 %v2064_v5, %v1995_v4 }
 0x467   : > { %v1972_v30 = vpop.f32.mrf.mxu3  ;;  %v2084_v57 = vpop.f32.mrf.mxu2 }
 0x468   : > { %v2176_v47 = vpop.f32.mrf.mxu0  ;;  %v1996_v16 = vadd.f32 %v1972_v30, %v1864_v37 }
 0x469   : > { %v2219_v32 = vadd.f32 %v2176_v47, %v2107_v23 }
 0x46a   : > { %v2108_v54 = vadd.f32 %v2084_v57, %v1996_v16 }
 0x46b   : > { %v2196_v2 = vpop.f32.mrf.mxu1 }
 0x46c   : > { %v2220_v38 = vadd.f32 %v2196_v2, %v2108_v54 }
 0x470   : > { %v2308_v39 = vpop.f32.mrf.mxu0 }
 0x471   : > { %v2104_v12 = vpop.f32.mrf.mxu3  ;;  %v2332_v43 = vadd.f32 %v2308_v39, %v2220_v38 }
 0x472   : > { %v2109_v35 = vadd.f32 %v2104_v12, %v1997_v11 }
 0x474   : > { %v2216_v13 = vpop.f32.mrf.mxu2  ;;  %v2328_v50 = vpop.f32.mrf.mxu1 }
 0x475   : > { %v2221_v45 = vadd.f32 %v2216_v13, %v2109_v35 }
 0x477   : > { %v2333_v26 = vadd.f32 %v2328_v50, %v2221_v45 }
 0x479   : > { %v2288_v20 = vpop.f32.mrf.mxu3  ;;  %v2440_v56 = vpop.f32.mrf.mxu0 }
 0x47a   : > { %v2331_v49 = vadd.f32 %v2288_v20, %v2219_v32  ;;  %v2445_v51 = vadd.f32 %v2440_v56, %v2333_v26 }
 0x47c   : > { %v2400_v29 = vpop.f32.mrf.mxu2  ;;  %v2512_v60 = vpop.f32.mrf.mxu1 }
 0x47d   : > { %v2443_v9 = vadd.f32 %v2400_v29, %v2331_v49 }
 0x47f   : > { %v2555_v36 = vadd.f32 %v2512_v60, %v2443_v9 }
 0x482   : > { %v2420_v41 = vpop.f32.mrf.mxu3 }
 0x483   : > { %v2444_v48 = vadd.f32 %v2420_v41, %v2332_v43 }
 0x484   : > { %v2532_v40 = vpop.f32.mrf.mxu2 }
 0x485   : > { %v2556_v22 = vadd.f32 %v2532_v40, %v2444_v48 }
 0x489   : > { %v2624_v6 = vpop.f32.mrf.mxu0  ;;  %v2644_v55 = vpop.f32.mrf.mxu1 }
 0x48a   : > { %v2667_v53 = vadd.f32 %v2624_v6, %v2555_v36  ;;  %v2668_v27 = vadd.f32 %v2644_v55, %v2556_v22  ;;  %v2552_v31 = vpop.f32.mrf.mxu3 }
 0x48b   : > { %v2557_v58 = vadd.f32 %v2552_v31, %v2445_v51 }
 0x48c   : > { %2683 = vrot.lane.b32.xlu0 %v2667_v53, %s3340_s19  ;;  %2678 = vrot.lane.b32.xlu1 %v2667_v53, %s3341_s7  ;;  %2671 = vst.msk [vmem:[%s4510_s30] sm:$0xf] %vm2670_vm0, %v2667_v53  ;;  %v2664_v17 = vpop.f32.mrf.mxu2  ;;  %v2704_v62 = vrot.slane %v2668_v27, 4 }
 0x48d   : > { %2673 = vrot.lane.b32.xlu2 %v2667_v53, %s3333_s8  ;;  %v2669_v61 = vadd.f32 %v2664_v17, %v2557_v58  ;;  %s3346_s8 = smov 104  }
 0x48e   : > { %v2705_v42 = vsel %vm4636_vm3, %v2667_v53, %v2704_v62 }
 0x48f   : > { %v2739_v1 = vrot.slane %v2669_v61, 4 }
 0x491   : > { %v2740_v28 = vsel %vm4637_vm4, %v2668_v27, %v2739_v1 }
 0x494   : > { %2688 = vrot.lane.b32.xlu0 %v2667_v53, %s3342_s13  ;;  %2714 = vrot.lane.b32.xlu1 %v2668_v27, %s3343_s14 }
 0x495   : > { %2722 = vrot.lane.b32.xlu2 %v2668_v27, %s3336_s11  ;;  %s3347_s11 = smov 114  }
 0x49c   : > { %2693 = vrot.lane.b32.xlu0 %v2667_v53, %s3344_s10  ;;  %2726 = vrot.lane.b32.xlu1 %v2668_v27, %s3345_s17 }
 0x49d   : > { %2730 = vrot.lane.b32.xlu2 %v2668_v27, %s3346_s8 }
 0x4a4   : > { %2718 = vrot.lane.b32.xlu0 %v2668_v27, %s3334_s9  ;;  %2706 = vrot.lane.b32.xlu1 %v2705_v42, %s3347_s11 }
 0x4a5   : > { %2741 = vrot.lane.b32.xlu2 %v2740_v28, %s3348_s18 }
 0x4ac   : > { %2748 = vrot.lane.b32.xlu0 %v2669_v61, %s3349_s22  ;;  %2734 = vrot.lane.b32.xlu1 %v2668_v27, %s3350_s4 }
 0x4ad   : > { %2698 = vrot.lane.b32.xlu2 %v2667_v53, %s3351_s5 }
 0x4e7   : > { %v2674_v14 = vpop.permute.xlu2 %2673 }
 0x4e8   : > { %2677 = vst.msk [vmem:[%s4510_s30] sm:$0xf] %vm2676_vm5, %v2674_v14 }
 0x4ef   : > { %v2723_v63 = vpop.permute.xlu2 %2722 }
 0x4f7   : > { %v2731_v24 = vpop.permute.xlu2 %2730 }
 0x4fe   : > { %v2684_v19 = vpop.permute.xlu0 %2683  ;;  %v2679_v18 = vpop.permute.xlu1 %2678 }
 0x4ff   : > { %2682 = vst.msk [vmem:[%s4510_s30] sm:$0xf] %vm2681_vm6, %v2679_v18  ;;  %v2742_v0 = vpop.permute.xlu2 %2741 }
 0x500   : > { %2687 = vst.msk [vmem:[%s4510_s30] sm:$0xf] %vm2686_vm7, %v2684_v19  ;;  %v2743_v10 = vrot.slane %v2742_v0, 4 }
 0x502   : > { %v2745_v5 = vsel %vm2744_vm13, %v2742_v0, %v2743_v10 }
 0x506   : > { %v2689_v3 = vpop.permute.xlu0 %2688  ;;  %v2715_v25 = vpop.permute.xlu1 %2714 }
 0x507   : > { %2692 = vst.msk [vmem:[%s4510_s30] sm:$0xf] %vm2691_vm12, %v2689_v3  ;;  %v2699_v52 = vpop.permute.xlu2 %2698 }
 0x508   : > { %2717 = vst.msk [vmem:[%s4510_s30 + $0x4] sm:$0xf] %vm2670_vm0, %v2715_v25 }
 0x50e   : > { %v2694_v59 = vpop.permute.xlu0 %2693  ;;  %v2727_v44 = vpop.permute.xlu1 %2726 }
 0x50f   : > { %2697 = vst.msk [vmem:[%s4510_s30] sm:$0xf] %vm2696_vm8, %v2694_v59 }
 0x510   : > { %2702 = vst.msk [vmem:[%s4510_s30] sm:$0xf] %vm2701_vm9, %v2699_v52 }
 0x516   : > { %v2719_v8 = vpop.permute.xlu0 %2718  ;;  %v2707_v34 = vpop.permute.xlu1 %2706 }
 0x517   : > { %2721 = vst.msk [vmem:[%s4510_s30 + $0x4] sm:$0xf] %vm2676_vm5, %v2719_v8  ;;  %v2708_v21 = vrot.slane %v2707_v34, 4 }
 0x518   : > { %2725 = vst.msk [vmem:[%s4510_s30 + $0x4] sm:$0xf] %vm2681_vm6, %v2723_v63 }
 0x519   : > { %2729 = vst.msk [vmem:[%s4510_s30 + $0x4] sm:$0xf] %vm2686_vm7, %v2727_v44  ;;  %v2710_v15 = vsel %vm2709_vm10, %v2707_v34, %v2708_v21 }
 0x51a   : > { %2713 = vst.msk [vmem:[%s4510_s30] sm:$0xf] %vm2712_vm11, %v2710_v15 }
 0x51b   : > { %2733 = vst.msk [vmem:[%s4510_s30 + $0x4] sm:$0xf] %vm2691_vm12, %v2731_v24 }
 0x51e   : > { %v2735_v46 = vpop.permute.xlu1 %2734  ;;  %v2749_v30 = vpop.permute.xlu0 %2748 }
 0x51f   : > { %2737 = vst.msk [vmem:[%s4510_s30 + $0x4] sm:$0xf] %vm2696_vm8, %v2735_v46 }
 0x520   : > { %2747 = vst.msk [vmem:[%s4510_s30 + $0x4] sm:$0xf] %vm2701_vm9, %v2745_v5 }
 0x521   : > { %2751 = vst.msk [vmem:[%s4510_s30 + $0x4] sm:$0xf] %vm2712_vm11, %v2749_v30 }
 0x522 PF: > { %s13_s12 = sadd.s32 1, %s3313_s12  }
 0x523   : > { %p10_p4 = scmp.ge.s32.totalorder %s13_s12, 4  }
 0x525   :  { %12 = sbr.rel (!%p10_p4) target bundleno = 1 (0x1), region = 87 }

</bundles_post_ra>
